<compile_context>
chip_gen: v6e
topology: v6e:2x2x1
jax: 0.10.0
libtpu: 0.0.40
codegen_flags: <defaults>
</compile_context>

<pallas_src>
import numpy as np
import jax
import jax.numpy as jnp
from jax.experimental import pallas as pl
from jax.experimental.pallas import tpu as pltpu


def down_kernel(x_ref, w1_ref, sh1_ref, w2_ref, sh2_ref, o_ref,
                pad1_ref, pad2_ref):
    Nb, H, W, Cin = x_ref.shape
    Hp, Wp = H // 2, W // 2
    Cout = sh1_ref.shape[-1]
    M = Nb * Hp * Wp

    # ---- zero only the 1-pixel halo of the padded scratches; interiors are fully overwritten.
    #      Done every step (not under program_id==0) so it stays correct when the batch grid
    #      axis is sharded across TensorCores ("parallel" semantics, v7x megacore). ----
    def zero_halo(pad_ref):
        c = pad_ref.shape[-1]
        zrow = jnp.zeros((Nb, 1, Wp + 2, c), jnp.float32)
        pad_ref[:, 0:1, :, :] = zrow
        pad_ref[:, Hp + 1:Hp + 2, :, :] = zrow
        zcol = jnp.zeros((Nb, Hp + 2, 1, c), jnp.float32)
        pad_ref[:, :, 0:1, :] = zcol
        pad_ref[:, :, Wp + 1:Wp + 2, :] = zcol

    zero_halo(pad1_ref)
    zero_halo(pad2_ref)

    # ---- MaxPool2d(kernel=2, stride=2) over all Nb images at once ----
    x = x_ref[...]                                              # (Nb, H, W, Cin)
    xw = jnp.max(x.reshape(Nb * H, Wp, 2, Cin), axis=2)         # pool along W
    pooled = jnp.max(xw.reshape(Nb * Hp, 2, Wp, Cin), axis=1)   # pool along H
    pad1_ref[:, 1:Hp + 1, 1:Wp + 1, :] = pooled.reshape(Nb, Hp, Wp, Cin)

    # ---- 3x3 'same' conv as 9 accumulated MXU matmuls (no im2col staging buffer),
    #      with folded bias/BN shift + ReLU ----
    def conv_bn_relu(pad_ref, w_ref, sh_ref):
        c = pad_ref.shape[-1]
        acc = None
        for k in range(9):
            dy, dx = divmod(k, 3)
            patch = pad_ref[:, dy:dy + Hp, dx:dx + Wp, :].reshape(M, c)
            part = jnp.dot(patch.astype(w_ref.dtype),            # (M, c) @ (c, Cout)
                           w_ref[k * c:(k + 1) * c, :],
                           preferred_element_type=jnp.float32)
            acc = part if acc is None else acc + part
        return jnp.maximum(acc + sh_ref[...], 0.0)               # folded bias+BN, ReLU

    y = conv_bn_relu(pad1_ref, w1_ref, sh1_ref)                  # (M, Cout)
    pad2_ref[:, 1:Hp + 1, 1:Wp + 1, :] = y.reshape(Nb, Hp, Wp, Cout)
    z = conv_bn_relu(pad2_ref, w2_ref, sh2_ref)                  # (M, Cout)

    o_ref[...] = z.astype(o_ref.dtype)


def _pick_nb(N, H, W, Cin, Cout, budget_bytes=20 << 20):
    """Largest per-step batch size whose estimated per-step VMEM footprint fits the budget.
    Also capped so the grid has >= 2 steps when N >= 2 (keeps both v7x TensorCores busy).
    Divisibility is not required; the wrapper pads the batch to a multiple of Nb."""
    Hp, Wp = H // 2, W // 2

    def bytes_for(nb):
        blocks = 2 * nb * H * W * Cin + 2 * nb * Hp * Wp * Cout        # in/out, double-buffered
        scratch = nb * (Hp + 2) * (Wp + 2) * (Cin + Cout)              # padded scratches
        values = nb * Hp * Wp * (2 * Cout + max(Cin, Cout))            # live matmul temporaries
        weights = 2 * (9 * Cin * Cout + 9 * Cout * Cout + 2 * Cout)    # folded weights/shifts
        return 4 * (blocks + scratch + values + weights)

    nb_cap = max(1, (N + 1) // 2) if N >= 2 else 1
    nb = nb_cap
    while nb > 1 and bytes_for(nb) > budget_bytes:
        nb -= 1
    return max(nb, 1)


def down_forward(x, params, eps=1e-5, data_format="NCHW", use_bf16_matmul=False):
    """Pallas implementation of Down.forward.

    data_format="NCHW" (PyTorch convention, default) or "NHWC" (skips the two wrapper
    transposes — prefer keeping the surrounding model in NHWC).
    use_bf16_matmul=True casts the MXU operands to bf16 (f32 accumulation) for v6e/v7x
    throughput; default f32 keeps bit-level agreement with the f32 reference.
    """
    if data_format == "NCHW":
        x = jnp.transpose(x, (0, 2, 3, 1))
    x = x.astype(jnp.float32)
    N, H, W, Cin = x.shape
    assert H % 2 == 0 and W % 2 == 0, "Down (MaxPool2d(2)) requires even H and W."
    Cout = params["w1"].shape[-1]
    Hp, Wp = H // 2, W // 2

    mm_dtype = jnp.bfloat16 if use_bf16_matmul else jnp.float32

    def fold(w, b, g, be, m, v):
        # BN(conv(x, w) + b) = conv(x, w * s) + (b * s + (beta - mean * s))
        s = g / jnp.sqrt(v + eps)                                  # (Cout,)
        wf = (w * s).reshape(-1, w.shape[-1]).astype(mm_dtype)     # (9*Cin, Cout), (ky,kx,cin) rows
        sh = (b * s + (be - m * s)).reshape(1, -1).astype(jnp.float32)
        return wf, sh

    w1, sh1 = fold(params["w1"], params["b1"], params["g1"], params["be1"],
                   params["m1"], params["v1"])
    w2, sh2 = fold(params["w2"], params["b2"], params["g2"], params["be2"],
                   params["m2"], params["v2"])

    Nb = _pick_nb(N, H, W, Cin, Cout)
    grid_n = -(-N // Nb)                      # ceil(N / Nb)
    Npad = grid_n * Nb
    if Npad != N:                             # pad awkward batch sizes; padded rows discarded
        x = jnp.pad(x, ((0, Npad - N), (0, 0), (0, 0), (0, 0)))

    M_total = Npad * Hp * Wp
    flops = 2 * M_total * 9 * (Cin * Cout + Cout * Cout)
    bytes_accessed = 4 * (Npad * H * W * Cin + M_total * Cout
                          + 9 * Cin * Cout + 9 * Cout * Cout + 2 * Cout)

    def full_spec(arr):
        shp = arr.shape
        return pl.BlockSpec(shp, lambda n, _d=len(shp): (0,) * _d)

    out2d = pl.pallas_call(
        down_kernel,
        out_shape=jax.ShapeDtypeStruct((M_total, Cout), jnp.float32),
        grid=(grid_n,),
        in_specs=[
            pl.BlockSpec((Nb, H, W, Cin), lambda n: (n, 0, 0, 0)),   # x
            full_spec(w1), full_spec(sh1),                           # folded conv1 weight / shift
            full_spec(w2), full_spec(sh2),                           # folded conv2 weight / shift
        ],
        out_specs=pl.BlockSpec((Nb * Hp * Wp, Cout), lambda n: (n, 0)),
        scratch_shapes=[
            pltpu.VMEM((Nb, Hp + 2, Wp + 2, Cin), jnp.float32),      # zero-padded pooled input
            pltpu.VMEM((Nb, Hp + 2, Wp + 2, Cout), jnp.float32),     # zero-padded conv1 output
        ],
        compiler_params=pltpu.CompilerParams(
            dimension_semantics=("parallel",),                       # batch steps are independent
            vmem_limit_bytes=32 * 1024 * 1024),
        cost_estimate=pl.CostEstimate(flops=int(flops), transcendentals=0,
                                      bytes_accessed=int(bytes_accessed)),
    )(x, w1, sh1, w2, sh2)

    out = out2d.reshape(Npad, Hp, Wp, Cout)[:N]
    if data_format == "NCHW":
        out = jnp.transpose(out, (0, 3, 1, 2))
    return out


def down_reference(x_nchw, params):
    """Pure-JAX reference (same semantics) for validation."""
    x = jnp.transpose(x_nchw, (0, 2, 3, 1)).astype(jnp.float32)
    x = jax.lax.reduce_window(x, -jnp.inf, jax.lax.max,
                              (1, 2, 2, 1), (1, 2, 2, 1), "VALID")

    def block(x, w, b, g, be, m, v):
        y = jax.lax.conv_general_dilated(
            x, w, (1, 1), "SAME",
            dimension_numbers=("NHWC", "HWIO", "NHWC")) + b
        y = (y - m) / jnp.sqrt(v + 1e-5) * g + be
        return jnp.maximum(y, 0.0)

    x = block(x, params["w1"], params["b1"], params["g1"], params["be1"],
              params["m1"], params["v1"])
    x = block(x, params["w2"], params["b2"], params["g2"], params["be2"],
              params["m2"], params["v2"])
    return jnp.transpose(x, (0, 3, 1, 2))


def make_params(key, in_channels, out_channels):
    ks = jax.random.split(key, 12)
    return {
        # conv weights in HWIO layout
        "w1": 0.1 * jax.random.normal(ks[0], (3, 3, in_channels, out_channels), jnp.float32),
        "b1": 0.1 * jax.random.normal(ks[1], (out_channels,), jnp.float32),
        "g1": jax.random.uniform(ks[2], (out_channels,), jnp.float32, 0.5, 1.5),
        "be1": 0.1 * jax.random.normal(ks[3], (out_channels,), jnp.float32),
        "m1": 0.1 * jax.random.normal(ks[4], (out_channels,), jnp.float32),
        "v1": jax.random.uniform(ks[5], (out_channels,), jnp.float32, 0.5, 1.5),
        "w2": 0.1 * jax.random.normal(ks[6], (3, 3, out_channels, out_channels), jnp.float32),
        "b2": 0.1 * jax.random.normal(ks[7], (out_channels,), jnp.float32),
        "g2": jax.random.uniform(ks[8], (out_channels,), jnp.float32, 0.5, 1.5),
        "be2": 0.1 * jax.random.normal(ks[9], (out_channels,), jnp.float32),
        "m2": 0.1 * jax.random.normal(ks[10], (out_channels,), jnp.float32),
        "v2": jax.random.uniform(ks[11], (out_channels,), jnp.float32, 0.5, 1.5),
    }


if __name__ == "__main__":
    key = jax.random.PRNGKey(0)
    k_x, k_p, k_x2 = jax.random.split(key, 3)

    N, Cin, Cout, H, W = 2, 4, 8, 16, 16
    x = jax.random.normal(k_x, (N, Cin, H, W), jnp.float32)   # NCHW, as in PyTorch
    params = make_params(k_p, Cin, Cout)

    out = jax.block_until_ready(down_forward(x, params))
    ref = jax.block_until_ready(down_reference(x, params))
    assert out.shape == (N, Cout, H // 2, W // 2), out.shape
    np.testing.assert_allclose(np.asarray(out), np.asarray(ref), rtol=1e-4, atol=1e-4)

    # Awkward (odd) batch size exercises the pad-to-multiple-of-Nb path.
    x3 = jax.random.normal(k_x2, (3, Cin, H, W), jnp.float32)
    out3 = jax.block_until_ready(down_forward(x3, params))
    ref3 = jax.block_until_ready(down_reference(x3, params))
    assert out3.shape == (3, Cout, H // 2, W // 2), out3.shape
    np.testing.assert_allclose(np.asarray(out3), np.asarray(ref3), rtol=1e-4, atol=1e-4)

    print("KERNEL_OK")
</pallas_src>

<mosaic_0001>
module attributes {stable_mosaic.version = 11 : i64} {
  func.func @down_kernel(%arg0: i32, %arg1: memref<1x16x16x4xf32, #tpu.memory_space<vmem>>, %arg2: memref<36x8xf32, #tpu.memory_space<vmem>>, %arg3: memref<1x8xf32, #tpu.memory_space<vmem>>, %arg4: memref<72x8xf32, #tpu.memory_space<vmem>>, %arg5: memref<1x8xf32, #tpu.memory_space<vmem>>, %arg6: memref<64x8xf32, #tpu.memory_space<vmem>>, %arg7: memref<1x10x10x4xf32, #tpu.memory_space<vmem>>, %arg8: memref<1x10x10x8xf32, #tpu.memory_space<vmem>>) attributes {dimension_semantics = [#tpu.dimension_semantics<parallel>], iteration_bounds = array<i64: 2>, scalar_prefetch = 0 : i64, scratch_operands = 2 : i64, tpu.core_type = #tpu.core_type<tc>, window_params = [{transform_indices = @transform_0, window_bounds = array<i64: 1, 16, 16, 4>}, {pipeline_mode = #tpu.pipeline_mode<synchronous>, transform_indices = @transform_1, window_bounds = array<i64: 36, 8>}, {pipeline_mode = #tpu.pipeline_mode<synchronous>, transform_indices = @transform_2, window_bounds = array<i64: 1, 8>}, {pipeline_mode = #tpu.pipeline_mode<synchronous>, transform_indices = @transform_3, window_bounds = array<i64: 72, 8>}, {pipeline_mode = #tpu.pipeline_mode<synchronous>, transform_indices = @transform_4, window_bounds = array<i64: 1, 8>}, {transform_indices = @transform_5, window_bounds = array<i64: 64, 8>}]} {
    %cst = arith.constant 0.000000e+00 : f32
    %0 = vector.broadcast %cst : f32 to vector<1x1x10x4xf32>
    %c0 = arith.constant 0 : index
    %c0_0 = arith.constant 0 : index
    %c0_1 = arith.constant 0 : index
    %c0_2 = arith.constant 0 : index
    %1 = vector.load %arg7[%c0, %c0_0, %c0_1, %c0_2] : memref<1x10x10x4xf32, #tpu.memory_space<vmem>>, vector<1x1x10x4xf32>
    tpu.vector_store %arg7[%c0, %c0_0, %c0_1, %c0_2], %0 {strides = array<i32>} : memref<1x10x10x4xf32, #tpu.memory_space<vmem>>, vector<1x1x10x4xf32>,
    %c0_3 = arith.constant 0 : index
    %c9 = arith.constant 9 : index
    %c0_4 = arith.constant 0 : index
    %c0_5 = arith.constant 0 : index
    %2 = vector.load %arg7[%c0_3, %c9, %c0_4, %c0_5] : memref<1x10x10x4xf32, #tpu.memory_space<vmem>>, vector<1x1x10x4xf32>
    tpu.vector_store %arg7[%c0_3, %c9, %c0_4, %c0_5], %0 {strides = array<i32>} : memref<1x10x10x4xf32, #tpu.memory_space<vmem>>, vector<1x1x10x4xf32>,
    %cst_6 = arith.constant 0.000000e+00 : f32
    %3 = vector.broadcast %cst_6 : f32 to vector<1x10x1x4xf32>
    %c0_7 = arith.constant 0 : index
    %c0_8 = arith.constant 0 : index
    %c0_9 = arith.constant 0 : index
    %c0_10 = arith.constant 0 : index
    %4 = vector.load %arg7[%c0_7, %c0_8, %c0_9, %c0_10] : memref<1x10x10x4xf32, #tpu.memory_space<vmem>>, vector<1x10x1x4xf32>
    tpu.vector_store %arg7[%c0_7, %c0_8, %c0_9, %c0_10], %3 {strides = array<i32>} : memref<1x10x10x4xf32, #tpu.memory_space<vmem>>, vector<1x10x1x4xf32>,
    %c0_11 = arith.constant 0 : index
    %c0_12 = arith.constant 0 : index
    %c9_13 = arith.constant 9 : index
    %c0_14 = arith.constant 0 : index
    %5 = vector.load %arg7[%c0_11, %c0_12, %c9_13, %c0_14] : memref<1x10x10x4xf32, #tpu.memory_space<vmem>>, vector<1x10x1x4xf32>
    tpu.vector_store %arg7[%c0_11, %c0_12, %c9_13, %c0_14], %3 {strides = array<i32>} : memref<1x10x10x4xf32, #tpu.memory_space<vmem>>, vector<1x10x1x4xf32>,
    %cst_15 = arith.constant 0.000000e+00 : f32
    %6 = vector.broadcast %cst_15 : f32 to vector<1x1x10x8xf32>
    %c0_16 = arith.constant 0 : index
    %c0_17 = arith.constant 0 : index
    %c0_18 = arith.constant 0 : index
    %c0_19 = arith.constant 0 : index
    %7 = vector.load %arg8[%c0_16, %c0_17, %c0_18, %c0_19] : memref<1x10x10x8xf32, #tpu.memory_space<vmem>>, vector<1x1x10x8xf32>
    tpu.vector_store %arg8[%c0_16, %c0_17, %c0_18, %c0_19], %6 {strides = array<i32>} : memref<1x10x10x8xf32, #tpu.memory_space<vmem>>, vector<1x1x10x8xf32>,
    %c0_20 = arith.constant 0 : index
    %c9_21 = arith.constant 9 : index
    %c0_22 = arith.constant 0 : index
    %c0_23 = arith.constant 0 : index
    %8 = vector.load %arg8[%c0_20, %c9_21, %c0_22, %c0_23] : memref<1x10x10x8xf32, #tpu.memory_space<vmem>>, vector<1x1x10x8xf32>
    tpu.vector_store %arg8[%c0_20, %c9_21, %c0_22, %c0_23], %6 {strides = array<i32>} : memref<1x10x10x8xf32, #tpu.memory_space<vmem>>, vector<1x1x10x8xf32>,
    %cst_24 = arith.constant 0.000000e+00 : f32
    %9 = vector.broadcast %cst_24 : f32 to vector<1x10x1x8xf32>
    %c0_25 = arith.constant 0 : index
    %c0_26 = arith.constant 0 : index
    %c0_27 = arith.constant 0 : index
    %c0_28 = arith.constant 0 : index
    %10 = vector.load %arg8[%c0_25, %c0_26, %c0_27, %c0_28] : memref<1x10x10x8xf32, #tpu.memory_space<vmem>>, vector<1x10x1x8xf32>
    tpu.vector_store %arg8[%c0_25, %c0_26, %c0_27, %c0_28], %9 {strides = array<i32>} : memref<1x10x10x8xf32, #tpu.memory_space<vmem>>, vector<1x10x1x8xf32>,
    %c0_29 = arith.constant 0 : index
    %c0_30 = arith.constant 0 : index
    %c9_31 = arith.constant 9 : index
    %c0_32 = arith.constant 0 : index
    %11 = vector.load %arg8[%c0_29, %c0_30, %c9_31, %c0_32] : memref<1x10x10x8xf32, #tpu.memory_space<vmem>>, vector<1x10x1x8xf32>
    tpu.vector_store %arg8[%c0_29, %c0_30, %c9_31, %c0_32], %9 {strides = array<i32>} : memref<1x10x10x8xf32, #tpu.memory_space<vmem>>, vector<1x10x1x8xf32>,
    %c0_33 = arith.constant 0 : index
    %c0_34 = arith.constant 0 : index
    %c0_35 = arith.constant 0 : index
    %c0_36 = arith.constant 0 : index
    %12 = vector.load %arg1[%c0_33, %c0_34, %c0_35, %c0_36] : memref<1x16x16x4xf32, #tpu.memory_space<vmem>>, vector<1x16x16x4xf32>
    %13 = vector.shape_cast %12 : vector<1x16x16x4xf32> to vector<16x8x2x4xf32>
    %cst_37 = arith.constant dense<0xFF800000> : vector<16x8x4xf32>
    %14 = vector.multi_reduction <maximumf>, %13, %cst_37 [2] : vector<16x8x2x4xf32> to vector<16x8x4xf32>
    %15 = vector.shape_cast %14 : vector<16x8x4xf32> to vector<8x2x8x4xf32>
    %cst_38 = arith.constant dense<0xFF800000> : vector<8x8x4xf32>
    %16 = vector.multi_reduction <maximumf>, %15, %cst_38 [1] : vector<8x2x8x4xf32> to vector<8x8x4xf32>
    %17 = vector.shape_cast %16 : vector<8x8x4xf32> to vector<1x8x8x4xf32>
    %c0_39 = arith.constant 0 : index
    %c1 = arith.constant 1 : index
    %c1_40 = arith.constant 1 : index
    %c0_41 = arith.constant 0 : index
    %18 = vector.load %arg7[%c0_39, %c1, %c1_40, %c0_41] : memref<1x10x10x4xf32, #tpu.memory_space<vmem>>, vector<1x8x8x4xf32>
    tpu.vector_store %arg7[%c0_39, %c1, %c1_40, %c0_41], %17 {strides = array<i32>} : memref<1x10x10x4xf32, #tpu.memory_space<vmem>>, vector<1x8x8x4xf32>,
    %c0_42 = arith.constant 0 : index
    %c0_43 = arith.constant 0 : index
    %c0_44 = arith.constant 0 : index
    %c0_45 = arith.constant 0 : index
    %19 = vector.load %arg7[%c0_42, %c0_43, %c0_44, %c0_45] : memref<1x10x10x4xf32, #tpu.memory_space<vmem>>, vector<1x8x8x4xf32>
    %20 = vector.shape_cast %19 : vector<1x8x8x4xf32> to vector<64x4xf32>
    %c0_46 = arith.constant 0 : index
    %c0_47 = arith.constant 0 : index
    %21 = vector.load %arg2[%c0_46, %c0_47] : memref<36x8xf32, #tpu.memory_space<vmem>>, vector<4x8xf32>
    %cst_48 = arith.constant dense<0.000000e+00> : vector<64x8xf32>
    %22 = tpu.matmul %20, %21, %cst_48 {dimension_numbers = #tpu.dot_dimension_numbers<[1], [0], [0], [1], [0, 0, 1, 1], [], []>} : vector<64x4xf32>, vector<4x8xf32>, vector<64x8xf32> -> vector<64x8xf32>
    %c0_49 = arith.constant 0 : index
    %c0_50 = arith.constant 0 : index
    %c1_51 = arith.constant 1 : index
    %c0_52 = arith.constant 0 : index
    %23 = vector.load %arg7[%c0_49, %c0_50, %c1_51, %c0_52] : memref<1x10x10x4xf32, #tpu.memory_space<vmem>>, vector<1x8x8x4xf32>
    %24 = vector.shape_cast %23 : vector<1x8x8x4xf32> to vector<64x4xf32>
    %c4 = arith.constant 4 : index
    %c0_53 = arith.constant 0 : index
    %25 = vector.load %arg2[%c4, %c0_53] : memref<36x8xf32, #tpu.memory_space<vmem>>, vector<4x8xf32>
    %cst_54 = arith.constant dense<0.000000e+00> : vector<64x8xf32>
    %26 = tpu.matmul %24, %25, %cst_54 {dimension_numbers = #tpu.dot_dimension_numbers<[1], [0], [0], [1], [0, 0, 1, 1], [], []>} : vector<64x4xf32>, vector<4x8xf32>, vector<64x8xf32> -> vector<64x8xf32>
    %27 = arith.addf %22, %26 : vector<64x8xf32>
    %c0_55 = arith.constant 0 : index
    %c0_56 = arith.constant 0 : index
    %c2 = arith.constant 2 : index
    %c0_57 = arith.constant 0 : index
    %28 = vector.load %arg7[%c0_55, %c0_56, %c2, %c0_57] : memref<1x10x10x4xf32, #tpu.memory_space<vmem>>, vector<1x8x8x4xf32>
    %29 = vector.shape_cast %28 : vector<1x8x8x4xf32> to vector<64x4xf32>
    %c8 = arith.constant 8 : index
    %c0_58 = arith.constant 0 : index
    %30 = vector.load %arg2[%c8, %c0_58] : memref<36x8xf32, #tpu.memory_space<vmem>>, vector<4x8xf32>
    %cst_59 = arith.constant dense<0.000000e+00> : vector<64x8xf32>
    %31 = tpu.matmul %29, %30, %cst_59 {dimension_numbers = #tpu.dot_dimension_numbers<[1], [0], [0], [1], [0, 0, 1, 1], [], []>} : vector<64x4xf32>, vector<4x8xf32>, vector<64x8xf32> -> vector<64x8xf32>
    %32 = arith.addf %27, %31 : vector<64x8xf32>
    %c0_60 = arith.constant 0 : index
    %c1_61 = arith.constant 1 : index
    %c0_62 = arith.constant 0 : index
    %c0_63 = arith.constant 0 : index
    %33 = vector.load %arg7[%c0_60, %c1_61, %c0_62, %c0_63] : memref<1x10x10x4xf32, #tpu.memory_space<vmem>>, vector<1x8x8x4xf32>
    %34 = vector.shape_cast %33 : vector<1x8x8x4xf32> to vector<64x4xf32>
    %c12 = arith.constant 12 : index
    %c0_64 = arith.constant 0 : index
    %35 = vector.load %arg2[%c12, %c0_64] : memref<36x8xf32, #tpu.memory_space<vmem>>, vector<4x8xf32>
    %cst_65 = arith.constant dense<0.000000e+00> : vector<64x8xf32>
    %36 = tpu.matmul %34, %35, %cst_65 {dimension_numbers = #tpu.dot_dimension_numbers<[1], [0], [0], [1], [0, 0, 1, 1], [], []>} : vector<64x4xf32>, vector<4x8xf32>, vector<64x8xf32> -> vector<64x8xf32>
    %37 = arith.addf %32, %36 : vector<64x8xf32>
    %c0_66 = arith.constant 0 : index
    %c1_67 = arith.constant 1 : index
    %c1_68 = arith.constant 1 : index
    %c0_69 = arith.constant 0 : index
    %38 = vector.load %arg7[%c0_66, %c1_67, %c1_68, %c0_69] : memref<1x10x10x4xf32, #tpu.memory_space<vmem>>, vector<1x8x8x4xf32>
    %39 = vector.shape_cast %38 : vector<1x8x8x4xf32> to vector<64x4xf32>
    %c16 = arith.constant 16 : index
    %c0_70 = arith.constant 0 : index
    %40 = vector.load %arg2[%c16, %c0_70] : memref<36x8xf32, #tpu.memory_space<vmem>>, vector<4x8xf32>
    %cst_71 = arith.constant dense<0.000000e+00> : vector<64x8xf32>
    %41 = tpu.matmul %39, %40, %cst_71 {dimension_numbers = #tpu.dot_dimension_numbers<[1], [0], [0], [1], [0, 0, 1, 1], [], []>} : vector<64x4xf32>, vector<4x8xf32>, vector<64x8xf32> -> vector<64x8xf32>
    %42 = arith.addf %37, %41 : vector<64x8xf32>
    %c0_72 = arith.constant 0 : index
    %c1_73 = arith.constant 1 : index
    %c2_74 = arith.constant 2 : index
    %c0_75 = arith.constant 0 : index
    %43 = vector.load %arg7[%c0_72, %c1_73, %c2_74, %c0_75] : memref<1x10x10x4xf32, #tpu.memory_space<vmem>>, vector<1x8x8x4xf32>
    %44 = vector.shape_cast %43 : vector<1x8x8x4xf32> to vector<64x4xf32>
    %c20 = arith.constant 20 : index
    %c0_76 = arith.constant 0 : index
    %45 = vector.load %arg2[%c20, %c0_76] : memref<36x8xf32, #tpu.memory_space<vmem>>, vector<4x8xf32>
    %cst_77 = arith.constant dense<0.000000e+00> : vector<64x8xf32>
    %46 = tpu.matmul %44, %45, %cst_77 {dimension_numbers = #tpu.dot_dimension_numbers<[1], [0], [0], [1], [0, 0, 1, 1], [], []>} : vector<64x4xf32>, vector<4x8xf32>, vector<64x8xf32> -> vector<64x8xf32>
    %47 = arith.addf %42, %46 : vector<64x8xf32>
    %c0_78 = arith.constant 0 : index
    %c2_79 = arith.constant 2 : index
    %c0_80 = arith.constant 0 : index
    %c0_81 = arith.constant 0 : index
    %48 = vector.load %arg7[%c0_78, %c2_79, %c0_80, %c0_81] : memref<1x10x10x4xf32, #tpu.memory_space<vmem>>, vector<1x8x8x4xf32>
    %49 = vector.shape_cast %48 : vector<1x8x8x4xf32> to vector<64x4xf32>
    %c24 = arith.constant 24 : index
    %c0_82 = arith.constant 0 : index
    %50 = vector.load %arg2[%c24, %c0_82] : memref<36x8xf32, #tpu.memory_space<vmem>>, vector<4x8xf32>
    %cst_83 = arith.constant dense<0.000000e+00> : vector<64x8xf32>
    %51 = tpu.matmul %49, %50, %cst_83 {dimension_numbers = #tpu.dot_dimension_numbers<[1], [0], [0], [1], [0, 0, 1, 1], [], []>} : vector<64x4xf32>, vector<4x8xf32>, vector<64x8xf32> -> vector<64x8xf32>
    %52 = arith.addf %47, %51 : vector<64x8xf32>
    %c0_84 = arith.constant 0 : index
    %c2_85 = arith.constant 2 : index
    %c1_86 = arith.constant 1 : index
    %c0_87 = arith.constant 0 : index
    %53 = vector.load %arg7[%c0_84, %c2_85, %c1_86, %c0_87] : memref<1x10x10x4xf32, #tpu.memory_space<vmem>>, vector<1x8x8x4xf32>
    %54 = vector.shape_cast %53 : vector<1x8x8x4xf32> to vector<64x4xf32>
    %c28 = arith.constant 28 : index
    %c0_88 = arith.constant 0 : index
    %55 = vector.load %arg2[%c28, %c0_88] : memref<36x8xf32, #tpu.memory_space<vmem>>, vector<4x8xf32>
    %cst_89 = arith.constant dense<0.000000e+00> : vector<64x8xf32>
    %56 = tpu.matmul %54, %55, %cst_89 {dimension_numbers = #tpu.dot_dimension_numbers<[1], [0], [0], [1], [0, 0, 1, 1], [], []>} : vector<64x4xf32>, vector<4x8xf32>, vector<64x8xf32> -> vector<64x8xf32>
    %57 = arith.addf %52, %56 : vector<64x8xf32>
    %c0_90 = arith.constant 0 : index
    %c2_91 = arith.constant 2 : index
    %c2_92 = arith.constant 2 : index
    %c0_93 = arith.constant 0 : index
    %58 = vector.load %arg7[%c0_90, %c2_91, %c2_92, %c0_93] : memref<1x10x10x4xf32, #tpu.memory_space<vmem>>, vector<1x8x8x4xf32>
    %59 = vector.shape_cast %58 : vector<1x8x8x4xf32> to vector<64x4xf32>
    %c32 = arith.constant 32 : index
    %c0_94 = arith.constant 0 : index
    %60 = vector.load %arg2[%c32, %c0_94] : memref<36x8xf32, #tpu.memory_space<vmem>>, vector<4x8xf32>
    %cst_95 = arith.constant dense<0.000000e+00> : vector<64x8xf32>
    %61 = tpu.matmul %59, %60, %cst_95 {dimension_numbers = #tpu.dot_dimension_numbers<[1], [0], [0], [1], [0, 0, 1, 1], [], []>} : vector<64x4xf32>, vector<4x8xf32>, vector<64x8xf32> -> vector<64x8xf32>
    %62 = arith.addf %57, %61 : vector<64x8xf32>
    %c0_96 = arith.constant 0 : index
    %c0_97 = arith.constant 0 : index
    %63 = vector.load %arg3[%c0_96, %c0_97] : memref<1x8xf32, #tpu.memory_space<vmem>>, vector<1x8xf32>
    %64 = vector.broadcast %63 : vector<1x8xf32> to vector<64x8xf32>
    %65 = arith.addf %62, %64 : vector<64x8xf32>
    %cst_98 = arith.constant 0.000000e+00 : f32
    %66 = vector.broadcast %cst_98 : f32 to vector<64x8xf32>
    %67 = arith.maximumf %65, %66 : vector<64x8xf32>
    %68 = vector.shape_cast %67 : vector<64x8xf32> to vector<1x8x8x8xf32>
    %c0_99 = arith.constant 0 : index
    %c1_100 = arith.constant 1 : index
    %c1_101 = arith.constant 1 : index
    %c0_102 = arith.constant 0 : index
    %69 = vector.load %arg8[%c0_99, %c1_100, %c1_101, %c0_102] : memref<1x10x10x8xf32, #tpu.memory_space<vmem>>, vector<1x8x8x8xf32>
    tpu.vector_store %arg8[%c0_99, %c1_100, %c1_101, %c0_102], %68 {strides = array<i32>} : memref<1x10x10x8xf32, #tpu.memory_space<vmem>>, vector<1x8x8x8xf32>,
    %c0_103 = arith.constant 0 : index
    %c0_104 = arith.constant 0 : index
    %c0_105 = arith.constant 0 : index
    %c0_106 = arith.constant 0 : index
    %70 = vector.load %arg8[%c0_103, %c0_104, %c0_105, %c0_106] : memref<1x10x10x8xf32, #tpu.memory_space<vmem>>, vector<1x8x8x8xf32>
    %71 = vector.shape_cast %70 : vector<1x8x8x8xf32> to vector<64x8xf32>
    %c0_107 = arith.constant 0 : index
    %c0_108 = arith.constant 0 : index
    %72 = vector.load %arg4[%c0_107, %c0_108] : memref<72x8xf32, #tpu.memory_space<vmem>>, vector<8x8xf32>
    %cst_109 = arith.constant dense<0.000000e+00> : vector<64x8xf32>
    %73 = tpu.matmul %71, %72, %cst_109 {dimension_numbers = #tpu.dot_dimension_numbers<[1], [0], [0], [1], [0, 0, 1, 1], [], []>} : vector<64x8xf32>, vector<8x8xf32>, vector<64x8xf32> -> vector<64x8xf32>
    %c0_110 = arith.constant 0 : index
    %c0_111 = arith.constant 0 : index
    %c1_112 = arith.constant 1 : index
    %c0_113 = arith.constant 0 : index
    %74 = vector.load %arg8[%c0_110, %c0_111, %c1_112, %c0_113] : memref<1x10x10x8xf32, #tpu.memory_space<vmem>>, vector<1x8x8x8xf32>
    %75 = vector.shape_cast %74 : vector<1x8x8x8xf32> to vector<64x8xf32>
    %c8_114 = arith.constant 8 : index
    %c0_115 = arith.constant 0 : index
    %76 = vector.load %arg4[%c8_114, %c0_115] : memref<72x8xf32, #tpu.memory_space<vmem>>, vector<8x8xf32>
    %cst_116 = arith.constant dense<0.000000e+00> : vector<64x8xf32>
    %77 = tpu.matmul %75, %76, %cst_116 {dimension_numbers = #tpu.dot_dimension_numbers<[1], [0], [0], [1], [0, 0, 1, 1], [], []>} : vector<64x8xf32>, vector<8x8xf32>, vector<64x8xf32> -> vector<64x8xf32>
    %78 = arith.addf %73, %77 : vector<64x8xf32>
    %c0_117 = arith.constant 0 : index
    %c0_118 = arith.constant 0 : index
    %c2_119 = arith.constant 2 : index
    %c0_120 = arith.constant 0 : index
    %79 = vector.load %arg8[%c0_117, %c0_118, %c2_119, %c0_120] : memref<1x10x10x8xf32, #tpu.memory_space<vmem>>, vector<1x8x8x8xf32>
    %80 = vector.shape_cast %79 : vector<1x8x8x8xf32> to vector<64x8xf32>
    %c16_121 = arith.constant 16 : index
    %c0_122 = arith.constant 0 : index
    %81 = vector.load %arg4[%c16_121, %c0_122] : memref<72x8xf32, #tpu.memory_space<vmem>>, vector<8x8xf32>
    %cst_123 = arith.constant dense<0.000000e+00> : vector<64x8xf32>
    %82 = tpu.matmul %80, %81, %cst_123 {dimension_numbers = #tpu.dot_dimension_numbers<[1], [0], [0], [1], [0, 0, 1, 1], [], []>} : vector<64x8xf32>, vector<8x8xf32>, vector<64x8xf32> -> vector<64x8xf32>
    %83 = arith.addf %78, %82 : vector<64x8xf32>
    %c0_124 = arith.constant 0 : index
    %c1_125 = arith.constant 1 : index
    %c0_126 = arith.constant 0 : index
    %c0_127 = arith.constant 0 : index
    %84 = vector.load %arg8[%c0_124, %c1_125, %c0_126, %c0_127] : memref<1x10x10x8xf32, #tpu.memory_space<vmem>>, vector<1x8x8x8xf32>
    %85 = vector.shape_cast %84 : vector<1x8x8x8xf32> to vector<64x8xf32>
    %c24_128 = arith.constant 24 : index
    %c0_129 = arith.constant 0 : index
    %86 = vector.load %arg4[%c24_128, %c0_129] : memref<72x8xf32, #tpu.memory_space<vmem>>, vector<8x8xf32>
    %cst_130 = arith.constant dense<0.000000e+00> : vector<64x8xf32>
    %87 = tpu.matmul %85, %86, %cst_130 {dimension_numbers = #tpu.dot_dimension_numbers<[1], [0], [0], [1], [0, 0, 1, 1], [], []>} : vector<64x8xf32>, vector<8x8xf32>, vector<64x8xf32> -> vector<64x8xf32>
    %88 = arith.addf %83, %87 : vector<64x8xf32>
    %c0_131 = arith.constant 0 : index
    %c1_132 = arith.constant 1 : index
    %c1_133 = arith.constant 1 : index
    %c0_134 = arith.constant 0 : index
    %89 = vector.load %arg8[%c0_131, %c1_132, %c1_133, %c0_134] : memref<1x10x10x8xf32, #tpu.memory_space<vmem>>, vector<1x8x8x8xf32>
    %90 = vector.shape_cast %89 : vector<1x8x8x8xf32> to vector<64x8xf32>
    %c32_135 = arith.constant 32 : index
    %c0_136 = arith.constant 0 : index
    %91 = vector.load %arg4[%c32_135, %c0_136] : memref<72x8xf32, #tpu.memory_space<vmem>>, vector<8x8xf32>
    %cst_137 = arith.constant dense<0.000000e+00> : vector<64x8xf32>
    %92 = tpu.matmul %90, %91, %cst_137 {dimension_numbers = #tpu.dot_dimension_numbers<[1], [0], [0], [1], [0, 0, 1, 1], [], []>} : vector<64x8xf32>, vector<8x8xf32>, vector<64x8xf32> -> vector<64x8xf32>
    %93 = arith.addf %88, %92 : vector<64x8xf32>
    %c0_138 = arith.constant 0 : index
    %c1_139 = arith.constant 1 : index
    %c2_140 = arith.constant 2 : index
    %c0_141 = arith.constant 0 : index
    %94 = vector.load %arg8[%c0_138, %c1_139, %c2_140, %c0_141] : memref<1x10x10x8xf32, #tpu.memory_space<vmem>>, vector<1x8x8x8xf32>
    %95 = vector.shape_cast %94 : vector<1x8x8x8xf32> to vector<64x8xf32>
    %c40 = arith.constant 40 : index
    %c0_142 = arith.constant 0 : index
    %96 = vector.load %arg4[%c40, %c0_142] : memref<72x8xf32, #tpu.memory_space<vmem>>, vector<8x8xf32>
    %cst_143 = arith.constant dense<0.000000e+00> : vector<64x8xf32>
    %97 = tpu.matmul %95, %96, %cst_143 {dimension_numbers = #tpu.dot_dimension_numbers<[1], [0], [0], [1], [0, 0, 1, 1], [], []>} : vector<64x8xf32>, vector<8x8xf32>, vector<64x8xf32> -> vector<64x8xf32>
    %98 = arith.addf %93, %97 : vector<64x8xf32>
    %c0_144 = arith.constant 0 : index
    %c2_145 = arith.constant 2 : index
    %c0_146 = arith.constant 0 : index
    %c0_147 = arith.constant 0 : index
    %99 = vector.load %arg8[%c0_144, %c2_145, %c0_146, %c0_147] : memref<1x10x10x8xf32, #tpu.memory_space<vmem>>, vector<1x8x8x8xf32>
    %100 = vector.shape_cast %99 : vector<1x8x8x8xf32> to vector<64x8xf32>
    %c48 = arith.constant 48 : index
    %c0_148 = arith.constant 0 : index
    %101 = vector.load %arg4[%c48, %c0_148] : memref<72x8xf32, #tpu.memory_space<vmem>>, vector<8x8xf32>
    %cst_149 = arith.constant dense<0.000000e+00> : vector<64x8xf32>
    %102 = tpu.matmul %100, %101, %cst_149 {dimension_numbers = #tpu.dot_dimension_numbers<[1], [0], [0], [1], [0, 0, 1, 1], [], []>} : vector<64x8xf32>, vector<8x8xf32>, vector<64x8xf32> -> vector<64x8xf32>
    %103 = arith.addf %98, %102 : vector<64x8xf32>
    %c0_150 = arith.constant 0 : index
    %c2_151 = arith.constant 2 : index
    %c1_152 = arith.constant 1 : index
    %c0_153 = arith.constant 0 : index
    %104 = vector.load %arg8[%c0_150, %c2_151, %c1_152, %c0_153] : memref<1x10x10x8xf32, #tpu.memory_space<vmem>>, vector<1x8x8x8xf32>
    %105 = vector.shape_cast %104 : vector<1x8x8x8xf32> to vector<64x8xf32>
    %c56 = arith.constant 56 : index
    %c0_154 = arith.constant 0 : index
    %106 = vector.load %arg4[%c56, %c0_154] : memref<72x8xf32, #tpu.memory_space<vmem>>, vector<8x8xf32>
    %cst_155 = arith.constant dense<0.000000e+00> : vector<64x8xf32>
    %107 = tpu.matmul %105, %106, %cst_155 {dimension_numbers = #tpu.dot_dimension_numbers<[1], [0], [0], [1], [0, 0, 1, 1], [], []>} : vector<64x8xf32>, vector<8x8xf32>, vector<64x8xf32> -> vector<64x8xf32>
    %108 = arith.addf %103, %107 : vector<64x8xf32>
    %c0_156 = arith.constant 0 : index
    %c2_157 = arith.constant 2 : index
    %c2_158 = arith.constant 2 : index
    %c0_159 = arith.constant 0 : index
    %109 = vector.load %arg8[%c0_156, %c2_157, %c2_158, %c0_159] : memref<1x10x10x8xf32, #tpu.memory_space<vmem>>, vector<1x8x8x8xf32>
    %110 = vector.shape_cast %109 : vector<1x8x8x8xf32> to vector<64x8xf32>
    %c64 = arith.constant 64 : index
    %c0_160 = arith.constant 0 : index
    %111 = vector.load %arg4[%c64, %c0_160] : memref<72x8xf32, #tpu.memory_space<vmem>>, vector<8x8xf32>
    %cst_161 = arith.constant dense<0.000000e+00> : vector<64x8xf32>
    %112 = tpu.matmul %110, %111, %cst_161 {dimension_numbers = #tpu.dot_dimension_numbers<[1], [0], [0], [1], [0, 0, 1, 1], [], []>} : vector<64x8xf32>, vector<8x8xf32>, vector<64x8xf32> -> vector<64x8xf32>
    %113 = arith.addf %108, %112 : vector<64x8xf32>
    %c0_162 = arith.constant 0 : index
    %c0_163 = arith.constant 0 : index
    %114 = vector.load %arg5[%c0_162, %c0_163] : memref<1x8xf32, #tpu.memory_space<vmem>>, vector<1x8xf32>
    %115 = vector.broadcast %114 : vector<1x8xf32> to vector<64x8xf32>
    %116 = arith.addf %113, %115 : vector<64x8xf32>
    %cst_164 = arith.constant 0.000000e+00 : f32
    %117 = vector.broadcast %cst_164 : f32 to vector<64x8xf32>
    %118 = arith.maximumf %116, %117 : vector<64x8xf32>
    %c0_165 = arith.constant 0 : index
    %c0_166 = arith.constant 0 : index
    %119 = vector.load %arg6[%c0_165, %c0_166] : memref<64x8xf32, #tpu.memory_space<vmem>>, vector<64x8xf32>
    tpu.vector_store %arg6[%c0_165, %c0_166], %118 {strides = array<i32>} : memref<64x8xf32, #tpu.memory_space<vmem>>, vector<64x8xf32>,
    return
  }
  func.func @transform_0(%arg0: i32) -> (i32, i32, i32, i32) {
    %c0_i32 = arith.constant 0 : i32
    %c0_i32_0 = arith.constant 0 : i32
    %c0_i32_1 = arith.constant 0 : i32
    %c0_i32_2 = arith.constant 0 : i32
    return %arg0, %c0_i32, %c0_i32_0, %c0_i32_1 : i32, i32, i32, i32
  }
  func.func @transform_1(%arg0: i32) -> (i32, i32) {
    %c0_i32 = arith.constant 0 : i32
    %c0_i32_0 = arith.constant 0 : i32
    %c0_i32_1 = arith.constant 0 : i32
    return %c0_i32, %c0_i32_0 : i32, i32
  }
  func.func @transform_2(%arg0: i32) -> (i32, i32) {
    %c0_i32 = arith.constant 0 : i32
    %c0_i32_0 = arith.constant 0 : i32
    %c0_i32_1 = arith.constant 0 : i32
    return %c0_i32, %c0_i32_0 : i32, i32
  }
  func.func @transform_3(%arg0: i32) -> (i32, i32) {
    %c0_i32 = arith.constant 0 : i32
    %c0_i32_0 = arith.constant 0 : i32
    %c0_i32_1 = arith.constant 0 : i32
    return %c0_i32, %c0_i32_0 : i32, i32
  }
  func.func @transform_4(%arg0: i32) -> (i32, i32) {
    %c0_i32 = arith.constant 0 : i32
    %c0_i32_0 = arith.constant 0 : i32
    %c0_i32_1 = arith.constant 0 : i32
    return %c0_i32, %c0_i32_0 : i32, i32
  }
  func.func @transform_5(%arg0: i32) -> (i32, i32) {
    %c0_i32 = arith.constant 0 : i32
    %c0_i32_0 = arith.constant 0 : i32
    return %arg0, %c0_i32 : i32, i32
  }
}

</mosaic_0001>

<bundles_post_ra>
// kernel: tpu_custom_call.1
= control target key start
LH: loop header
LB: loop body
LE: loop exit
PB: predicated region body
PF: predicated region fallthrough
CT: control target
= control target key end

     0   :  { %s5660_s18 = smov 0   ;;  %s7098_s0 = inlined_call_operand.vmem [shape: f32[2,16,16,4], index: 0, kind: input, shape index: {}]   ;;  %s7099_s1 = inlined_call_operand.vmem [shape: f32[36,8], index: 1, kind: input, shape index: {}]   ;;  %s7100_s2 = inlined_call_operand.vmem [shape: f32[1,8], index: 2, kind: input, shape index: {}]   ;;  %s7101_s3 = inlined_call_operand.vmem [shape: f32[72,8], index: 3, kind: input, shape index: {}]   ;;  %s7102_s4 = inlined_call_operand.vmem [shape: f32[1,8], index: 4, kind: input, shape index: {}]   ;;  %s7103_s5 = inlined_call_operand.vmem [shape: f32[128,8], index: 5, kind: output, shape index: {}]  }
   0x1 LB: > { %s5666_s19 = sadd.s32 4294967295, %s5626_s18   ;;  %p4999_p0 = scmp.ge.s32.totalorder %s5626_s18, 1  ;;  %s5626_s18 = sphi %s5660_s18, %s15_s18  }
   0x2   : > { %p187_p1 = scmp.lt.s32.totalorder %s5626_s18, 3 }
   0x4   : > { %p188_p2 = pnand %p4999_p0, %p187_p1 }
   0x6   : > { %191 = sbr.rel (%p188_p2) target bundleno = 867 (0x363), region = 40 }
   0xb   : > { %v2267_v0 = vld [vmem:[%s7099_s1 + $0x4] sm:$0xf]  ;;  %vm2292_vm0 = vcmask 1043456   ;;  %v2258_v1 = vld [vmem:[%s7099_s1] sm:$0xf]  ;;  %vm226_vm1 = vcmask 31744   ;;  %v350_v2 = vlaneseq }
   0xc   : > { %5324 = vmatprep.subr.msk.mxu0 %vm2292_vm0, %v2267_v0  ;;  %5338 = vmatprep.subr.msk.mxu1 %vm2292_vm0, %v2258_v1  ;;  %vm228_vm2 = vcmask 25600   ;;  %vm233_vm3 = vcmask 24576   ;;  %v5681_v3 = vld [vmem:[%s7099_s1 + $0x8] sm:$0xf]  ;;  %p215_p3 = scmp.lt.s32.totalorder %s5666_s19, 1  ;;  %v5628_v4 = vmov 0.0  }
   0xd   : > { %5325 = vmatpush3.msk.msra.mxu0 %vm2292_vm0, %v2267_v0  ;;  %227 = vst.msk [vmem:[#allocation2] sm:$0xff] %vm226_vm1, %v5628_v4  ;;  %231 = vst.msk [vmem:[#allocation2 + $0x90] sm:$0xff] %vm226_vm1, %v5628_v4  ;;  %5339 = vmatpush3.msk.msra.mxu1 %vm2292_vm0, %v2258_v1  ;;  %v5629_v5 = vmov 1983009808   ;;  %v351_v7 = vshrl.u32 %v350_v2, 7  ;;  %vm2170_vm4 = vcmask 1041409  }
   0xe   : > { %229 = vst.msk [vmem:[#allocation2 + $0x8] sm:$0x3] %vm228_vm2, %v5628_v4  ;;  %232 = vst.msk [vmem:[#allocation2 + $0x98] sm:$0x3] %vm228_vm2, %v5628_v4  ;;  %5352 = vmatprep.subr.msk.mxu0 %vm2292_vm0, %v5681_v3  ;;  %s216_s26 = scalar_select %p215_p3, %s5666_s19, 1  ;;  %v348_v6 = vunpack.c.l.s4 %v5629_v5  ;;  %vm2172_vm5 = vcmask 1042434  }
   0xf   : > { %235 = vst.msk [vmem:[#allocation2 + $0x10] sm:$0x1] %vm233_vm3, %v5628_v4  ;;  %236 = vst.msk [vmem:[#allocation2 + $0x20] sm:$0x1] %vm233_vm3, %v5628_v4  ;;  %vm2174_vm6 = vcmask 1043459   ;;  %vm2176_vm7 = vcmask 1044484  }
  0x10   : > { %237 = vst.msk [vmem:[#allocation2 + $0x30] sm:$0x1] %vm233_vm3, %v5628_v4  ;;  %238 = vst.msk [vmem:[#allocation2 + $0x40] sm:$0x1] %vm233_vm3, %v5628_v4  ;;  %s5161_s27 = sshll.u32 %s216_s26, 8  ;;  %v349_v8 = vunpack.c.0.s8 %v348_v6  ;;  %vm2178_vm8 = vcmask 1045509  }
  0x11   : > { %239 = vst.msk [vmem:[#allocation2 + $0x50] sm:$0x1] %vm233_vm3, %v5628_v4  ;;  %240 = vst.msk [vmem:[#allocation2 + $0x60] sm:$0x1] %vm233_vm3, %v5628_v4  ;;  %s5742_s30 = scalar_lea.vmem %s7098_s0, %s5161_s27  ;;  %vm2180_vm9 = vcmask 1046534   ;;  %vm2182_vm10 = vcmask 1047559  }
  0x12   : > { %241 = vst.msk [vmem:[#allocation2 + $0x70] sm:$0x1] %vm233_vm3, %v5628_v4  ;;  %242 = vst.msk [vmem:[#allocation2 + $0x80] sm:$0x1] %vm233_vm3, %v5628_v4  ;;  %v282_v9 = vld [vmem:[%s5742_s30] sm:$0xff]  ;;  %v283_v10 = vld [vmem:[%s5742_s30 + $0x8] sm:$0xff]  ;;  %v5747_v12 = vsub.s32 %v349_v8, %v351_v7 }
  0x13   : > { %245 = vst.msk [vmem:[#allocation2 + $0x19] sm:$0x1] %vm233_vm3, %v5628_v4  ;;  %246 = vst.msk [vmem:[#allocation2 + $0x29] sm:$0x1] %vm233_vm3, %v5628_v4  ;;  %v284_v11 = vld [vmem:[%s5742_s30 + $0x10] sm:$0xff]  ;;  %v285_v13 = vld [vmem:[%s5742_s30 + $0x18] sm:$0xff]  ;;  %v346_v14 = vcombine.high %v282_v9, %v282_v9  ;;  %v363_v15 = vcombine.high %v283_v10, %v283_v10 }
  0x14   : > { %247 = vst.msk [vmem:[#allocation2 + $0x39] sm:$0x1] %vm233_vm3, %v5628_v4  ;;  %248 = vst.msk [vmem:[#allocation2 + $0x49] sm:$0x1] %vm233_vm3, %v5628_v4  ;;  %v380_v16 = vcombine.high %v284_v11, %v284_v11  ;;  %v353_v18 = vrot.slane %v282_v9, %v5747_v12  ;;  %v370_v19 = vrot.slane %v283_v10, %v5747_v12  ;;  %vm254_vm11 = vcmask 64512   ;;  %s5002_s21 = sshll.u32 %s5666_s19, 3 }
  0x15   : > { %249 = vst.msk [vmem:[#allocation2 + $0x59] sm:$0x1] %vm233_vm3, %v5628_v4  ;;  %250 = vst.msk [vmem:[#allocation2 + $0x69] sm:$0x1] %vm233_vm3, %v5628_v4  ;;  %v2259_v17 = vld [vmem:[#allocation2 + $0x1] sm:$0xff]  ;;  %v5753_v20 = vrot.slane %v284_v11, %v5747_v12  ;;  %v397_v21 = vcombine.high %v285_v13, %v285_v13  ;;  %v360_v23 = vrot.slane %v346_v14, %v5747_v12  ;;  %vm261_vm12 = vcmask 57344  }
  0x16   : > { %251 = vst.msk [vmem:[#allocation2 + $0x79] sm:$0x1] %vm233_vm3, %v5628_v4  ;;  %252 = vst.msk [vmem:[#allocation2 + $0x89] sm:$0x1] %vm233_vm3, %v5628_v4  ;;  %5326 = vmatprep.mubr.msk.f32.mxu0 %vm226_vm1, %v2259_v17  ;;  %v377_v24 = vrot.slane %v363_v15, %v5747_v12  ;;  %v5759_v25 = vrot.slane %v380_v16, %v5747_v12  ;;  %v5762_v26 = vrot.slane %v285_v13, %v5747_v12  ;;  %vm256_vm13 = vcmask 58368   ;;  %p7057_p4 = scmp.lt.s32.totalorder %s5002_s21, 15 }
  0x17   : > { %244 = vst.msk [vmem:[#allocation2 + $0x9] sm:$0x1] %vm233_vm3, %v5628_v4  ;;  %234 = vst.msk [vmem:[#allocation2] sm:$0x1] %vm233_vm3, %v5628_v4  ;;  %v361_v27 = vcombine.high %v353_v18, %v353_v18  ;;  %v378_v28 = vcombine.high %v370_v19, %v370_v19  ;;  %v395_v29 = vcombine.high %v5753_v20, %v5753_v20  ;;  %v1018_v36 = vsel %vm228_vm2, %v353_v18, -inf }
  0x18   : > { %243 = vst.msk [vmem:[#allocation2 + $0x90] sm:$0x1] %vm233_vm3, %v5628_v4  ;;  %253 = vst.msk [vmem:[#allocation2 + $0x99] sm:$0x1] %vm233_vm3, %v5628_v4  ;;  %v5768_v30 = vrot.slane %v397_v21, %v5747_v12  ;;  %v362_v31 = vcombine.high %v360_v23, %v360_v23  ;;  %v379_v32 = vcombine.high %v377_v24, %v377_v24  ;;  %v1032_v38 = vsel %vm228_vm2, %v360_v23, -inf  ;;  %s7110_s21 = smov (!%p7057_p4, %s5002_s21), 15 }
  0x19   : > { %v396_v33 = vcombine.high %v5759_v25, %v5759_v25  ;;  %v412_v34 = vcombine.high %v5762_v26, %v5762_v26  ;;  %v1025_v37 = vsel %vm228_vm2, %v361_v27, -inf  ;;  %v1019_v39 = vrot.slane %v1018_v36, 4  ;;  %255 = vst.msk [vmem:[#allocation3] sm:$0xff] %vm254_vm11, %v5628_v4  ;;  %259 = vst.msk [vmem:[#allocation3 + $0x90] sm:$0xff] %vm254_vm11, %v5628_v4  ;;  %s5003_s24 = sshll.u32 %s7110_s21, 3 }
  0x1a   : > { %v413_v35 = vcombine.high %v5768_v30, %v5768_v30  ;;  %v1026_v40 = vrot.slane %v1025_v37, 4  ;;  %v1033_v41 = vrot.slane %v1032_v38, 4  ;;  %v1039_v42 = vsel %vm228_vm2, %v362_v31, -inf  ;;  %262 = vst.msk [vmem:[#allocation3] sm:$0x1] %vm261_vm12, %v5628_v4  ;;  %s7076_s27 = scalar_lea.vmem %s7103_s5, %s5003_s24 }
  0x1b   : > { %v1040_v43 = vrot.slane %v1039_v42, 4  ;;  %v1046_v44 = vsel %vm228_vm2, %v370_v19, -inf  ;;  %v1053_v45 = vsel %vm228_vm2, %v378_v28, -inf  ;;  %v1060_v46 = vsel %vm228_vm2, %v377_v24, -inf  ;;  %263 = vst.msk [vmem:[#allocation3 + $0x10] sm:$0x1] %vm261_vm12, %v5628_v4 }
  0x1c   : > { %v1020_v47 = vmax.f32 %v1018_v36, %v1019_v39  ;;  %v1027_v48 = vmax.f32 %v1025_v37, %v1026_v40  ;;  %v1034_v49 = vmax.f32 %v1032_v38, %v1033_v41  ;;  %v1047_v50 = vrot.slane %v1046_v44, 4  ;;  %264 = vst.msk [vmem:[#allocation3 + $0x20] sm:$0x1] %vm261_vm12, %v5628_v4  ;;  %265 = vst.msk [vmem:[#allocation3 + $0x30] sm:$0x1] %vm261_vm12, %v5628_v4 }
  0x1d   : > { %v1041_v51 = vmax.f32 %v1039_v42, %v1040_v43  ;;  %v1054_v52 = vrot.slane %v1053_v45, 4  ;;  %v1061_v53 = vrot.slane %v1060_v46, 4  ;;  %v1067_v54 = vsel %vm228_vm2, %v379_v32, -inf  ;;  %266 = vst.msk [vmem:[#allocation3 + $0x40] sm:$0x1] %vm261_vm12, %v5628_v4 }
  0x1e   : > { %v2250_v22 = vld [vmem:[#allocation2] sm:$0xff]  ;;  %v1021_v55 = vrot.slane %v1020_v47, 2  ;;  %v1028_v56 = vrot.slane %v1027_v48, 2  ;;  %v1035_v57 = vrot.slane %v1034_v49, 2  ;;  %v1048_v58 = vmax.f32 %v1046_v44, %v1047_v50  ;;  %267 = vst.msk [vmem:[#allocation3 + $0x50] sm:$0x1] %vm261_vm12, %v5628_v4 }
  0x1f   : > { %5340 = vmatprep.mubr.msk.f32.mxu1 %vm226_vm1, %v2250_v22  ;;  %v1042_v59 = vrot.slane %v1041_v51, 2  ;;  %v1055_v60 = vmax.f32 %v1053_v45, %v1054_v52  ;;  %v1062_v61 = vmax.f32 %v1060_v46, %v1061_v53  ;;  %v1068_v62 = vrot.slane %v1067_v54, 4  ;;  %268 = vst.msk [vmem:[#allocation3 + $0x60] sm:$0x1] %vm261_vm12, %v5628_v4  ;;  %269 = vst.msk [vmem:[#allocation3 + $0x70] sm:$0x1] %vm261_vm12, %v5628_v4 }
  0x20   : > { %v1022_v63 = vmax.f32 %v1020_v47, %v1021_v55  ;;  %v1029_v0 = vmax.f32 %v1027_v48, %v1028_v56  ;;  %v1036_v1 = vmax.f32 %v1034_v49, %v1035_v57  ;;  %v1049_v2 = vrot.slane %v1048_v58, 2  ;;  %270 = vst.msk [vmem:[#allocation3 + $0x80] sm:$0x1] %vm261_vm12, %v5628_v4  ;;  %271 = vst.msk [vmem:[#allocation3 + $0x90] sm:$0x1] %vm261_vm12, %v5628_v4 }
  0x21   : > { %v1043_v5 = vmax.f32 %v1041_v51, %v1042_v59  ;;  %v1056_v6 = vrot.slane %v1055_v60, 2  ;;  %v1063_v7 = vrot.slane %v1062_v61, 2  ;;  %v1069_v8 = vmax.f32 %v1067_v54, %v1068_v62  ;;  %273 = vst.msk [vmem:[#allocation3 + $0x19] sm:$0x1] %vm261_vm12, %v5628_v4  ;;  %274 = vst.msk [vmem:[#allocation3 + $0x29] sm:$0x1] %vm261_vm12, %v5628_v4 }
  0x22   : > { %v1023_v9 = vrot.slane %v1022_v63, 1  ;;  %v1030_v10 = vrot.slane %v1029_v0, 1  ;;  %v1037_v11 = vrot.slane %v1036_v1, 1  ;;  %v1050_v13 = vmax.f32 %v1048_v58, %v1049_v2  ;;  %275 = vst.msk [vmem:[#allocation3 + $0x39] sm:$0x1] %vm261_vm12, %v5628_v4 }
  0x23   : > { %v1044_v14 = vrot.slane %v1043_v5, 1  ;;  %v1057_v15 = vmax.f32 %v1055_v60, %v1056_v6  ;;  %v1064_v16 = vmax.f32 %v1062_v61, %v1063_v7  ;;  %v1070_v17 = vrot.slane %v1069_v8, 2  ;;  %276 = vst.msk [vmem:[#allocation3 + $0x49] sm:$0x1] %vm261_vm12, %v5628_v4  ;;  %277 = vst.msk [vmem:[#allocation3 + $0x59] sm:$0x1] %vm261_vm12, %v5628_v4 }
  0x24   : > { %v5784_v18 = vmax.f32 %v1022_v63, %v1023_v9  ;;  %v5786_v19 = vmax.f32 %v1029_v0, %v1030_v10  ;;  %v5788_v21 = vmax.f32 %v1036_v1, %v1037_v11  ;;  %v1051_v22 = vrot.slane %v1050_v13, 1  ;;  %278 = vst.msk [vmem:[#allocation3 + $0x69] sm:$0x1] %vm261_vm12, %v5628_v4  ;;  %279 = vst.msk [vmem:[#allocation3 + $0x79] sm:$0x1] %vm261_vm12, %v5628_v4 }
  0x25   : > { %v5790_v23 = vmax.f32 %v1043_v5, %v1044_v14  ;;  %v1058_v24 = vrot.slane %v1057_v15, 1  ;;  %v1065_v27 = vrot.slane %v1064_v16, 1  ;;  %v1071_v28 = vmax.f32 %v1069_v8, %v1070_v17  ;;  %280 = vst.msk [vmem:[#allocation3 + $0x89] sm:$0x1] %vm261_vm12, %v5628_v4 }
  0x26   : > { %v5792_v31 = vmax.f32 %v1050_v13, %v1051_v22  ;;  %v1074_v32 = vsel %vm228_vm2, %v5753_v20, -inf  ;;  %v1081_v36 = vsel %vm228_vm2, %v395_v29, -inf  ;;  %v1088_v37 = vsel %vm228_vm2, %v5759_v25, -inf  ;;  %257 = vst.msk [vmem:[#allocation3 + $0x8] sm:$0x3] %vm256_vm13, %v5628_v4 }
  0x27   : > { %v5799_v38 = vmax.f32 %v1057_v15, %v1058_v24  ;;  %v5801_v39 = vmax.f32 %v1064_v16, %v1065_v27  ;;  %v1072_v40 = vrot.slane %v1071_v28, 1  ;;  %v1075_v41 = vrot.slane %v1074_v32, 4  ;;  %260 = vst.msk [vmem:[#allocation3 + $0x98] sm:$0x3] %vm256_vm13, %v5628_v4 }
  0x28   : > { %v1082_v42 = vrot.slane %v1081_v36, 4  ;;  %v1089_v43 = vrot.slane %v1088_v37, 4  ;;  %v1095_v44 = vsel %vm228_vm2, %v396_v33, -inf  ;;  %v1102_v20 = vsel %vm228_vm2, %v5762_v26, -inf  ;;  %272 = vst.msk [vmem:[#allocation3 + $0x9] sm:$0x1] %vm261_vm12, %v5628_v4 }
  0x29   : > { %v5809_v29 = vmax.f32 %v1071_v28, %v1072_v40  ;;  %v1076_v45 = vmax.f32 %v1074_v32, %v1075_v41  ;;  %v1096_v46 = vrot.slane %v1095_v44, 4  ;;  %v1103_v47 = vrot.slane %v1102_v20, 4  ;;  %281 = vst.msk [vmem:[#allocation3 + $0x99] sm:$0x1] %vm261_vm12, %v5628_v4 }
  0x2a   : > { %v1083_v48 = vmax.f32 %v1081_v36, %v1082_v42  ;;  %v1090_v49 = vmax.f32 %v1088_v37, %v1089_v43  ;;  %v1109_v50 = vsel %vm228_vm2, %v412_v34, -inf  ;;  %v1116_v25 = vsel %vm228_vm2, %v5768_v30, -inf }
  0x2b   : > { %v1077_v51 = vrot.slane %v1076_v45, 2  ;;  %v1097_v33 = vmax.f32 %v1095_v44, %v1096_v46  ;;  %v1104_v52 = vmax.f32 %v1102_v20, %v1103_v47  ;;  %v1110_v53 = vrot.slane %v1109_v50, 4 }
  0x2c   : > { %v1084_v54 = vrot.slane %v1083_v48, 2  ;;  %v1091_v55 = vrot.slane %v1090_v49, 2  ;;  %v1117_v56 = vrot.slane %v1116_v25, 4  ;;  %v1123_v57 = vsel %vm228_vm2, %v413_v35, -inf }
  0x2d   : > { %v1078_v58 = vmax.f32 %v1076_v45, %v1077_v51  ;;  %v1098_v59 = vrot.slane %v1097_v33, 2  ;;  %v1105_v26 = vrot.slane %v1104_v52, 2  ;;  %v1111_v60 = vmax.f32 %v1109_v50, %v1110_v53  ;;  %v286_v51 = vld [vmem:[%s5742_s30 + $0x20] sm:$0xff] }
  0x2e   : > { %v1085_v34 = vmax.f32 %v1083_v48, %v1084_v54  ;;  %v1092_v61 = vmax.f32 %v1090_v49, %v1091_v55  ;;  %v1118_v62 = vmax.f32 %v1116_v25, %v1117_v56  ;;  %v1124_v63 = vrot.slane %v1123_v57, 4  ;;  %v287_v54 = vld [vmem:[%s5742_s30 + $0x28] sm:$0xff]  ;;  %v288_v55 = vld [vmem:[%s5742_s30 + $0x30] sm:$0xff] }
  0x2f   : > { %v1079_v0 = vrot.slane %v1078_v58, 1  ;;  %v1099_v1 = vmax.f32 %v1097_v33, %v1098_v59  ;;  %v1106_v2 = vmax.f32 %v1104_v52, %v1105_v26  ;;  %v1112_v5 = vrot.slane %v1111_v60, 2 }
  0x30   : > { %v1086_v6 = vrot.slane %v1085_v34, 1  ;;  %v1093_v7 = vrot.slane %v1092_v61, 1  ;;  %v1119_v8 = vrot.slane %v1118_v62, 2  ;;  %v1125_v9 = vmax.f32 %v1123_v57, %v1124_v63 }
  0x31   : > { %v1080_v30 = vmax.f32 %v1078_v58, %v1079_v0  ;;  %v1100_v10 = vrot.slane %v1099_v1, 1  ;;  %v1107_v35 = vrot.slane %v1106_v2, 1  ;;  %v1113_v11 = vmax.f32 %v1111_v60, %v1112_v5 }
  0x32   : > { %v1087_v13 = vmax.f32 %v1085_v34, %v1086_v6  ;;  %v1094_v14 = vmax.f32 %v1092_v61, %v1093_v7  ;;  %v1120_v15 = vmax.f32 %v1118_v62, %v1119_v8  ;;  %v1126_v16 = vrot.slane %v1125_v9, 2 }
  0x33   : > { %v1101_v17 = vmax.f32 %v1099_v1, %v1100_v10  ;;  %v1108_v22 = vmax.f32 %v1106_v2, %v1107_v35  ;;  %v1114_v24 = vrot.slane %v1113_v11, 1  ;;  %v1914_v27 = vsel %vm226_vm1, %v5784_v18, -inf }
  0x34   : > { %v1121_v28 = vrot.slane %v1120_v15, 1  ;;  %v1127_v32 = vmax.f32 %v1125_v9, %v1126_v16  ;;  %v1915_v36 = vsel %vm226_vm1, %v1080_v30, -inf  ;;  %v1917_v37 = vsel %vm226_vm1, %v5786_v19, -inf }
  0x35   : > { %v1115_v40 = vmax.f32 %v1113_v11, %v1114_v24  ;;  %v1916_v41 = vmax.f32 %v1914_v27, %v1915_v36  ;;  %v1918_v42 = vsel %vm226_vm1, %v1087_v13, -inf  ;;  %v1920_v43 = vsel %vm226_vm1, %v5788_v21, -inf }
  0x36   : > { %v1122_v44 = vmax.f32 %v1120_v15, %v1121_v28  ;;  %v1128_v18 = vrot.slane %v1127_v32, 1  ;;  %v1919_v20 = vmax.f32 %v1917_v37, %v1918_v42  ;;  %v1921_v45 = vsel %vm226_vm1, %v1094_v14, -inf }
  0x37   : > { %v1922_v46 = vmax.f32 %v1920_v43, %v1921_v45  ;;  %v1923_v19 = vsel %vm226_vm1, %v5790_v23, -inf  ;;  %v1924_v47 = vsel %vm226_vm1, %v1101_v17, -inf  ;;  %v1926_v48 = vsel %vm226_vm1, %v5792_v31, -inf }
  0x38   : > { %v1129_v49 = vmax.f32 %v1127_v32, %v1128_v18  ;;  %v1925_v21 = vmax.f32 %v1923_v19, %v1924_v47  ;;  %v1927_v50 = vsel %vm226_vm1, %v1108_v22, -inf  ;;  %v1929_v25 = vsel %vm226_vm1, %v5799_v38, -inf }
  0x39   : > { %v1928_v33 = vmax.f32 %v1926_v48, %v1927_v50  ;;  %v1930_v52 = vsel %vm226_vm1, %v1115_v40, -inf  ;;  %v1932_v23 = vsel %vm226_vm1, %v5801_v39, -inf  ;;  %v1933_v53 = vsel %vm226_vm1, %v1122_v44, -inf  ;;  %v289_v39 = vld [vmem:[%s5742_s30 + $0x38] sm:$0xff] }
  0x3a   : > { %v1931_v31 = vmax.f32 %v1929_v25, %v1930_v52  ;;  %v1934_v56 = vmax.f32 %v1932_v23, %v1933_v53  ;;  %v1935_v57 = vsel %vm226_vm1, %v5809_v29, -inf  ;;  %v1936_v58 = vsel %vm226_vm1, %v1129_v49, -inf }
  0x3b   : > { %v1937_v38 = vmax.f32 %v1935_v57, %v1936_v58  ;;  %v2171_v59 = vsel %vm2170_vm4, %v1919_v20, %v1916_v41  ;;  %v414_v26 = vcombine.high %v286_v51, %v286_v51  ;;  %v421_v60 = vrot.slane %v286_v51, %v5747_v12 }
  0x3c   : > { %v2173_v34 = vsel %vm2172_vm5, %v1922_v46, %v2171_v59  ;;  %v431_v61 = vcombine.high %v287_v54, %v287_v54  ;;  %v438_v62 = vrot.slane %v287_v54, %v5747_v12  ;;  %v448_v63 = vcombine.high %v288_v55, %v288_v55 }
  0x3d   : > { %v2175_v0 = vsel %vm2174_vm6, %v1925_v21, %v2173_v34  ;;  %v428_v1 = vrot.slane %v414_v26, %v5747_v12  ;;  %v429_v29 = vcombine.high %v421_v60, %v421_v60  ;;  %v5856_v2 = vrot.slane %v288_v55, %v5747_v12 }
  0x3e   : > { %v2177_v5 = vsel %vm2176_vm7, %v1928_v33, %v2175_v0  ;;  %v445_v6 = vrot.slane %v431_v61, %v5747_v12  ;;  %v446_v7 = vcombine.high %v438_v62, %v438_v62  ;;  %v5861_v8 = vrot.slane %v448_v63, %v5747_v12 }
  0x3f   : > { %v2179_v9 = vsel %vm2178_vm8, %v1931_v31, %v2177_v5  ;;  %v430_v30 = vcombine.high %v428_v1, %v428_v1  ;;  %v463_v10 = vcombine.high %v5856_v2, %v5856_v2  ;;  %v465_v35 = vcombine.high %v289_v39, %v289_v39 }
  0x40   : > { %v2181_v11 = vsel %vm2180_vm9, %v1934_v56, %v2179_v9  ;;  %v447_v13 = vcombine.high %v445_v6, %v445_v6  ;;  %v464_v14 = vcombine.high %v5861_v8, %v5861_v8  ;;  %v5870_v15 = vrot.slane %v289_v39, %v5747_v12 }
  0x41   : > { %v2183_v16 = vsel %vm2182_vm10, %v1937_v38, %v2181_v11  ;;  %v5874_v17 = vrot.slane %v465_v35, %v5747_v12  ;;  %v1130_v22 = vsel %vm228_vm2, %v421_v60, -inf  ;;  %v1137_v24 = vsel %vm228_vm2, %v429_v29, -inf }
  0x42   : > { %2242 = vst.msk [vmem:[#allocation2 + $0x11] sm:$0xff] %vm226_vm1, %v2183_v16  ;;  %v480_v27 = vcombine.high %v5870_v15, %v5870_v15  ;;  %v1131_v28 = vrot.slane %v1130_v22, 4  ;;  %v1138_v32 = vrot.slane %v1137_v24, 4  ;;  %v1144_v36 = vsel %vm228_vm2, %v428_v1, -inf }
  0x43   : > { %v481_v37 = vcombine.high %v5874_v17, %v5874_v17  ;;  %v1145_v40 = vrot.slane %v1144_v36, 4  ;;  %v1151_v41 = vsel %vm228_vm2, %v430_v30, -inf  ;;  %v1158_v42 = vsel %vm228_vm2, %v438_v62, -inf }
  0x44   : > { %v1132_v43 = vmax.f32 %v1130_v22, %v1131_v28  ;;  %v1139_v44 = vmax.f32 %v1137_v24, %v1138_v32  ;;  %v1152_v18 = vrot.slane %v1151_v41, 4  ;;  %v1159_v20 = vrot.slane %v1158_v42, 4 }
  0x45   : > { %v1146_v45 = vmax.f32 %v1144_v36, %v1145_v40  ;;  %v1165_v46 = vsel %vm228_vm2, %v446_v7, -inf  ;;  %v1172_v19 = vsel %vm228_vm2, %v445_v6, -inf  ;;  %v1179_v47 = vsel %vm228_vm2, %v447_v13, -inf }
  0x46   : > { %v1133_v48 = vrot.slane %v1132_v43, 2  ;;  %v1140_v49 = vrot.slane %v1139_v44, 2  ;;  %v1153_v21 = vmax.f32 %v1151_v41, %v1152_v18  ;;  %v1160_v50 = vmax.f32 %v1158_v42, %v1159_v20 }
  0x47   : > { %v1147_v25 = vrot.slane %v1146_v45, 2  ;;  %v1166_v51 = vrot.slane %v1165_v46, 4  ;;  %v1173_v33 = vrot.slane %v1172_v19, 4  ;;  %v1180_v52 = vrot.slane %v1179_v47, 4 }
  0x48   : > { %v1134_v23 = vmax.f32 %v1132_v43, %v1133_v48  ;;  %v1141_v53 = vmax.f32 %v1139_v44, %v1140_v49  ;;  %v1154_v54 = vrot.slane %v1153_v21, 2  ;;  %v1161_v55 = vrot.slane %v1160_v50, 2 }
  0x49   : > { %v2260_v31 = vld [vmem:[#allocation2 + $0x11] sm:$0xff]  ;;  %v1148_v57 = vmax.f32 %v1146_v45, %v1147_v25  ;;  %v1167_v58 = vmax.f32 %v1165_v46, %v1166_v51  ;;  %v1174_v38 = vmax.f32 %v1172_v19, %v1173_v33  ;;  %v1181_v59 = vmax.f32 %v1179_v47, %v1180_v52 }
  0x4a   : > { %v2251_v56 = vld [vmem:[#allocation2 + $0x10] sm:$0xff]  ;;  %5327 = vmatmul.mubr.msk.f32.vlgmr.msra.gmra.mxu0 %vm226_vm1, %v2260_v31  ;;  %v1135_v26 = vrot.slane %v1134_v23, 1  ;;  %v1142_v60 = vrot.slane %v1141_v53, 1  ;;  %v1155_v34 = vmax.f32 %v1153_v21, %v1154_v54  ;;  %v1162_v39 = vmax.f32 %v1160_v50, %v1161_v55 }
  0x4b   : > { %5341 = vmatmul.mubr.msk.f32.vlgmr.msra.gmra.mxu1 %vm226_vm1, %v2251_v56  ;;  %5353 = vmatpush3.msk.msra.mxu0 %vm2292_vm0, %v5681_v3  ;;  %v1149_v61 = vrot.slane %v1148_v57, 1  ;;  %v1168_v62 = vrot.slane %v1167_v58, 2  ;;  %v1175_v63 = vrot.slane %v1174_v38, 2  ;;  %v1182_v0 = vrot.slane %v1181_v59, 2 }
  0x4c   : > { %v5893_v1 = vmax.f32 %v1134_v23, %v1135_v26  ;;  %v5895_v29 = vmax.f32 %v1141_v53, %v1142_v60  ;;  %v1156_v5 = vrot.slane %v1155_v34, 1  ;;  %v1163_v6 = vrot.slane %v1162_v39, 1 }
  0x4d   : > { %v5897_v7 = vmax.f32 %v1148_v57, %v1149_v61  ;;  %v1169_v9 = vmax.f32 %v1167_v58, %v1168_v62  ;;  %v1176_v30 = vmax.f32 %v1174_v38, %v1175_v63  ;;  %v1183_v35 = vmax.f32 %v1181_v59, %v1182_v0 }
  0x4e   : > { %v5899_v11 = vmax.f32 %v1155_v34, %v1156_v5  ;;  %v5901_v13 = vmax.f32 %v1162_v39, %v1163_v6  ;;  %v1186_v3 = vsel %vm228_vm2, %v5856_v2, -inf  ;;  %v1193_v16 = vsel %vm228_vm2, %v463_v10, -inf }
  0x4f   : > { %v1170_v22 = vrot.slane %v1169_v9, 1  ;;  %v1177_v24 = vrot.slane %v1176_v30, 1  ;;  %v1184_v28 = vrot.slane %v1183_v35, 1  ;;  %v1187_v32 = vrot.slane %v1186_v3, 4 }
  0x50   : > { %v1194_v36 = vrot.slane %v1193_v16, 4  ;;  %v1200_v40 = vsel %vm228_vm2, %v5861_v8, -inf  ;;  %v1207_v41 = vsel %vm228_vm2, %v464_v14, -inf  ;;  %v1214_v42 = vsel %vm228_vm2, %v5870_v15, -inf }
  0x51   : > { %v5917_v43 = vmax.f32 %v1169_v9, %v1170_v22  ;;  %v5919_v2 = vmax.f32 %v1176_v30, %v1177_v24  ;;  %v5921_v10 = vmax.f32 %v1183_v35, %v1184_v28  ;;  %v1188_v44 = vmax.f32 %v1186_v3, %v1187_v32 }
  0x52   : > { %v1195_v18 = vmax.f32 %v1193_v16, %v1194_v36  ;;  %v1201_v20 = vrot.slane %v1200_v40, 4  ;;  %v1208_v45 = vrot.slane %v1207_v41, 4  ;;  %v1215_v46 = vrot.slane %v1214_v42, 4 }
  0x53   : > { %v1189_v19 = vrot.slane %v1188_v44, 2  ;;  %v1221_v8 = vsel %vm228_vm2, %v480_v27, -inf  ;;  %v1228_v14 = vsel %vm228_vm2, %v5874_v17, -inf  ;;  %v1235_v47 = vsel %vm228_vm2, %v481_v37, -inf }
  0x54   : > { %v1196_v48 = vrot.slane %v1195_v18, 2  ;;  %v1202_v49 = vmax.f32 %v1200_v40, %v1201_v20  ;;  %v1209_v21 = vmax.f32 %v1207_v41, %v1208_v45  ;;  %v1216_v50 = vmax.f32 %v1214_v42, %v1215_v46 }
  0x55   : > { %v1190_v25 = vmax.f32 %v1188_v44, %v1189_v19  ;;  %v1222_v51 = vrot.slane %v1221_v8, 4  ;;  %v1229_v33 = vrot.slane %v1228_v14, 4  ;;  %v1236_v52 = vrot.slane %v1235_v47, 4 }
  0x56   : > { %v1197_v23 = vmax.f32 %v1195_v18, %v1196_v48  ;;  %v1203_v15 = vrot.slane %v1202_v49, 2  ;;  %v1210_v53 = vrot.slane %v1209_v21, 2  ;;  %v1217_v27 = vrot.slane %v1216_v50, 2 }
  0x57   : > { %v1191_v54 = vrot.slane %v1190_v25, 1  ;;  %v1223_v55 = vmax.f32 %v1221_v8, %v1222_v51  ;;  %v1230_v31 = vmax.f32 %v1228_v14, %v1229_v33  ;;  %v1237_v56 = vmax.f32 %v1235_v47, %v1236_v52  ;;  %v290_v47 = vld [vmem:[%s5742_s30 + $0x40] sm:$0xff] }
  0x58   : > { %v1198_v57 = vrot.slane %v1197_v23, 1  ;;  %v1204_v17 = vmax.f32 %v1202_v49, %v1203_v15  ;;  %v1211_v58 = vmax.f32 %v1209_v21, %v1210_v53  ;;  %v1218_v37 = vmax.f32 %v1216_v50, %v1217_v27  ;;  %v291_v50 = vld [vmem:[%s5742_s30 + $0x48] sm:$0xff]  ;;  %v293_v27 = vld [vmem:[%s5742_s30 + $0x58] sm:$0xff] }
  0x59   : > { %v1192_v38 = vmax.f32 %v1190_v25, %v1191_v54  ;;  %v1224_v59 = vrot.slane %v1223_v55, 2  ;;  %v1231_v26 = vrot.slane %v1230_v31, 2  ;;  %v1238_v60 = vrot.slane %v1237_v56, 2  ;;  %v292_v25 = vld [vmem:[%s5742_s30 + $0x50] sm:$0xff] }
  0x5a   : > { %v1199_v34 = vmax.f32 %v1197_v23, %v1198_v57  ;;  %v1205_v39 = vrot.slane %v1204_v17, 1  ;;  %v1212_v61 = vrot.slane %v1211_v58, 1  ;;  %v1219_v62 = vrot.slane %v1218_v37, 1 }
  0x5b   : > { %v1225_v63 = vmax.f32 %v1223_v55, %v1224_v59  ;;  %v1232_v0 = vmax.f32 %v1230_v31, %v1231_v26  ;;  %v1239_v5 = vmax.f32 %v1237_v56, %v1238_v60  ;;  %v1938_v6 = vsel %vm226_vm1, %v5893_v1, -inf }
  0x5c   : > { %v1206_v9 = vmax.f32 %v1204_v17, %v1205_v39  ;;  %v1213_v30 = vmax.f32 %v1211_v58, %v1212_v61  ;;  %v1220_v35 = vmax.f32 %v1218_v37, %v1219_v62  ;;  %v1939_v3 = vsel %vm226_vm1, %v1192_v38, -inf }
  0x5d   : > { %v1226_v16 = vrot.slane %v1225_v63, 1  ;;  %v1233_v22 = vrot.slane %v1232_v0, 1  ;;  %v1240_v24 = vrot.slane %v1239_v5, 1  ;;  %v1940_v28 = vmax.f32 %v1938_v6, %v1939_v3 }
  0x5e   : > { %v1941_v32 = vsel %vm226_vm1, %v5895_v29, -inf  ;;  %v1942_v36 = vsel %vm226_vm1, %v1199_v34, -inf  ;;  %v1944_v40 = vsel %vm226_vm1, %v5897_v7, -inf  ;;  %v1945_v1 = vsel %vm226_vm1, %v1206_v9, -inf }
  0x5f   : > { %v1227_v41 = vmax.f32 %v1225_v63, %v1226_v16  ;;  %v1234_v42 = vmax.f32 %v1232_v0, %v1233_v22  ;;  %v1241_v44 = vmax.f32 %v1239_v5, %v1240_v24  ;;  %v1943_v18 = vmax.f32 %v1941_v32, %v1942_v36 }
  0x60   : > { %v1946_v20 = vmax.f32 %v1944_v40, %v1945_v1  ;;  %v1947_v45 = vsel %vm226_vm1, %v5899_v11, -inf  ;;  %v1948_v29 = vsel %vm226_vm1, %v1213_v30, -inf  ;;  %v1950_v46 = vsel %vm226_vm1, %v5901_v13, -inf }
  0x61   : > { %v1949_v19 = vmax.f32 %v1947_v45, %v1948_v29  ;;  %v1951_v7 = vsel %vm226_vm1, %v1220_v35, -inf  ;;  %v1953_v8 = vsel %vm226_vm1, %v5917_v43, -inf  ;;  %v1954_v14 = vsel %vm226_vm1, %v1227_v41, -inf }
  0x62   : > { %v1952_v48 = vmax.f32 %v1950_v46, %v1951_v7  ;;  %v1955_v49 = vmax.f32 %v1953_v8, %v1954_v14  ;;  %v1956_v11 = vsel %vm226_vm1, %v5919_v2, -inf  ;;  %v1957_v21 = vsel %vm226_vm1, %v1234_v42, -inf }
  0x63   : > { %v1958_v13 = vmax.f32 %v1956_v11, %v1957_v21  ;;  %v1959_v51 = vsel %vm226_vm1, %v5921_v10, -inf  ;;  %v1960_v33 = vsel %vm226_vm1, %v1241_v44, -inf  ;;  %v2184_v43 = vsel %vm2170_vm4, %v1943_v18, %v1940_v28 }
  0x64   : > { %v1961_v52 = vmax.f32 %v1959_v51, %v1960_v33  ;;  %v2185_v23 = vsel %vm2172_vm5, %v1946_v20, %v2184_v43  ;;  %v482_v15 = vcombine.high %v290_v47, %v290_v47  ;;  %v489_v53 = vrot.slane %v290_v47, %v5747_v12 }
  0x65   : > { %v2186_v2 = vsel %vm2174_vm6, %v1949_v19, %v2185_v23  ;;  %v499_v54 = vcombine.high %v291_v50, %v291_v50  ;;  %v506_v55 = vrot.slane %v291_v50, %v5747_v12  ;;  %v516_v31 = vcombine.high %v292_v25, %v292_v25 }
  0x66   : > { %v2187_v56 = vsel %vm2176_vm7, %v1952_v48, %v2186_v2  ;;  %v496_v10 = vrot.slane %v482_v15, %v5747_v12  ;;  %v497_v57 = vcombine.high %v489_v53, %v489_v53  ;;  %v5969_v17 = vrot.slane %v292_v25, %v5747_v12 }
  0x67   : > { %v2188_v58 = vsel %vm2178_vm8, %v1955_v49, %v2187_v56  ;;  %v513_v37 = vrot.slane %v499_v54, %v5747_v12  ;;  %v514_v38 = vcombine.high %v506_v55, %v506_v55  ;;  %v5974_v59 = vrot.slane %v516_v31, %v5747_v12 }
  0x68   : > { %v2189_v26 = vsel %vm2180_vm9, %v1958_v13, %v2188_v58  ;;  %v498_v60 = vcombine.high %v496_v10, %v496_v10  ;;  %v531_v34 = vcombine.high %v5969_v17, %v5969_v17  ;;  %v533_v39 = vcombine.high %v293_v27, %v293_v27 }
  0x69   : > { %v2190_v61 = vsel %vm2182_vm10, %v1961_v52, %v2189_v26  ;;  %v515_v62 = vcombine.high %v513_v37, %v513_v37  ;;  %v532_v63 = vcombine.high %v5974_v59, %v5974_v59  ;;  %v5983_v0 = vrot.slane %v293_v27, %v5747_v12 }
  0x6a   : > { %2243 = vst.msk [vmem:[#allocation2 + $0x21] sm:$0xff] %vm226_vm1, %v2190_v61  ;;  %v5987_v5 = vrot.slane %v533_v39, %v5747_v12  ;;  %v1242_v6 = vsel %vm228_vm2, %v489_v53, -inf  ;;  %v1249_v9 = vsel %vm228_vm2, %v497_v57, -inf  ;;  %v1256_v30 = vsel %vm228_vm2, %v496_v10, -inf }
  0x6b   : > { %v548_v35 = vcombine.high %v5983_v0, %v5983_v0  ;;  %v1243_v3 = vrot.slane %v1242_v6, 4  ;;  %v1250_v16 = vrot.slane %v1249_v9, 4  ;;  %v1257_v22 = vrot.slane %v1256_v30, 4 }
  0x6c   : > { %v549_v24 = vcombine.high %v5987_v5, %v5987_v5  ;;  %v1263_v28 = vsel %vm228_vm2, %v498_v60, -inf  ;;  %v1270_v32 = vsel %vm228_vm2, %v506_v55, -inf  ;;  %v1277_v36 = vsel %vm228_vm2, %v514_v38, -inf }
  0x6d   : > { %v1244_v40 = vmax.f32 %v1242_v6, %v1243_v3  ;;  %v1251_v1 = vmax.f32 %v1249_v9, %v1250_v16  ;;  %v1258_v41 = vmax.f32 %v1256_v30, %v1257_v22  ;;  %v1264_v42 = vrot.slane %v1263_v28, 4 }
  0x6e   : > { %v1271_v44 = vrot.slane %v1270_v32, 4  ;;  %v1278_v18 = vrot.slane %v1277_v36, 4  ;;  %v1284_v20 = vsel %vm228_vm2, %v513_v37, -inf  ;;  %v1291_v45 = vsel %vm228_vm2, %v515_v62, -inf }
  0x6f   : > { %v1245_v29 = vrot.slane %v1244_v40, 2  ;;  %v1252_v46 = vrot.slane %v1251_v1, 2  ;;  %v1259_v19 = vrot.slane %v1258_v41, 2  ;;  %v1265_v7 = vmax.f32 %v1263_v28, %v1264_v42 }
  0x70   : > { %v1272_v8 = vmax.f32 %v1270_v32, %v1271_v44  ;;  %v1279_v14 = vmax.f32 %v1277_v36, %v1278_v18  ;;  %v1285_v47 = vrot.slane %v1284_v20, 4  ;;  %v1292_v48 = vrot.slane %v1291_v45, 4 }
  0x71   : > { %v2261_v49 = vld [vmem:[#allocation2 + $0x21] sm:$0xff]  ;;  %v1246_v21 = vmax.f32 %v1244_v40, %v1245_v29  ;;  %v1253_v50 = vmax.f32 %v1251_v1, %v1252_v46  ;;  %v1260_v25 = vmax.f32 %v1258_v41, %v1259_v19  ;;  %v1266_v13 = vrot.slane %v1265_v7, 2 }
  0x72   : > { %v2252_v11 = vld [vmem:[#allocation2 + $0x20] sm:$0xff]  ;;  %5329 = vmatprep.mubr.msk.f32.mxu0 %vm226_vm1, %v2261_v49  ;;  %v1273_v51 = vrot.slane %v1272_v8, 2  ;;  %v1280_v33 = vrot.slane %v1279_v14, 2  ;;  %v1286_v43 = vmax.f32 %v1284_v20, %v1285_v47  ;;  %v1293_v52 = vmax.f32 %v1291_v45, %v1292_v48 }
  0x73   : > { %5343 = vmatprep.mubr.msk.f32.mxu1 %vm226_vm1, %v2252_v11  ;;  %v1247_v23 = vrot.slane %v1246_v21, 1  ;;  %v1254_v15 = vrot.slane %v1253_v50, 1  ;;  %v1261_v53 = vrot.slane %v1260_v25, 1  ;;  %v1267_v2 = vmax.f32 %v1265_v7, %v1266_v13 }
  0x74   : > { %v1274_v27 = vmax.f32 %v1272_v8, %v1273_v51  ;;  %v1281_v54 = vmax.f32 %v1279_v14, %v1280_v33  ;;  %v1287_v55 = vrot.slane %v1286_v43, 2  ;;  %v1294_v31 = vrot.slane %v1293_v52, 2 }
  0x75   : > { %v6003_v56 = vmax.f32 %v1246_v21, %v1247_v23  ;;  %v6005_v10 = vmax.f32 %v1253_v50, %v1254_v15  ;;  %v6007_v57 = vmax.f32 %v1260_v25, %v1261_v53  ;;  %v1268_v58 = vrot.slane %v1267_v2, 1 }
  0x76   : > { %v1275_v37 = vrot.slane %v1274_v27, 1  ;;  %v1282_v38 = vrot.slane %v1281_v54, 1  ;;  %v1288_v26 = vmax.f32 %v1286_v43, %v1287_v55  ;;  %v1295_v60 = vmax.f32 %v1293_v52, %v1294_v31 }
  0x77   : > { %v6009_v39 = vmax.f32 %v1267_v2, %v1268_v58  ;;  %v1298_v61 = vsel %vm228_vm2, %v5969_v17, -inf  ;;  %v1305_v62 = vsel %vm228_vm2, %v531_v34, -inf  ;;  %v1312_v6 = vsel %vm228_vm2, %v5974_v59, -inf }
  0x78   : > { %v6019_v9 = vmax.f32 %v1274_v27, %v1275_v37  ;;  %v6021_v30 = vmax.f32 %v1281_v54, %v1282_v38  ;;  %v1289_v3 = vrot.slane %v1288_v26, 1  ;;  %v1296_v16 = vrot.slane %v1295_v60, 1 }
  0x79   : > { %v1299_v22 = vrot.slane %v1298_v61, 4  ;;  %v1306_v28 = vrot.slane %v1305_v62, 4  ;;  %v1313_v32 = vrot.slane %v1312_v6, 4  ;;  %v1319_v36 = vsel %vm228_vm2, %v532_v63, -inf }
  0x7a   : > { %v6027_v17 = vmax.f32 %v1288_v26, %v1289_v3  ;;  %v6029_v34 = vmax.f32 %v1295_v60, %v1296_v16  ;;  %v1320_v40 = vrot.slane %v1319_v36, 4  ;;  %v1326_v1 = vsel %vm228_vm2, %v5983_v0, -inf }
  0x7b   : > { %v1300_v41 = vmax.f32 %v1298_v61, %v1299_v22  ;;  %v1307_v42 = vmax.f32 %v1305_v62, %v1306_v28  ;;  %v1314_v44 = vmax.f32 %v1312_v6, %v1313_v32  ;;  %v1327_v18 = vrot.slane %v1326_v1, 4 }
  0x7c   : > { %v1321_v20 = vmax.f32 %v1319_v36, %v1320_v40  ;;  %v1333_v59 = vsel %vm228_vm2, %v548_v35, -inf  ;;  %v1340_v63 = vsel %vm228_vm2, %v5987_v5, -inf  ;;  %v1347_v45 = vsel %vm228_vm2, %v549_v24, -inf }
  0x7d   : > { %v1301_v29 = vrot.slane %v1300_v41, 2  ;;  %v1308_v46 = vrot.slane %v1307_v42, 2  ;;  %v1315_v19 = vrot.slane %v1314_v44, 2  ;;  %v1328_v7 = vmax.f32 %v1326_v1, %v1327_v18 }
  0x7e   : > { %v1322_v8 = vrot.slane %v1321_v20, 2  ;;  %v1334_v14 = vrot.slane %v1333_v59, 4  ;;  %v1341_v47 = vrot.slane %v1340_v63, 4  ;;  %v1348_v48 = vrot.slane %v1347_v45, 4 }
  0x7f   : > { %v1302_v49 = vmax.f32 %v1300_v41, %v1301_v29  ;;  %v1309_v0 = vmax.f32 %v1307_v42, %v1308_v46  ;;  %v1316_v11 = vmax.f32 %v1314_v44, %v1315_v19  ;;  %v1329_v35 = vrot.slane %v1328_v7, 2 }
  0x80   : > { %v1323_v21 = vmax.f32 %v1321_v20, %v1322_v8  ;;  %v1335_v50 = vmax.f32 %v1333_v59, %v1334_v14  ;;  %v1342_v25 = vmax.f32 %v1340_v63, %v1341_v47  ;;  %v1349_v13 = vmax.f32 %v1347_v45, %v1348_v48  ;;  %v295_v45 = vld [vmem:[%s5742_s30 + $0x68] sm:$0xff] }
  0x81   : > { %v1303_v51 = vrot.slane %v1302_v49, 1  ;;  %v1310_v5 = vrot.slane %v1309_v0, 1  ;;  %v1317_v33 = vrot.slane %v1316_v11, 1  ;;  %v1330_v24 = vmax.f32 %v1328_v7, %v1329_v35  ;;  %v296_v7 = vld [vmem:[%s5742_s30 + $0x70] sm:$0xff]  ;;  %v297_v35 = vld [vmem:[%s5742_s30 + $0x78] sm:$0xff] }
  0x82   : > { %v1324_v43 = vrot.slane %v1323_v21, 1  ;;  %v1336_v52 = vrot.slane %v1335_v50, 2  ;;  %v1343_v23 = vrot.slane %v1342_v25, 2  ;;  %v1350_v15 = vrot.slane %v1349_v13, 2 }
  0x83   : > { %v1304_v53 = vmax.f32 %v1302_v49, %v1303_v51  ;;  %v1311_v2 = vmax.f32 %v1309_v0, %v1310_v5  ;;  %v1318_v27 = vmax.f32 %v1316_v11, %v1317_v33  ;;  %v1331_v54 = vrot.slane %v1330_v24, 1 }
  0x84   : > { %v1325_v55 = vmax.f32 %v1323_v21, %v1324_v43  ;;  %v1337_v31 = vmax.f32 %v1335_v50, %v1336_v52  ;;  %v1344_v58 = vmax.f32 %v1342_v25, %v1343_v23  ;;  %v1351_v37 = vmax.f32 %v1349_v13, %v1350_v15 }
  0x85   : > { %v1332_v38 = vmax.f32 %v1330_v24, %v1331_v54  ;;  %v1962_v26 = vsel %vm226_vm1, %v6003_v56, -inf  ;;  %v1963_v60 = vsel %vm226_vm1, %v1304_v53, -inf  ;;  %v1965_v61 = vsel %vm226_vm1, %v6005_v10, -inf }
  0x86   : > { %v1338_v62 = vrot.slane %v1337_v31, 1  ;;  %v1345_v6 = vrot.slane %v1344_v58, 1  ;;  %v1352_v3 = vrot.slane %v1351_v37, 1  ;;  %v1964_v16 = vmax.f32 %v1962_v26, %v1963_v60 }
  0x87   : > { %v1966_v22 = vsel %vm226_vm1, %v1311_v2, -inf  ;;  %v1968_v28 = vsel %vm226_vm1, %v6007_v57, -inf  ;;  %v1969_v32 = vsel %vm226_vm1, %v1318_v27, -inf  ;;  %v1971_v56 = vsel %vm226_vm1, %v6009_v39, -inf  ;;  %v294_v57 = vld [vmem:[%s5742_s30 + $0x60] sm:$0xff] }
  0x88   : > { %v1339_v36 = vmax.f32 %v1337_v31, %v1338_v62  ;;  %v1346_v40 = vmax.f32 %v1344_v58, %v1345_v6  ;;  %v1353_v1 = vmax.f32 %v1351_v37, %v1352_v3  ;;  %v1967_v10 = vmax.f32 %v1965_v61, %v1966_v22 }
  0x89   : > { %v1970_v41 = vmax.f32 %v1968_v28, %v1969_v32  ;;  %v1972_v42 = vsel %vm226_vm1, %v1325_v55, -inf  ;;  %v1974_v44 = vsel %vm226_vm1, %v6019_v9, -inf  ;;  %v1975_v18 = vsel %vm226_vm1, %v1332_v38, -inf }
  0x8a   : > { %v1973_v20 = vmax.f32 %v1971_v56, %v1972_v42  ;;  %v1976_v59 = vmax.f32 %v1974_v44, %v1975_v18  ;;  %v1977_v63 = vsel %vm226_vm1, %v6021_v30, -inf  ;;  %v1978_v39 = vsel %vm226_vm1, %v1339_v36, -inf }
  0x8b   : > { %v1979_v29 = vmax.f32 %v1977_v63, %v1978_v39  ;;  %v1980_v46 = vsel %vm226_vm1, %v6027_v17, -inf  ;;  %v1981_v19 = vsel %vm226_vm1, %v1346_v40, -inf  ;;  %v1983_v9 = vsel %vm226_vm1, %v6029_v34, -inf }
  0x8c   : > { %v1982_v8 = vmax.f32 %v1980_v46, %v1981_v19  ;;  %v1984_v14 = vsel %vm226_vm1, %v1353_v1, -inf  ;;  %v2191_v47 = vsel %vm2170_vm4, %v1967_v10, %v1964_v16  ;;  %v550_v30 = vcombine.high %v294_v57, %v294_v57 }
  0x8d   : > { %v1985_v48 = vmax.f32 %v1983_v9, %v1984_v14  ;;  %v2192_v49 = vsel %vm2172_vm5, %v1970_v41, %v2191_v47  ;;  %v557_v0 = vrot.slane %v294_v57, %v5747_v12  ;;  %v567_v11 = vcombine.high %v295_v45, %v295_v45 }
  0x8e   : > { %v2193_v17 = vsel %vm2174_vm6, %v1973_v20, %v2192_v49  ;;  %v564_v21 = vrot.slane %v550_v30, %v5747_v12  ;;  %v574_v34 = vrot.slane %v295_v45, %v5747_v12  ;;  %v584_v50 = vcombine.high %v296_v7, %v296_v7 }
  0x8f   : > { %v2194_v25 = vsel %vm2176_vm7, %v1976_v59, %v2193_v17  ;;  %v565_v13 = vcombine.high %v557_v0, %v557_v0  ;;  %v581_v51 = vrot.slane %v567_v11, %v5747_v12  ;;  %v6080_v5 = vrot.slane %v296_v7, %v5747_v12 }
  0x90   : > { %v2195_v33 = vsel %vm2178_vm8, %v1979_v29, %v2194_v25  ;;  %v566_v24 = vcombine.high %v564_v21, %v564_v21  ;;  %v582_v43 = vcombine.high %v574_v34, %v574_v34  ;;  %v6084_v52 = vrot.slane %v584_v50, %v5747_v12 }
  0x91   : > { %v2196_v23 = vsel %vm2180_vm9, %v1982_v8, %v2195_v33  ;;  %v583_v15 = vcombine.high %v581_v51, %v581_v51  ;;  %v599_v53 = vcombine.high %v6080_v5, %v6080_v5  ;;  %v601_v2 = vcombine.high %v297_v35, %v297_v35 }
  0x92   : > { %v2197_v27 = vsel %vm2182_vm10, %v1985_v48, %v2196_v23  ;;  %v600_v54 = vcombine.high %v6084_v52, %v6084_v52  ;;  %v6093_v55 = vrot.slane %v297_v35, %v5747_v12  ;;  %v1354_v31 = vsel %vm228_vm2, %v557_v0, -inf }
  0x93   : > { %2244 = vst.msk [vmem:[#allocation2 + $0x31] sm:$0xff] %vm226_vm1, %v2197_v27  ;;  %v6098_v58 = vrot.slane %v601_v2, %v5747_v12  ;;  %v1355_v37 = vrot.slane %v1354_v31, 4  ;;  %v1361_v38 = vsel %vm228_vm2, %v565_v13, -inf  ;;  %v1368_v26 = vsel %vm228_vm2, %v564_v21, -inf }
  0x94   : > { %v616_v60 = vcombine.high %v6093_v55, %v6093_v55  ;;  %v1362_v61 = vrot.slane %v1361_v38, 4  ;;  %v1369_v62 = vrot.slane %v1368_v26, 4  ;;  %v1375_v6 = vsel %vm228_vm2, %v566_v24, -inf }
  0x95   : > { %v617_v3 = vcombine.high %v6098_v58, %v6098_v58  ;;  %v1356_v16 = vmax.f32 %v1354_v31, %v1355_v37  ;;  %v1376_v22 = vrot.slane %v1375_v6, 4  ;;  %v1382_v28 = vsel %vm228_vm2, %v574_v34, -inf }
  0x96   : > { %v1363_v32 = vmax.f32 %v1361_v38, %v1362_v61  ;;  %v1370_v56 = vmax.f32 %v1368_v26, %v1369_v62  ;;  %v1383_v36 = vrot.slane %v1382_v28, 4  ;;  %v1389_v40 = vsel %vm228_vm2, %v582_v43, -inf }
  0x97   : > { %v1357_v1 = vrot.slane %v1356_v16, 2  ;;  %v1377_v10 = vmax.f32 %v1375_v6, %v1376_v22  ;;  %v1390_v41 = vrot.slane %v1389_v40, 4  ;;  %v1396_v42 = vsel %vm228_vm2, %v581_v51, -inf }
  0x98   : > { %v1364_v44 = vrot.slane %v1363_v32, 2  ;;  %v1371_v18 = vrot.slane %v1370_v56, 2  ;;  %v1384_v57 = vmax.f32 %v1382_v28, %v1383_v36  ;;  %v1397_v20 = vrot.slane %v1396_v42, 4 }
  0x99   : > { %v1358_v59 = vmax.f32 %v1356_v16, %v1357_v1  ;;  %v1378_v63 = vrot.slane %v1377_v10, 2  ;;  %v1391_v39 = vmax.f32 %v1389_v40, %v1390_v41  ;;  %v1403_v45 = vsel %vm228_vm2, %v583_v15, -inf }
  0x9a   : > { %v2262_v29 = vld [vmem:[#allocation2 + $0x31] sm:$0xff]  ;;  %v1365_v19 = vmax.f32 %v1363_v32, %v1364_v44  ;;  %v1372_v9 = vmax.f32 %v1370_v56, %v1371_v18  ;;  %v1385_v7 = vrot.slane %v1384_v57, 2  ;;  %v1398_v8 = vmax.f32 %v1396_v42, %v1397_v20 }
  0x9b   : > { %v2253_v46 = vld [vmem:[#allocation2 + $0x30] sm:$0xff]  ;;  %5330 = vmatmul.mubr.msk.f32.gmra.mxu0 %vm226_vm1, %v2262_v29  ;;  %v1359_v14 = vrot.slane %v1358_v59, 1  ;;  %v1379_v47 = vmax.f32 %v1377_v10, %v1378_v63  ;;  %v1392_v30 = vrot.slane %v1391_v39, 2  ;;  %v1404_v48 = vrot.slane %v1403_v45, 4 }
  0x9c   : > { %5344 = vmatmul.mubr.msk.f32.gmra.mxu1 %vm226_vm1, %v2253_v46  ;;  %v1366_v49 = vrot.slane %v1365_v19, 1  ;;  %v1373_v0 = vrot.slane %v1372_v9, 1  ;;  %v1386_v11 = vmax.f32 %v1384_v57, %v1385_v7  ;;  %v1399_v17 = vrot.slane %v1398_v8, 2 }
  0x9d   : > { %v6113_v35 = vmax.f32 %v1358_v59, %v1359_v14  ;;  %v1380_v21 = vrot.slane %v1379_v47, 1  ;;  %v1393_v34 = vmax.f32 %v1391_v39, %v1392_v30  ;;  %v1405_v50 = vmax.f32 %v1403_v45, %v1404_v48 }
  0x9e   : > { %v6115_v25 = vmax.f32 %v1365_v19, %v1366_v49  ;;  %v6117_v13 = vmax.f32 %v1372_v9, %v1373_v0  ;;  %v1387_v51 = vrot.slane %v1386_v11, 1  ;;  %v1400_v33 = vmax.f32 %v1398_v8, %v1399_v17 }
  0x9f   : > { %v6119_v24 = vmax.f32 %v1379_v47, %v1380_v21  ;;  %v1394_v43 = vrot.slane %v1393_v34, 1  ;;  %v1406_v23 = vrot.slane %v1405_v50, 2  ;;  %v1410_v15 = vsel %vm228_vm2, %v6080_v5, -inf }
  0xa0   : > { %v6123_v2 = vmax.f32 %v1386_v11, %v1387_v51  ;;  %v1401_v27 = vrot.slane %v1400_v33, 1  ;;  %v1411_v31 = vrot.slane %v1410_v15, 4  ;;  %v1417_v37 = vsel %vm228_vm2, %v599_v53, -inf }
  0xa1   : > { %v6129_v38 = vmax.f32 %v1393_v34, %v1394_v43  ;;  %v1407_v26 = vmax.f32 %v1405_v50, %v1406_v23  ;;  %v1418_v61 = vrot.slane %v1417_v37, 4  ;;  %v1424_v62 = vsel %vm228_vm2, %v6084_v52, -inf }
  0xa2   : > { %v6133_v6 = vmax.f32 %v1400_v33, %v1401_v27  ;;  %v1412_v16 = vmax.f32 %v1410_v15, %v1411_v31  ;;  %v1425_v22 = vrot.slane %v1424_v62, 4  ;;  %v1431_v28 = vsel %vm228_vm2, %v600_v54, -inf }
  0xa3   : > { %v1408_v32 = vrot.slane %v1407_v26, 1  ;;  %v1419_v5 = vmax.f32 %v1417_v37, %v1418_v61  ;;  %v1432_v56 = vrot.slane %v1431_v28, 4  ;;  %v1438_v53 = vsel %vm228_vm2, %v6093_v55, -inf }
  0xa4   : > { %v1413_v36 = vrot.slane %v1412_v16, 2  ;;  %v1426_v40 = vmax.f32 %v1424_v62, %v1425_v22  ;;  %v1439_v1 = vrot.slane %v1438_v53, 4  ;;  %v1445_v10 = vsel %vm228_vm2, %v616_v60, -inf }
  0xa5   : > { %v6145_v41 = vmax.f32 %v1407_v26, %v1408_v32  ;;  %v1420_v42 = vrot.slane %v1419_v5, 2  ;;  %v1433_v52 = vmax.f32 %v1431_v28, %v1432_v56  ;;  %v1446_v44 = vrot.slane %v1445_v10, 4 }
  0xa6   : > { %v1414_v54 = vmax.f32 %v1412_v16, %v1413_v36  ;;  %v1427_v18 = vrot.slane %v1426_v40, 2  ;;  %v1440_v57 = vmax.f32 %v1438_v53, %v1439_v1  ;;  %v1452_v20 = vsel %vm228_vm2, %v6098_v58, -inf  ;;  %v298_v1 = vld [vmem:[%s5742_s30 + $0x80] sm:$0xff] }
  0xa7   : > { %v1421_v59 = vmax.f32 %v1419_v5, %v1420_v42  ;;  %v1434_v63 = vrot.slane %v1433_v52, 2  ;;  %v1447_v39 = vmax.f32 %v1445_v10, %v1446_v44  ;;  %v1453_v45 = vrot.slane %v1452_v20, 4  ;;  %v299_v10 = vld [vmem:[%s5742_s30 + $0x88] sm:$0xff] }
  0xa8   : > { %v1415_v29 = vrot.slane %v1414_v54, 1  ;;  %v1428_v46 = vmax.f32 %v1426_v40, %v1427_v18  ;;  %v1441_v55 = vrot.slane %v1440_v57, 2  ;;  %v1459_v60 = vsel %vm228_vm2, %v617_v3, -inf }
  0xa9   : > { %v1422_v19 = vrot.slane %v1421_v59, 1  ;;  %v1435_v9 = vmax.f32 %v1433_v52, %v1434_v63  ;;  %v1448_v7 = vrot.slane %v1447_v39, 2  ;;  %v1454_v8 = vmax.f32 %v1452_v20, %v1453_v45 }
  0xaa   : > { %v1416_v14 = vmax.f32 %v1414_v54, %v1415_v29  ;;  %v1429_v47 = vrot.slane %v1428_v46, 1  ;;  %v1442_v30 = vmax.f32 %v1440_v57, %v1441_v55  ;;  %v1460_v48 = vrot.slane %v1459_v60, 4  ;;  %v300_v54 = vld [vmem:[%s5742_s30 + $0x90] sm:$0xff] }
  0xab   : > { %v1423_v49 = vmax.f32 %v1421_v59, %v1422_v19  ;;  %v1436_v0 = vrot.slane %v1435_v9, 1  ;;  %v1449_v11 = vmax.f32 %v1447_v39, %v1448_v7  ;;  %v1455_v17 = vrot.slane %v1454_v8, 2 }
  0xac   : > { %v1430_v21 = vmax.f32 %v1428_v46, %v1429_v47  ;;  %v1443_v34 = vrot.slane %v1442_v30, 1  ;;  %v1461_v50 = vmax.f32 %v1459_v60, %v1460_v48  ;;  %v1986_v58 = vsel %vm226_vm1, %v6113_v35, -inf }
  0xad   : > { %v1437_v51 = vmax.f32 %v1435_v9, %v1436_v0  ;;  %v1450_v3 = vrot.slane %v1449_v11, 1  ;;  %v1456_v33 = vmax.f32 %v1454_v8, %v1455_v17  ;;  %v1987_v43 = vsel %vm226_vm1, %v1416_v14, -inf }
  0xae   : > { %v1444_v23 = vmax.f32 %v1442_v30, %v1443_v34  ;;  %v1462_v15 = vrot.slane %v1461_v50, 2  ;;  %v1988_v27 = vmax.f32 %v1986_v58, %v1987_v43  ;;  %v1989_v31 = vsel %vm226_vm1, %v6115_v25, -inf }
  0xaf   : > { %v1451_v37 = vmax.f32 %v1449_v11, %v1450_v3  ;;  %v1457_v26 = vrot.slane %v1456_v33, 1  ;;  %v1990_v61 = vsel %vm226_vm1, %v1423_v49, -inf  ;;  %v1992_v35 = vsel %vm226_vm1, %v6117_v13, -inf }
  0xb0   : > { %v1463_v62 = vmax.f32 %v1461_v50, %v1462_v15  ;;  %v1991_v16 = vmax.f32 %v1989_v31, %v1990_v61  ;;  %v1993_v22 = vsel %vm226_vm1, %v1430_v21, -inf  ;;  %v1995_v28 = vsel %vm226_vm1, %v6119_v24, -inf }
  0xb1   : > { %v1458_v32 = vmax.f32 %v1456_v33, %v1457_v26  ;;  %v1994_v5 = vmax.f32 %v1992_v35, %v1993_v22  ;;  %v1996_v25 = vsel %vm226_vm1, %v1437_v51, -inf  ;;  %v1998_v56 = vsel %vm226_vm1, %v6123_v2, -inf  ;;  %v2690_v22 = vld [vmem:[%s7099_s1 + $0xc] sm:$0xf] }
  0xb2   : > { %v1464_v53 = vrot.slane %v1463_v62, 1  ;;  %v1997_v36 = vmax.f32 %v1995_v28, %v1996_v25  ;;  %v1999_v40 = vsel %vm226_vm1, %v1444_v23, -inf  ;;  %v2001_v13 = vsel %vm226_vm1, %v6129_v38, -inf  ;;  %5366 = vmatprep.subr.msk.mxu1 %vm2292_vm0, %v2690_v22 }
  0xb3   : > { %v2000_v42 = vmax.f32 %v1998_v56, %v1999_v40  ;;  %v2002_v24 = vsel %vm226_vm1, %v1451_v37, -inf  ;;  %v2004_v52 = vsel %vm226_vm1, %v6133_v6, -inf  ;;  %v2005_v44 = vsel %vm226_vm1, %v1458_v32, -inf  ;;  %v301_v6 = vld [vmem:[%s5742_s30 + $0x98] sm:$0xff]  ;;  %v2839_v56 = vld [vmem:[%s7099_s1 + $0x10] sm:$0xf]  ;;  %5367 = vmatpush3.msk.msra.mxu1 %vm2292_vm0, %v2690_v22 }
  0xb4   : > { %v1465_v2 = vmax.f32 %v1463_v62, %v1464_v53  ;;  %v2003_v18 = vmax.f32 %v2001_v13, %v2002_v24  ;;  %v2006_v57 = vmax.f32 %v2004_v52, %v2005_v44  ;;  %v2007_v20 = vsel %vm226_vm1, %v6145_v41, -inf  ;;  %5380 = vmatprep.subr.msk.mxu0 %vm2292_vm0, %v2839_v56 }
  0xb5   : > { %v2198_v38 = vsel %vm2170_vm4, %v1991_v16, %v1988_v27  ;;  %v618_v59 = vcombine.high %v298_v1, %v298_v1  ;;  %v625_v63 = vrot.slane %v298_v1, %v5747_v12  ;;  %v635_v39 = vcombine.high %v299_v10, %v299_v10 }
  0xb6   : > { %v2008_v45 = vsel %vm226_vm1, %v1465_v2, -inf  ;;  %v2199_v29 = vsel %vm2172_vm5, %v1994_v5, %v2198_v38  ;;  %v642_v46 = vrot.slane %v299_v10, %v5747_v12  ;;  %v652_v55 = vcombine.high %v300_v54, %v300_v54 }
  0xb7   : > { %v2009_v60 = vmax.f32 %v2007_v20, %v2008_v45  ;;  %v2200_v19 = vsel %vm2174_vm6, %v1997_v36, %v2199_v29  ;;  %v632_v9 = vrot.slane %v618_v59, %v5747_v12  ;;  %v633_v41 = vcombine.high %v625_v63, %v625_v63 }
  0xb8   : > { %v2201_v7 = vsel %vm2176_vm7, %v2000_v42, %v2200_v19  ;;  %v649_v8 = vrot.slane %v635_v39, %v5747_v12  ;;  %v650_v14 = vcombine.high %v642_v46, %v642_v46  ;;  %v6190_v47 = vrot.slane %v300_v54, %v5747_v12 }
  0xb9   : > { %v2202_v30 = vsel %vm2178_vm8, %v2003_v18, %v2201_v7  ;;  %v634_v48 = vcombine.high %v632_v9, %v632_v9  ;;  %v6194_v49 = vrot.slane %v652_v55, %v5747_v12  ;;  %v669_v0 = vcombine.high %v301_v6, %v301_v6 }
  0xba   : > { %v2203_v11 = vsel %vm2180_vm9, %v2006_v57, %v2202_v30  ;;  %v651_v17 = vcombine.high %v649_v8, %v649_v8  ;;  %v667_v21 = vcombine.high %v6190_v47, %v6190_v47  ;;  %v6200_v34 = vrot.slane %v301_v6, %v5747_v12 }
  0xbb   : > { %v2204_v50 = vsel %vm2182_vm10, %v2009_v60, %v2203_v11  ;;  %v668_v58 = vcombine.high %v6194_v49, %v6194_v49  ;;  %v6206_v51 = vrot.slane %v669_v0, %v5747_v12  ;;  %v1466_v3 = vsel %vm228_vm2, %v625_v63, -inf }
  0xbc   : > { %2245 = vst.msk [vmem:[#allocation2 + $0x41] sm:$0xff] %vm226_vm1, %v2204_v50  ;;  %v684_v33 = vcombine.high %v6200_v34, %v6200_v34  ;;  %v1467_v43 = vrot.slane %v1466_v3, 4  ;;  %v1473_v23 = vsel %vm228_vm2, %v633_v41, -inf  ;;  %v1480_v15 = vsel %vm228_vm2, %v632_v9, -inf }
  0xbd   : > { %v685_v27 = vcombine.high %v6206_v51, %v6206_v51  ;;  %v1474_v31 = vrot.slane %v1473_v23, 4  ;;  %v1481_v37 = vrot.slane %v1480_v15, 4  ;;  %v1487_v26 = vsel %vm228_vm2, %v634_v48, -inf }
  0xbe   : > { %v1468_v61 = vmax.f32 %v1466_v3, %v1467_v43  ;;  %v1488_v35 = vrot.slane %v1487_v26, 4  ;;  %v1494_v62 = vsel %vm228_vm2, %v642_v46, -inf  ;;  %v1501_v16 = vsel %vm228_vm2, %v650_v14, -inf }
  0xbf   : > { %v1475_v28 = vmax.f32 %v1473_v23, %v1474_v31  ;;  %v1482_v32 = vmax.f32 %v1480_v15, %v1481_v37  ;;  %v1495_v5 = vrot.slane %v1494_v62, 4  ;;  %v1502_v25 = vrot.slane %v1501_v16, 4 }
  0xc0   : > { %v1469_v53 = vrot.slane %v1468_v61, 2  ;;  %v1489_v36 = vmax.f32 %v1487_v26, %v1488_v35  ;;  %v1508_v40 = vsel %vm228_vm2, %v649_v8, -inf  ;;  %v1515_v13 = vsel %vm228_vm2, %v651_v17, -inf }
  0xc1   : > { %v1476_v1 = vrot.slane %v1475_v28, 2  ;;  %v1483_v10 = vrot.slane %v1482_v32, 2  ;;  %v1496_v42 = vmax.f32 %v1494_v62, %v1495_v5  ;;  %v1503_v24 = vmax.f32 %v1501_v16, %v1502_v25 }
  0xc2   : > { %v1470_v52 = vmax.f32 %v1468_v61, %v1469_v53  ;;  %v1490_v44 = vrot.slane %v1489_v36, 2  ;;  %v1509_v54 = vrot.slane %v1508_v40, 4  ;;  %v1516_v2 = vrot.slane %v1515_v13, 4 }
  0xc3   : > { %v2263_v18 = vld [vmem:[#allocation2 + $0x41] sm:$0xff]  ;;  %v1477_v20 = vmax.f32 %v1475_v28, %v1476_v1  ;;  %v1484_v38 = vmax.f32 %v1482_v32, %v1483_v10  ;;  %v1497_v59 = vrot.slane %v1496_v42, 2  ;;  %v1504_v63 = vrot.slane %v1503_v24, 2  ;;  %v2988_v1 = vld [vmem:[%s7099_s1 + $0x14] sm:$0xf] }
  0xc4   : > { %v2254_v57 = vld [vmem:[#allocation2 + $0x40] sm:$0xff]  ;;  %5332 = vmatprep.mubr.msk.f32.mxu0 %vm226_vm1, %v2263_v18  ;;  %v1471_v39 = vrot.slane %v1470_v52, 1  ;;  %v1491_v45 = vmax.f32 %v1489_v36, %v1490_v44  ;;  %v1510_v29 = vmax.f32 %v1508_v40, %v1509_v54  ;;  %v1517_v6 = vmax.f32 %v1515_v13, %v1516_v2  ;;  %5394 = vmatprep.subr.msk.mxu1 %vm2292_vm0, %v2988_v1  ;;  %v303_v1 = vld [vmem:[%s5742_s30 + $0xa8] sm:$0xff] }
  0xc5   : > { %5346 = vmatprep.mubr.msk.f32.mxu1 %vm226_vm1, %v2254_v57  ;;  %v1478_v46 = vrot.slane %v1477_v20, 1  ;;  %v1485_v55 = vrot.slane %v1484_v38, 1  ;;  %v1498_v60 = vmax.f32 %v1496_v42, %v1497_v59  ;;  %v1505_v19 = vmax.f32 %v1503_v24, %v1504_v63 }
  0xc6   : > { %v6232_v9 = vmax.f32 %v1470_v52, %v1471_v39  ;;  %v1492_v41 = vrot.slane %v1491_v45, 1  ;;  %v1511_v7 = vrot.slane %v1510_v29, 2  ;;  %v1518_v8 = vrot.slane %v1517_v6, 2 }
  0xc7   : > { %v6234_v14 = vmax.f32 %v1477_v20, %v1478_v46  ;;  %v6236_v30 = vmax.f32 %v1484_v38, %v1485_v55  ;;  %v1499_v48 = vrot.slane %v1498_v60, 1  ;;  %v1506_v0 = vrot.slane %v1505_v19, 1 }
  0xc8   : > { %v6238_v11 = vmax.f32 %v1491_v45, %v1492_v41  ;;  %v1512_v17 = vmax.f32 %v1510_v29, %v1511_v7  ;;  %v1519_v50 = vmax.f32 %v1517_v6, %v1518_v8  ;;  %v1522_v3 = vsel %vm228_vm2, %v6190_v47, -inf }
  0xc9   : > { %v6242_v43 = vmax.f32 %v1498_v60, %v1499_v48  ;;  %v6244_v23 = vmax.f32 %v1505_v19, %v1506_v0  ;;  %v1523_v15 = vrot.slane %v1522_v3, 4  ;;  %v1529_v31 = vsel %vm228_vm2, %v667_v21, -inf }
  0xca   : > { %v1513_v37 = vrot.slane %v1512_v17, 1  ;;  %v1520_v26 = vrot.slane %v1519_v50, 1  ;;  %v1530_v61 = vrot.slane %v1529_v31, 4  ;;  %v1536_v35 = vsel %vm228_vm2, %v6194_v49, -inf }
  0xcb   : > { %v1524_v62 = vmax.f32 %v1522_v3, %v1523_v15  ;;  %v1537_v16 = vrot.slane %v1536_v35, 4  ;;  %v1543_v22 = vsel %vm228_vm2, %v668_v58, -inf  ;;  %v1550_v28 = vsel %vm228_vm2, %v6200_v34, -inf }
  0xcc   : > { %v6258_v32 = vmax.f32 %v1512_v17, %v1513_v37  ;;  %v6260_v47 = vmax.f32 %v1519_v50, %v1520_v26  ;;  %v1531_v21 = vmax.f32 %v1529_v31, %v1530_v61  ;;  %v1544_v5 = vrot.slane %v1543_v22, 4 }
  0xcd   : > { %v1525_v25 = vrot.slane %v1524_v62, 2  ;;  %v1538_v56 = vmax.f32 %v1536_v35, %v1537_v16  ;;  %v1551_v53 = vrot.slane %v1550_v28, 4  ;;  %v1557_v36 = vsel %vm228_vm2, %v684_v33, -inf }
  0xce   : > { %v1532_v49 = vrot.slane %v1531_v21, 2  ;;  %v1545_v40 = vmax.f32 %v1543_v22, %v1544_v5  ;;  %v1558_v58 = vrot.slane %v1557_v36, 4  ;;  %v1564_v13 = vsel %vm228_vm2, %v6206_v51, -inf }
  0xcf   : > { %v1526_v10 = vmax.f32 %v1524_v62, %v1525_v25  ;;  %v1539_v42 = vrot.slane %v1538_v56, 2  ;;  %v1552_v24 = vmax.f32 %v1550_v28, %v1551_v53  ;;  %v1565_v52 = vrot.slane %v1564_v13, 4 }
  0xd0   : > { %v1533_v44 = vmax.f32 %v1531_v21, %v1532_v49  ;;  %v1546_v34 = vrot.slane %v1545_v40, 2  ;;  %v1559_v54 = vmax.f32 %v1557_v36, %v1558_v58  ;;  %v1571_v33 = vsel %vm228_vm2, %v685_v27, -inf }
  0xd1   : > { %v1527_v2 = vrot.slane %v1526_v10, 1  ;;  %v1540_v18 = vmax.f32 %v1538_v56, %v1539_v42  ;;  %v1553_v57 = vrot.slane %v1552_v24, 2  ;;  %v1566_v20 = vmax.f32 %v1564_v13, %v1565_v52  ;;  %v302_v56 = vld [vmem:[%s5742_s30 + $0xa0] sm:$0xff] }
  0xd2   : > { %v1534_v38 = vrot.slane %v1533_v44, 1  ;;  %v1547_v59 = vmax.f32 %v1545_v40, %v1546_v34  ;;  %v1560_v63 = vrot.slane %v1559_v54, 2  ;;  %v1572_v39 = vrot.slane %v1571_v33, 4 }
  0xd3   : > { %v1528_v45 = vmax.f32 %v1526_v10, %v1527_v2  ;;  %v1541_v29 = vrot.slane %v1540_v18, 1  ;;  %v1554_v6 = vmax.f32 %v1552_v24, %v1553_v57  ;;  %v1567_v46 = vrot.slane %v1566_v20, 2  ;;  %v304_v24 = vld [vmem:[%s5742_s30 + $0xb0] sm:$0xff]  ;;  %v305_v2 = vld [vmem:[%s5742_s30 + $0xb8] sm:$0xff] }
  0xd4   : > { %v1535_v55 = vmax.f32 %v1533_v44, %v1534_v38  ;;  %v1548_v60 = vrot.slane %v1547_v59, 1  ;;  %v1561_v19 = vmax.f32 %v1559_v54, %v1560_v63  ;;  %v1573_v41 = vmax.f32 %v1571_v33, %v1572_v39 }
  0xd5   : > { %v1542_v7 = vmax.f32 %v1540_v18, %v1541_v29  ;;  %v1555_v51 = vrot.slane %v1554_v6, 1  ;;  %v1568_v8 = vmax.f32 %v1566_v20, %v1567_v46  ;;  %v2010_v27 = vsel %vm226_vm1, %v6232_v9, -inf }
  0xd6   : > { %v1549_v48 = vmax.f32 %v1547_v59, %v1548_v60  ;;  %v1562_v0 = vrot.slane %v1561_v19, 1  ;;  %v1574_v17 = vrot.slane %v1573_v41, 2  ;;  %v2011_v50 = vsel %vm226_vm1, %v1528_v45, -inf }
  0xd7   : > { %v1556_v3 = vmax.f32 %v1554_v6, %v1555_v51  ;;  %v1569_v15 = vrot.slane %v1568_v8, 1  ;;  %v2012_v31 = vmax.f32 %v2010_v27, %v2011_v50  ;;  %v2013_v37 = vsel %vm226_vm1, %v6234_v14, -inf }
  0xd8   : > { %v1563_v26 = vmax.f32 %v1561_v19, %v1562_v0  ;;  %v1575_v61 = vmax.f32 %v1573_v41, %v1574_v17  ;;  %v2014_v35 = vsel %vm226_vm1, %v1535_v55, -inf  ;;  %v2016_v62 = vsel %vm226_vm1, %v6236_v30, -inf }
  0xd9   : > { %v1570_v9 = vmax.f32 %v1568_v8, %v1569_v15  ;;  %v2015_v16 = vmax.f32 %v2013_v37, %v2014_v35  ;;  %v2017_v22 = vsel %vm226_vm1, %v1542_v7, -inf  ;;  %v2019_v28 = vsel %vm226_vm1, %v6238_v11, -inf }
  0xda   : > { %v1576_v21 = vrot.slane %v1575_v61, 1  ;;  %v2018_v5 = vmax.f32 %v2016_v62, %v2017_v22  ;;  %v2020_v14 = vsel %vm226_vm1, %v1549_v48, -inf  ;;  %v2022_v25 = vsel %vm226_vm1, %v6242_v43, -inf }
  0xdb   : > { %v2021_v53 = vmax.f32 %v2019_v28, %v2020_v14  ;;  %v2023_v30 = vsel %vm226_vm1, %v1556_v3, -inf  ;;  %v2025_v36 = vsel %vm226_vm1, %v6244_v23, -inf  ;;  %v2026_v49 = vsel %vm226_vm1, %v1563_v26, -inf }
  0xdc   : > { %v1577_v40 = vmax.f32 %v1575_v61, %v1576_v21  ;;  %v2024_v11 = vmax.f32 %v2022_v25, %v2023_v30  ;;  %v2027_v58 = vmax.f32 %v2025_v36, %v2026_v49  ;;  %v2028_v13 = vsel %vm226_vm1, %v6258_v32, -inf }
  0xdd   : > { %v2029_v10 = vsel %vm226_vm1, %v1570_v9, -inf  ;;  %v2031_v43 = vsel %vm226_vm1, %v6260_v47, -inf  ;;  %v2205_v42 = vsel %vm2170_vm4, %v2015_v16, %v2012_v31  ;;  %v686_v52 = vcombine.high %v302_v56, %v302_v56 }
  0xde   : > { %v2030_v23 = vmax.f32 %v2028_v13, %v2029_v10  ;;  %v2032_v44 = vsel %vm226_vm1, %v1577_v40, -inf  ;;  %v2206_v34 = vsel %vm2172_vm5, %v2018_v5, %v2205_v42  ;;  %v693_v54 = vrot.slane %v302_v56, %v5747_v12 }
  0xdf   : > { %v2033_v33 = vmax.f32 %v2031_v43, %v2032_v44  ;;  %v2207_v32 = vsel %vm2174_vm6, %v2021_v53, %v2206_v34  ;;  %v700_v18 = vrot.slane %v686_v52, %v5747_v12  ;;  %v703_v57 = vcombine.high %v303_v1, %v303_v1 }
  0xe0   : > { %v2208_v47 = vsel %vm2176_vm7, %v2024_v11, %v2207_v32  ;;  %v701_v20 = vcombine.high %v693_v54, %v693_v54  ;;  %v710_v38 = vrot.slane %v303_v1, %v5747_v12  ;;  %v720_v59 = vcombine.high %v304_v24, %v304_v24 }
  0xe1   : > { %v2209_v63 = vsel %vm2178_vm8, %v2027_v58, %v2208_v47  ;;  %v702_v39 = vcombine.high %v700_v18, %v700_v18  ;;  %v717_v45 = vrot.slane %v703_v57, %v5747_v12  ;;  %v6314_v29 = vrot.slane %v304_v24, %v5747_v12 }
  0xe2   : > { %v2210_v6 = vsel %vm2180_vm9, %v2030_v23, %v2209_v63  ;;  %v718_v46 = vcombine.high %v710_v38, %v710_v38  ;;  %v6318_v55 = vrot.slane %v720_v59, %v5747_v12  ;;  %v737_v60 = vcombine.high %v305_v2, %v305_v2 }
  0xe3   : > { %v2211_v19 = vsel %vm2182_vm10, %v2033_v33, %v2210_v6  ;;  %v719_v41 = vcombine.high %v717_v45, %v717_v45  ;;  %v735_v7 = vcombine.high %v6314_v29, %v6314_v29  ;;  %v6324_v51 = vrot.slane %v305_v2, %v5747_v12 }
  0xe4   : > { %2246 = vst.msk [vmem:[#allocation2 + $0x51] sm:$0xff] %vm226_vm1, %v2211_v19  ;;  %v736_v8 = vcombine.high %v6318_v55, %v6318_v55  ;;  %v6330_v27 = vrot.slane %v737_v60, %v5747_v12  ;;  %v1578_v48 = vsel %vm228_vm2, %v693_v54, -inf  ;;  %v1585_v0 = vsel %vm228_vm2, %v701_v20, -inf }
  0xe5   : > { %v752_v17 = vcombine.high %v6324_v51, %v6324_v51  ;;  %v1579_v50 = vrot.slane %v1578_v48, 4  ;;  %v1586_v3 = vrot.slane %v1585_v0, 4  ;;  %v1592_v15 = vsel %vm228_vm2, %v700_v18, -inf }
  0xe6   : > { %v753_v31 = vcombine.high %v6330_v27, %v6330_v27  ;;  %v1593_v37 = vrot.slane %v1592_v15, 4  ;;  %v1599_v26 = vsel %vm228_vm2, %v702_v39, -inf  ;;  %v1606_v61 = vsel %vm228_vm2, %v710_v38, -inf }
  0xe7   : > { %v1580_v35 = vmax.f32 %v1578_v48, %v1579_v50  ;;  %v1587_v62 = vmax.f32 %v1585_v0, %v1586_v3  ;;  %v1600_v9 = vrot.slane %v1599_v26, 4  ;;  %v1607_v16 = vrot.slane %v1606_v61, 4 }
  0xe8   : > { %v1594_v22 = vmax.f32 %v1592_v15, %v1593_v37  ;;  %v1613_v28 = vsel %vm228_vm2, %v718_v46, -inf  ;;  %v1620_v21 = vsel %vm228_vm2, %v717_v45, -inf  ;;  %v1627_v5 = vsel %vm228_vm2, %v719_v41, -inf }
  0xe9   : > { %v1581_v14 = vrot.slane %v1580_v35, 2  ;;  %v1588_v25 = vrot.slane %v1587_v62, 2  ;;  %v1601_v56 = vmax.f32 %v1599_v26, %v1600_v9  ;;  %v1608_v53 = vmax.f32 %v1606_v61, %v1607_v16 }
  0xea   : > { %v1595_v30 = vrot.slane %v1594_v22, 2  ;;  %v1614_v36 = vrot.slane %v1613_v28, 4  ;;  %v1621_v49 = vrot.slane %v1620_v21, 4  ;;  %v1628_v40 = vrot.slane %v1627_v5, 4 }
  0xeb   : > { %v2264_v11 = vld [vmem:[#allocation2 + $0x51] sm:$0xff]  ;;  %v1582_v13 = vmax.f32 %v1580_v35, %v1581_v14  ;;  %v1589_v1 = vmax.f32 %v1587_v62, %v1588_v25  ;;  %v1602_v10 = vrot.slane %v1601_v56, 2  ;;  %v1609_v43 = vrot.slane %v1608_v53, 2 }
  0xec   : > { %v6344_v58 = vld [vmem:[#allocation2 + $0x50] sm:$0xff]  ;;  %5333 = vmatmul.mubr.msk.f32.gmra.mxu0 %vm226_vm1, %v2264_v11  ;;  %v1596_v42 = vmax.f32 %v1594_v22, %v1595_v30  ;;  %v1615_v24 = vmax.f32 %v1613_v28, %v1614_v36  ;;  %v1622_v52 = vmax.f32 %v1620_v21, %v1621_v49  ;;  %v1634_v23 = vsel %vm228_vm2, %v6314_v29, -inf }
  0xed   : > { %5347 = vmatmul.mubr.msk.f32.gmra.mxu1 %vm226_vm1, %v6344_v58  ;;  %v1583_v44 = vrot.slane %v1582_v13, 1  ;;  %v1590_v34 = vrot.slane %v1589_v1, 1  ;;  %v1603_v54 = vmax.f32 %v1601_v56, %v1602_v10  ;;  %v1610_v33 = vmax.f32 %v1608_v53, %v1609_v43 }
  0xee   : > { %v1597_v32 = vrot.slane %v1596_v42, 1  ;;  %v1616_v2 = vrot.slane %v1615_v24, 2  ;;  %v1623_v18 = vrot.slane %v1622_v52, 2  ;;  %v1629_v57 = vmax.f32 %v1627_v5, %v1628_v40 }
  0xef   : > { %v1584_v47 = vmax.f32 %v1582_v13, %v1583_v44  ;;  %v6351_v20 = vmax.f32 %v1589_v1, %v1590_v34  ;;  %v1604_v38 = vrot.slane %v1603_v54, 1  ;;  %v1611_v59 = vrot.slane %v1610_v33, 1 }
  0xf0   : > { %v6353_v63 = vmax.f32 %v1596_v42, %v1597_v32  ;;  %v1617_v39 = vmax.f32 %v1615_v24, %v1616_v2  ;;  %v1624_v45 = vmax.f32 %v1622_v52, %v1623_v18  ;;  %v1630_v6 = vrot.slane %v1629_v57, 2 }
  0xf1   : > { %v6355_v46 = vmax.f32 %v1603_v54, %v1604_v38  ;;  %v6357_v29 = vmax.f32 %v1610_v33, %v1611_v59  ;;  %v1635_v60 = vrot.slane %v1634_v23, 4  ;;  %v1641_v19 = vsel %vm228_vm2, %v735_v7, -inf }
  0xf2   : > { %v1618_v41 = vrot.slane %v1617_v39, 1  ;;  %v1625_v48 = vrot.slane %v1624_v45, 1  ;;  %v1631_v0 = vmax.f32 %v1629_v57, %v1630_v6  ;;  %v1642_v50 = vrot.slane %v1641_v19, 4 }
  0xf3   : > { %v1636_v3 = vmax.f32 %v1634_v23, %v1635_v60  ;;  %v1648_v15 = vsel %vm228_vm2, %v6318_v55, -inf  ;;  %v1655_v37 = vsel %vm228_vm2, %v736_v8, -inf  ;;  %v1662_v26 = vsel %vm228_vm2, %v6324_v51, -inf }
  0xf4   : > { %v6368_v61 = vmax.f32 %v1617_v39, %v1618_v41  ;;  %v6370_v35 = vmax.f32 %v1624_v45, %v1625_v48  ;;  %v1632_v7 = vrot.slane %v1631_v0, 1  ;;  %v1643_v62 = vmax.f32 %v1641_v19, %v1642_v50 }
  0xf5   : > { %v1637_v9 = vrot.slane %v1636_v3, 2  ;;  %v1649_v16 = vrot.slane %v1648_v15, 4  ;;  %v1656_v22 = vrot.slane %v1655_v37, 4  ;;  %v1663_v28 = vrot.slane %v1662_v26, 4 }
  0xf6   : > { %v6372_v21 = vmax.f32 %v1631_v0, %v1632_v7  ;;  %v1644_v5 = vrot.slane %v1643_v62, 2  ;;  %v1669_v55 = vsel %vm228_vm2, %v752_v17, -inf  ;;  %v1676_v8 = vsel %vm228_vm2, %v6330_v27, -inf }
  0xf7   : > { %v1638_v14 = vmax.f32 %v1636_v3, %v1637_v9  ;;  %v1650_v25 = vmax.f32 %v1648_v15, %v1649_v16  ;;  %v1657_v56 = vmax.f32 %v1655_v37, %v1656_v22  ;;  %v1664_v53 = vmax.f32 %v1662_v26, %v1663_v28 }
  0xf8   : > { %v1645_v30 = vmax.f32 %v1643_v62, %v1644_v5  ;;  %v1670_v36 = vrot.slane %v1669_v55, 4  ;;  %v1677_v49 = vrot.slane %v1676_v8, 4  ;;  %v1683_v40 = vsel %vm228_vm2, %v753_v31, -inf }
  0xf9   : > { %v1639_v11 = vrot.slane %v1638_v14, 1  ;;  %v1651_v13 = vrot.slane %v1650_v25, 2  ;;  %v1658_v51 = vrot.slane %v1657_v56, 2  ;;  %v1665_v1 = vrot.slane %v1664_v53, 2 }
  0xfa   : > { %v1646_v17 = vrot.slane %v1645_v30, 1  ;;  %v1671_v10 = vmax.f32 %v1669_v55, %v1670_v36  ;;  %v1678_v43 = vmax.f32 %v1676_v8, %v1677_v49  ;;  %v1684_v42 = vrot.slane %v1683_v40, 4  ;;  %v306_v8 = vld [vmem:[%s5742_s30 + $0xc0] sm:$0xff] }
  0xfb   : > { %v1640_v24 = vmax.f32 %v1638_v14, %v1639_v11  ;;  %v1652_v52 = vmax.f32 %v1650_v25, %v1651_v13  ;;  %v1659_v23 = vmax.f32 %v1657_v56, %v1658_v51  ;;  %v1666_v44 = vmax.f32 %v1664_v53, %v1665_v1  ;;  %v307_v53 = vld [vmem:[%s5742_s30 + $0xc8] sm:$0xff] }
  0xfc   : > { %v1647_v34 = vmax.f32 %v1645_v30, %v1646_v17  ;;  %v1672_v54 = vrot.slane %v1671_v10, 2  ;;  %v1679_v33 = vrot.slane %v1678_v43, 2  ;;  %v1685_v32 = vmax.f32 %v1683_v40, %v1684_v42  ;;  %v308_v30 = vld [vmem:[%s5742_s30 + $0xd0] sm:$0xff]  ;;  %v309_v17 = vld [vmem:[%s5742_s30 + $0xd8] sm:$0xff] }
  0xfd   : > { %v1653_v2 = vrot.slane %v1652_v52, 1  ;;  %v1660_v27 = vrot.slane %v1659_v23, 1  ;;  %v1667_v18 = vrot.slane %v1666_v44, 1  ;;  %v2034_v31 = vsel %vm226_vm1, %v1584_v47, -inf }
  0xfe   : > { %v1673_v57 = vmax.f32 %v1671_v10, %v1672_v54  ;;  %v1680_v38 = vmax.f32 %v1678_v43, %v1679_v33  ;;  %v1686_v59 = vrot.slane %v1685_v32, 2  ;;  %v2035_v39 = vsel %vm226_vm1, %v1640_v24, -inf }
  0xff   : > { %v1654_v45 = vmax.f32 %v1652_v52, %v1653_v2  ;;  %v1661_v6 = vmax.f32 %v1659_v23, %v1660_v27  ;;  %v1668_v60 = vmax.f32 %v1666_v44, %v1667_v18  ;;  %v2036_v19 = vmax.f32 %v2034_v31, %v2035_v39 }
 0x100   : > { %v1674_v41 = vrot.slane %v1673_v57, 1  ;;  %v1681_v48 = vrot.slane %v1680_v38, 1  ;;  %v1687_v0 = vmax.f32 %v1685_v32, %v1686_v59  ;;  %v2037_v50 = vsel %vm226_vm1, %v6351_v20, -inf }
 0x101   : > { %v2038_v3 = vsel %vm226_vm1, %v1647_v34, -inf  ;;  %v2040_v47 = vsel %vm226_vm1, %v6353_v63, -inf  ;;  %v2041_v15 = vsel %vm226_vm1, %v1654_v45, -inf  ;;  %v2043_v37 = vsel %vm226_vm1, %v6355_v46, -inf }
 0x102   : > { %v1675_v26 = vmax.f32 %v1673_v57, %v1674_v41  ;;  %v1682_v7 = vmax.f32 %v1680_v38, %v1681_v48  ;;  %v1688_v62 = vrot.slane %v1687_v0, 1  ;;  %v2039_v9 = vmax.f32 %v2037_v50, %v2038_v3 }
 0x103   : > { %v2042_v16 = vmax.f32 %v2040_v47, %v2041_v15  ;;  %v2044_v20 = vsel %vm226_vm1, %v1661_v6, -inf  ;;  %v2046_v22 = vsel %vm226_vm1, %v6357_v29, -inf  ;;  %v2047_v28 = vsel %vm226_vm1, %v1668_v60, -inf }
 0x104   : > { %v1689_v63 = vmax.f32 %v1687_v0, %v1688_v62  ;;  %v2045_v5 = vmax.f32 %v2043_v37, %v2044_v20  ;;  %v2048_v55 = vmax.f32 %v2046_v22, %v2047_v28  ;;  %v2049_v46 = vsel %vm226_vm1, %v6368_v61, -inf }
 0x105   : > { %v2050_v14 = vsel %vm226_vm1, %v1675_v26, -inf  ;;  %v2052_v25 = vsel %vm226_vm1, %v6370_v35, -inf  ;;  %v2053_v56 = vsel %vm226_vm1, %v1682_v7, -inf  ;;  %v2055_v29 = vsel %vm226_vm1, %v6372_v21, -inf }
 0x106   : > { %v2051_v36 = vmax.f32 %v2049_v46, %v2050_v14  ;;  %v2054_v49 = vmax.f32 %v2052_v25, %v2053_v56  ;;  %v2056_v40 = vsel %vm226_vm1, %v1689_v63, -inf  ;;  %v2212_v61 = vsel %vm2170_vm4, %v2039_v9, %v2036_v19 }
 0x107   : > { %v2057_v11 = vmax.f32 %v2055_v29, %v2056_v40  ;;  %v2213_v13 = vsel %vm2172_vm5, %v2042_v16, %v2212_v61  ;;  %v754_v51 = vcombine.high %v306_v8, %v306_v8  ;;  %v761_v1 = vrot.slane %v306_v8, %v5747_v12 }
 0x108   : > { %v2214_v35 = vsel %vm2174_vm6, %v2045_v5, %v2213_v13  ;;  %v771_v10 = vcombine.high %v307_v53, %v307_v53  ;;  %v778_v21 = vrot.slane %v307_v53, %v5747_v12  ;;  %v788_v43 = vcombine.high %v308_v30, %v308_v30 }
 0x109   : > { %v2215_v42 = vsel %vm2176_vm7, %v2048_v55, %v2214_v35  ;;  %v768_v24 = vrot.slane %v754_v51, %v5747_v12  ;;  %v769_v52 = vcombine.high %v761_v1, %v761_v1  ;;  %v6419_v23 = vrot.slane %v308_v30, %v5747_v12 }
 0x10a   : > { %v2216_v44 = vsel %vm2178_vm8, %v2051_v36, %v2215_v42  ;;  %v785_v34 = vrot.slane %v771_v10, %v5747_v12  ;;  %v786_v54 = vcombine.high %v778_v21, %v778_v21  ;;  %v6424_v33 = vrot.slane %v788_v43, %v5747_v12  ;;  %v5328_v4 = vpop.f32.mrf.mxu0 }
 0x10b   : > { %v2217_v32 = vsel %vm2180_vm9, %v2054_v49, %v2216_v44  ;;  %v770_v2 = vcombine.high %v768_v24, %v768_v24  ;;  %v803_v27 = vcombine.high %v6419_v23, %v6419_v23  ;;  %v805_v18 = vcombine.high %v309_v17, %v309_v17 }
 0x10c   : > { %v2218_v31 = vsel %vm2182_vm10, %v2057_v11, %v2217_v32  ;;  %v787_v57 = vcombine.high %v785_v34, %v785_v34  ;;  %v804_v38 = vcombine.high %v6424_v33, %v6424_v33  ;;  %v6433_v59 = vrot.slane %v309_v17, %v5747_v12 }
 0x10d   : > { %2247 = vst.msk [vmem:[#allocation2 + $0x61] sm:$0xff] %vm226_vm1, %v2218_v31  ;;  %v6437_v39 = vrot.slane %v805_v18, %v5747_v12  ;;  %v1690_v45 = vsel %vm228_vm2, %v761_v1, -inf  ;;  %v1697_v6 = vsel %vm228_vm2, %v769_v52, -inf  ;;  %v1704_v60 = vsel %vm228_vm2, %v768_v24, -inf }
 0x10e   : > { %v820_v19 = vcombine.high %v6433_v59, %v6433_v59  ;;  %v1691_v41 = vrot.slane %v1690_v45, 4  ;;  %v1698_v48 = vrot.slane %v1697_v6, 4  ;;  %v1705_v0 = vrot.slane %v1704_v60, 4 }
 0x10f   : > { %v821_v50 = vcombine.high %v6437_v39, %v6437_v39  ;;  %v1711_v3 = vsel %vm228_vm2, %v770_v2, -inf  ;;  %v1718_v47 = vsel %vm228_vm2, %v778_v21, -inf  ;;  %v1725_v15 = vsel %vm228_vm2, %v786_v54, -inf }
 0x110   : > { %v1692_v37 = vmax.f32 %v1690_v45, %v1691_v41  ;;  %v1699_v26 = vmax.f32 %v1697_v6, %v1698_v48  ;;  %v1706_v7 = vmax.f32 %v1704_v60, %v1705_v0  ;;  %v1712_v62 = vrot.slane %v1711_v3, 4 }
 0x111   : > { %v1719_v9 = vrot.slane %v1718_v47, 4  ;;  %v1726_v16 = vrot.slane %v1725_v15, 4  ;;  %v1732_v20 = vsel %vm228_vm2, %v785_v34, -inf  ;;  %v1739_v22 = vsel %vm228_vm2, %v787_v57, -inf }
 0x112   : > { %v1693_v28 = vrot.slane %v1692_v37, 2  ;;  %v1700_v63 = vrot.slane %v1699_v26, 2  ;;  %v1707_v5 = vrot.slane %v1706_v7, 2  ;;  %v1713_v55 = vmax.f32 %v1711_v3, %v1712_v62 }
 0x113   : > { %v1720_v46 = vmax.f32 %v1718_v47, %v1719_v9  ;;  %v1727_v8 = vmax.f32 %v1725_v15, %v1726_v16  ;;  %v1733_v14 = vrot.slane %v1732_v20, 4  ;;  %v1740_v25 = vrot.slane %v1739_v22, 4 }
 0x114   : > { %v6451_v56 = vld [vmem:[#allocation2 + $0x61] sm:$0xff]  ;;  %v1694_v53 = vmax.f32 %v1692_v37, %v1693_v28  ;;  %v1701_v30 = vmax.f32 %v1699_v26, %v1700_v63  ;;  %v1708_v36 = vmax.f32 %v1706_v7, %v1707_v5  ;;  %v1714_v49 = vrot.slane %v1713_v55, 2 }
 0x115   : > { %v6453_v29 = vld [vmem:[#allocation2 + $0x60] sm:$0xff]  ;;  %5335 = vmatprep.mubr.msk.f32.mxu0 %vm226_vm1, %v6451_v56  ;;  %v1721_v40 = vrot.slane %v1720_v46, 2  ;;  %v1728_v61 = vrot.slane %v1727_v8, 2  ;;  %v1734_v11 = vmax.f32 %v1732_v20, %v1733_v14  ;;  %v1741_v13 = vmax.f32 %v1739_v22, %v1740_v25 }
 0x116   : > { %5349 = vmatprep.mubr.msk.f32.mxu1 %vm226_vm1, %v6453_v29  ;;  %v1695_v51 = vrot.slane %v1694_v53, 1  ;;  %v1702_v1 = vrot.slane %v1701_v30, 1  ;;  %v1709_v35 = vrot.slane %v1708_v36, 1  ;;  %v1715_v17 = vmax.f32 %v1713_v55, %v1714_v49 }
 0x117   : > { %v1722_v10 = vmax.f32 %v1720_v46, %v1721_v40  ;;  %v1729_v21 = vmax.f32 %v1727_v8, %v1728_v61  ;;  %v1735_v43 = vrot.slane %v1734_v11, 2  ;;  %v1742_v42 = vrot.slane %v1741_v13, 2 }
 0x118   : > { %v6459_v24 = vmax.f32 %v1694_v53, %v1695_v51  ;;  %v6461_v52 = vmax.f32 %v1701_v30, %v1702_v1  ;;  %v6463_v44 = vmax.f32 %v1708_v36, %v1709_v35  ;;  %v1716_v34 = vrot.slane %v1715_v17, 1 }
 0x119   : > { %v1723_v54 = vrot.slane %v1722_v10, 1  ;;  %v1730_v32 = vrot.slane %v1729_v21, 1  ;;  %v1736_v2 = vmax.f32 %v1734_v11, %v1735_v43  ;;  %v1743_v18 = vmax.f32 %v1741_v13, %v1742_v42 }
 0x11a   : > { %v6465_v31 = vmax.f32 %v1715_v17, %v1716_v34  ;;  %v1746_v57 = vsel %vm228_vm2, %v6419_v23, -inf  ;;  %v1753_v45 = vsel %vm228_vm2, %v803_v27, -inf  ;;  %v1760_v6 = vsel %vm228_vm2, %v6424_v33, -inf }
 0x11b   : > { %v6475_v60 = vmax.f32 %v1722_v10, %v1723_v54  ;;  %v6477_v41 = vmax.f32 %v1729_v21, %v1730_v32  ;;  %v1737_v48 = vrot.slane %v1736_v2, 1  ;;  %v1744_v0 = vrot.slane %v1743_v18, 1 }
 0x11c   : > { %v1747_v3 = vrot.slane %v1746_v57, 4  ;;  %v1754_v47 = vrot.slane %v1753_v45, 4  ;;  %v1761_v15 = vrot.slane %v1760_v6, 4  ;;  %v1767_v37 = vsel %vm228_vm2, %v804_v38, -inf }
 0x11d   : > { %v6483_v23 = vmax.f32 %v1736_v2, %v1737_v48  ;;  %v6485_v27 = vmax.f32 %v1743_v18, %v1744_v0  ;;  %v1768_v26 = vrot.slane %v1767_v37, 4  ;;  %v1774_v7 = vsel %vm228_vm2, %v6433_v59, -inf }
 0x11e   : > { %v1748_v62 = vmax.f32 %v1746_v57, %v1747_v3  ;;  %v1755_v9 = vmax.f32 %v1753_v45, %v1754_v47  ;;  %v1762_v16 = vmax.f32 %v1760_v6, %v1761_v15  ;;  %v1775_v20 = vrot.slane %v1774_v7, 4 }
 0x11f   : > { %v1769_v22 = vmax.f32 %v1767_v37, %v1768_v26  ;;  %v1781_v33 = vsel %vm228_vm2, %v820_v19, -inf  ;;  %v1788_v38 = vsel %vm228_vm2, %v6437_v39, -inf  ;;  %v1795_v28 = vsel %vm228_vm2, %v821_v50, -inf }
 0x120   : > { %v1749_v63 = vrot.slane %v1748_v62, 2  ;;  %v1756_v5 = vrot.slane %v1755_v9, 2  ;;  %v1763_v55 = vrot.slane %v1762_v16, 2  ;;  %v1776_v46 = vmax.f32 %v1774_v7, %v1775_v20 }
 0x121   : > { %v1770_v8 = vrot.slane %v1769_v22, 2  ;;  %v1782_v14 = vrot.slane %v1781_v33, 4  ;;  %v1789_v25 = vrot.slane %v1788_v38, 4  ;;  %v1796_v53 = vrot.slane %v1795_v28, 4 }
 0x122   : > { %v1750_v30 = vmax.f32 %v1748_v62, %v1749_v63  ;;  %v1757_v59 = vmax.f32 %v1755_v9, %v1756_v5  ;;  %v1764_v36 = vmax.f32 %v1762_v16, %v1763_v55  ;;  %v1777_v19 = vrot.slane %v1776_v46, 2  ;;  %v311_v55 = vld [vmem:[%s5742_s30 + $0xe8] sm:$0xff] }
 0x123   : > { %v1771_v49 = vmax.f32 %v1769_v22, %v1770_v8  ;;  %v1783_v40 = vmax.f32 %v1781_v33, %v1782_v14  ;;  %v1790_v61 = vmax.f32 %v1788_v38, %v1789_v25  ;;  %v1797_v11 = vmax.f32 %v1795_v28, %v1796_v53  ;;  %v312_v25 = vld [vmem:[%s5742_s30 + $0xf0] sm:$0xff] }
 0x124   : > { %v1751_v13 = vrot.slane %v1750_v30, 1  ;;  %v1758_v39 = vrot.slane %v1757_v59, 1  ;;  %v1765_v51 = vrot.slane %v1764_v36, 1  ;;  %v1778_v50 = vmax.f32 %v1776_v46, %v1777_v19 }
 0x125   : > { %v1772_v1 = vrot.slane %v1771_v49, 1  ;;  %v1784_v35 = vrot.slane %v1783_v40, 2  ;;  %v1791_v17 = vrot.slane %v1790_v61, 2  ;;  %v1798_v10 = vrot.slane %v1797_v11, 2 }
 0x126   : > { %v1752_v21 = vmax.f32 %v1750_v30, %v1751_v13  ;;  %v1759_v43 = vmax.f32 %v1757_v59, %v1758_v39  ;;  %v1766_v42 = vmax.f32 %v1764_v36, %v1765_v51  ;;  %v1779_v34 = vrot.slane %v1778_v50, 1 }
 0x127   : > { %v1773_v54 = vmax.f32 %v1771_v49, %v1772_v1  ;;  %v1785_v32 = vmax.f32 %v1783_v40, %v1784_v35  ;;  %v1792_v2 = vmax.f32 %v1790_v61, %v1791_v17  ;;  %v1799_v18 = vmax.f32 %v1797_v11, %v1798_v10  ;;  %v313_v61 = vld [vmem:[%s5742_s30 + $0xf8] sm:$0xff] }
 0x128   : > { %v1780_v57 = vmax.f32 %v1778_v50, %v1779_v34  ;;  %v2058_v45 = vsel %vm226_vm1, %v6459_v24, -inf  ;;  %v2059_v6 = vsel %vm226_vm1, %v1752_v21, -inf  ;;  %v2061_v48 = vsel %vm226_vm1, %v6461_v52, -inf }
 0x129   : > { %v1786_v0 = vrot.slane %v1785_v32, 1  ;;  %v1793_v3 = vrot.slane %v1792_v2, 1  ;;  %v1800_v47 = vrot.slane %v1799_v18, 1  ;;  %v2060_v15 = vmax.f32 %v2058_v45, %v2059_v6 }
 0x12a   : > { %v2062_v37 = vsel %vm226_vm1, %v1759_v43, -inf  ;;  %v2064_v26 = vsel %vm226_vm1, %v6463_v44, -inf  ;;  %v2065_v7 = vsel %vm226_vm1, %v1766_v42, -inf  ;;  %v2067_v24 = vsel %vm226_vm1, %v6465_v31, -inf  ;;  %v310_v44 = vld [vmem:[%s5742_s30 + $0xe0] sm:$0xff] }
 0x12b   : > { %v1787_v62 = vmax.f32 %v1785_v32, %v1786_v0  ;;  %v1794_v9 = vmax.f32 %v1792_v2, %v1793_v3  ;;  %v1801_v16 = vmax.f32 %v1799_v18, %v1800_v47  ;;  %v2063_v52 = vmax.f32 %v2061_v48, %v2062_v37 }
 0x12c   : > { %v2066_v20 = vmax.f32 %v2064_v26, %v2065_v7  ;;  %v2068_v22 = vsel %vm226_vm1, %v1773_v54, -inf  ;;  %v2070_v33 = vsel %vm226_vm1, %v6475_v60, -inf  ;;  %v2071_v38 = vsel %vm226_vm1, %v1780_v57, -inf }
 0x12d   : > { %v2069_v28 = vmax.f32 %v2067_v24, %v2068_v22  ;;  %v2072_v63 = vmax.f32 %v2070_v33, %v2071_v38  ;;  %v2073_v5 = vsel %vm226_vm1, %v6477_v41, -inf  ;;  %v2074_v31 = vsel %vm226_vm1, %v1787_v62, -inf }
 0x12e   : > { %v2075_v46 = vmax.f32 %v2073_v5, %v2074_v31  ;;  %v2076_v8 = vsel %vm226_vm1, %v6483_v23, -inf  ;;  %v2077_v14 = vsel %vm226_vm1, %v1794_v9, -inf  ;;  %v2079_v60 = vsel %vm226_vm1, %v6485_v27, -inf  ;;  %v2533_v5 = vld [vmem:[#allocation2 + $0x2] sm:$0xff]  ;;  %v2682_v31 = vld [vmem:[#allocation2 + $0x10] sm:$0xff] }
 0x12f   : > { %v2078_v53 = vmax.f32 %v2076_v8, %v2077_v14  ;;  %v2080_v30 = vsel %vm226_vm1, %v1801_v16, -inf  ;;  %v2219_v59 = vsel %vm2170_vm4, %v2063_v52, %v2060_v15  ;;  %v822_v41 = vcombine.high %v310_v44, %v310_v44 }
 0x130   : > { %v2081_v36 = vmax.f32 %v2079_v60, %v2080_v30  ;;  %v2220_v19 = vsel %vm2172_vm5, %v2066_v20, %v2219_v59  ;;  %v829_v49 = vrot.slane %v310_v44, %v5747_v12  ;;  %v839_v40 = vcombine.high %v311_v55, %v311_v55 }
 0x131   : > { %v2221_v23 = vsel %vm2174_vm6, %v2069_v28, %v2220_v19  ;;  %v836_v11 = vrot.slane %v822_v41, %v5747_v12  ;;  %v846_v27 = vrot.slane %v311_v55, %v5747_v12  ;;  %v856_v13 = vcombine.high %v312_v25, %v312_v25 }
 0x132   : > { %v2222_v39 = vsel %vm2176_vm7, %v2072_v63, %v2221_v23  ;;  %v837_v51 = vcombine.high %v829_v49, %v829_v49  ;;  %v853_v50 = vrot.slane %v839_v40, %v5747_v12  ;;  %v6536_v1 = vrot.slane %v312_v25, %v5747_v12  ;;  %v6574_v23 = vld [vmem:[#allocation2 + $0x12] sm:$0xff] }
 0x133   : > { %v2223_v35 = vsel %vm2178_vm8, %v2075_v46, %v2222_v39  ;;  %v838_v17 = vcombine.high %v836_v11, %v836_v11  ;;  %v6540_v10 = vrot.slane %v856_v13, %v5747_v12  ;;  %v854_v43 = vcombine.high %v846_v27, %v846_v27 }
 0x134   : > { %v2224_v21 = vsel %vm2180_vm9, %v2078_v53, %v2223_v35  ;;  %v855_v42 = vcombine.high %v853_v50, %v853_v50  ;;  %v873_v34 = vcombine.high %v313_v61, %v313_v61  ;;  %v871_v32 = vcombine.high %v6536_v1, %v6536_v1 }
 0x135   : > { %v2225_v54 = vsel %vm2182_vm10, %v2081_v36, %v2224_v21  ;;  %v6547_v2 = vrot.slane %v313_v61, %v5747_v12  ;;  %v1802_v18 = vsel %vm228_vm2, %v829_v49, -inf  ;;  %v872_v57 = vcombine.high %v6540_v10, %v6540_v10  ;;  %v6577_v61 = vld [vmem:[#allocation2 + $0x20] sm:$0xff] }
 0x136   : > { %2248 = vst.msk [vmem:[#allocation2 + $0x71] sm:$0xff] %vm226_vm1, %v2225_v54  ;;  %v1803_v45 = vrot.slane %v1802_v18, 4  ;;  %v1809_v6 = vsel %vm228_vm2, %v837_v51, -inf  ;;  %v1816_v48 = vsel %vm228_vm2, %v836_v11, -inf  ;;  %v6556_v0 = vrot.slane %v873_v34, %v5747_v12  ;;  %v6579_v51 = vld [vmem:[#allocation2 + $0x22] sm:$0xff] }
 0x137   : > { %v1810_v3 = vrot.slane %v1809_v6, 4  ;;  %v1817_v47 = vrot.slane %v1816_v48, 4  ;;  %v1823_v15 = vsel %vm228_vm2, %v838_v17, -inf  ;;  %v888_v37 = vcombine.high %v6547_v2, %v6547_v2 }
 0x138   : > { %v1804_v26 = vmax.f32 %v1802_v18, %v1803_v45  ;;  %v1824_v7 = vrot.slane %v1823_v15, 4  ;;  %v1830_v24 = vsel %vm228_vm2, %v846_v27, -inf  ;;  %v1837_v52 = vsel %vm228_vm2, %v854_v43, -inf  ;;  %v6583_v43 = vld [vmem:[#allocation2 + $0x30] sm:$0xff]  ;;  %v6592_v45 = vld [vmem:[%s7099_s1 + $0x18] sm:$0xf] }
 0x139   : > { %v1811_v62 = vmax.f32 %v1809_v6, %v1810_v3  ;;  %v1818_v9 = vmax.f32 %v1816_v48, %v1817_v47  ;;  %v1831_v16 = vrot.slane %v1830_v24, 4  ;;  %v1838_v12 = vrot.slane %v1837_v52, 4 }
 0x13a   : > { %v1805_v20 = vrot.slane %v1804_v26, 2  ;;  %v1825_v22 = vmax.f32 %v1823_v15, %v1824_v7  ;;  %v1844_v33 = vsel %vm228_vm2, %v853_v50, -inf  ;;  %v1851_v14 = vsel %vm228_vm2, %v855_v42, -inf  ;;  %v6605_v15 = vld [vmem:[%s7099_s1 + $0x1c] sm:$0xf]  ;;  %v6613_v7 = vld [vmem:[#allocation2 + $0x32] sm:$0xff] }
 0x13b   : > { %v1812_v38 = vrot.slane %v1811_v62, 2  ;;  %v1819_v44 = vrot.slane %v1818_v9, 2  ;;  %v1832_v28 = vmax.f32 %v1830_v24, %v1831_v16  ;;  %v1845_v63 = vrot.slane %v1844_v33, 4  ;;  %v6615_v24 = vld [vmem:[#allocation2 + $0x40] sm:$0xff] }
 0x13c   : > { %v1806_v55 = vmax.f32 %v1804_v26, %v1805_v20  ;;  %v1826_v46 = vrot.slane %v1825_v22, 2  ;;  %v1839_v8 = vmax.f32 %v1837_v52, %v1838_v12  ;;  %v1852_v40 = vrot.slane %v1851_v14, 4  ;;  %v5618_v26 = vld [vmem:[%s7099_s1 + $0x10] sm:$0xf]  ;;  %v6625_v20 = vld [vmem:[#allocation2 + $0x42] sm:$0xff] }
 0x13d   : > { %v6565_v60 = vld [vmem:[#allocation2 + $0x71] sm:$0xff]  ;;  %v1813_v53 = vmax.f32 %v1811_v62, %v1812_v38  ;;  %v1820_v30 = vmax.f32 %v1818_v9, %v1819_v44  ;;  %v1833_v59 = vrot.slane %v1832_v28, 2  ;;  %v1846_v41 = vmax.f32 %v1844_v33, %v1845_v63 }
 0x13e   : > { %v6567_v25 = vld [vmem:[#allocation2 + $0x70] sm:$0xff]  ;;  %5336 = vmatmul.mubr.msk.f32.gmra.mxu0 %vm226_vm1, %v6565_v60  ;;  %v1807_v36 = vrot.slane %v1806_v55, 1  ;;  %v1827_v19 = vmax.f32 %v1825_v22, %v1826_v46  ;;  %v1840_v49 = vrot.slane %v1839_v8, 2  ;;  %v889_v50 = vcombine.high %v6556_v0, %v6556_v0 }
 0x13f   : > { %5350 = vmatmul.mubr.msk.f32.gmra.mxu1 %vm226_vm1, %v6567_v25  ;;  %5354 = vmatprep.mubr.msk.f32.mxu0 %vm226_vm1, %v2533_v5  ;;  %v1814_v11 = vrot.slane %v1813_v53, 1  ;;  %v1821_v27 = vrot.slane %v1820_v30, 1  ;;  %v1834_v13 = vmax.f32 %v1832_v28, %v1833_v59  ;;  %v1847_v39 = vrot.slane %v1846_v41, 2  ;;  %v5619_v44 = vld [vmem:[%s7099_s1 + $0x14] sm:$0xf] }
 0x140   : > { %5368 = vmatprep.mubr.msk.f32.mxu1 %vm226_vm1, %v2682_v31  ;;  %v1828_v35 = vrot.slane %v1827_v19, 1  ;;  %v1841_v17 = vmax.f32 %v1839_v8, %v1840_v49  ;;  %v1853_v21 = vmax.f32 %v1851_v14, %v1852_v40  ;;  %v6585_v42 = vmax.f32 %v1806_v55, %v1807_v36 }
 0x141   : > { %v6587_v34 = vmax.f32 %v1813_v53, %v1814_v11  ;;  %v1835_v54 = vrot.slane %v1834_v13, 1  ;;  %v1848_v18 = vmax.f32 %v1846_v41, %v1847_v39  ;;  %v6598_v6 = vmax.f32 %v1820_v30, %v1821_v27  ;;  %v6665_v30 = vld [vmem:[#allocation2 + $0x62] sm:$0xff]  ;;  %v6676_v39 = vld [vmem:[#allocation2 + $0x72] sm:$0xff] }
 0x142   : > { %5355 = vmatmul.mubr.msk.f32.vlgmr.msra.gmra.mxu0 %vm226_vm1, %v6574_v23  ;;  %v1842_v48 = vrot.slane %v1841_v17, 1  ;;  %v1854_v3 = vrot.slane %v1853_v21, 2  ;;  %v1858_v47 = vsel %vm228_vm2, %v6536_v1, -inf  ;;  %v6617_v62 = vmax.f32 %v1827_v19, %v1828_v35 }
 0x143   : > { %5369 = vmatmul.mubr.msk.f32.vlgmr.msra.gmra.mxu1 %vm226_vm1, %v6577_v61  ;;  %5381 = vmatpush3.msk.msra.mxu0 %vm2292_vm0, %v5618_v26  ;;  %v1849_v9 = vrot.slane %v1848_v18, 1  ;;  %v1859_v16 = vrot.slane %v1858_v47, 4  ;;  %v1865_v52 = vsel %vm228_vm2, %v871_v32, -inf  ;;  %v6627_v22 = vmax.f32 %v1834_v13, %v1835_v54  ;;  %v2831_v26 = vld [vmem:[#allocation2 + $0x11] sm:$0xff] }
 0x144   : > { %5357 = vmatprep.mubr.msk.f32.mxu0 %vm226_vm1, %v6579_v51  ;;  %5371 = vmatprep.mubr.msk.f32.mxu1 %vm226_vm1, %v6583_v43  ;;  %v6629_v12 = vmax.f32 %v1853_v21, %v1854_v3  ;;  %v1866_v33 = vrot.slane %v1865_v52, 4  ;;  %v1872_v38 = vsel %vm228_vm2, %v6540_v10, -inf  ;;  %v6637_v1 = vmax.f32 %v1841_v17, %v1842_v48 }
 0x145   : > { %5395 = vmatpush3.msk.msra.mxu1 %vm2292_vm0, %v5619_v44  ;;  %v1860_v32 = vmax.f32 %v1858_v47, %v1859_v16  ;;  %v1873_v28 = vrot.slane %v1872_v38, 4  ;;  %v1879_v63 = vsel %vm228_vm2, %v872_v57, -inf  ;;  %5408 = vmatprep.subr.msk.mxu0 %vm2292_vm0, %v6592_v45  ;;  %v6651_v5 = vmax.f32 %v1848_v18, %v1849_v9  ;;  %v6657_v57 = vld [vmem:[#allocation2 + $0x52] sm:$0xff] }
 0x146   : > { %5422 = vmatprep.subr.msk.mxu1 %vm2292_vm0, %v6605_v15  ;;  %5358 = vmatmul.mubr.msk.f32.gmra.mxu0 %vm226_vm1, %v6613_v7  ;;  %v1867_v31 = vmax.f32 %v1865_v52, %v1866_v33  ;;  %v1880_v55 = vrot.slane %v1879_v63, 4  ;;  %v1886_v10 = vsel %vm228_vm2, %v6547_v2, -inf  ;;  %v1893_v53 = vsel %vm228_vm2, %v888_v37, -inf }
 0x147   : > { %5372 = vmatmul.mubr.msk.f32.gmra.mxu1 %vm226_vm1, %v6615_v24  ;;  %5360 = vmatprep.mubr.msk.f32.mxu0 %vm226_vm1, %v6625_v20  ;;  %v1861_v46 = vrot.slane %v1860_v32, 2  ;;  %v1874_v8 = vmax.f32 %v1872_v38, %v1873_v28  ;;  %v1887_v14 = vrot.slane %v1886_v10, 4  ;;  %v1856_v59 = vrot.slane %v6629_v12, 1 }
 0x148   : > { %5374 = vmatprep.mubr.msk.f32.mxu1 %vm226_vm1, %v6344_v58  ;;  %v1868_v41 = vrot.slane %v1867_v31, 2  ;;  %v1881_v36 = vmax.f32 %v1879_v63, %v1880_v55  ;;  %v1894_v19 = vrot.slane %v1893_v53, 4  ;;  %v1900_v58 = vsel %vm228_vm2, %v6556_v0, -inf  ;;  %v6689_v55 = vld [vmem:[#allocation2 + $0x21] sm:$0xff] }
 0x149   : > { %v1862_v49 = vmax.f32 %v1860_v32, %v1861_v46  ;;  %v1875_v40 = vrot.slane %v1874_v8, 2  ;;  %v1888_v11 = vmax.f32 %v1886_v10, %v1887_v14  ;;  %v1901_v13 = vrot.slane %v1900_v58, 4 }
 0x14a   : > { %5361 = vmatmul.mubr.msk.f32.gmra.mxu0 %vm226_vm1, %v6657_v57  ;;  %v1869_v2 = vmax.f32 %v1867_v31, %v1868_v41  ;;  %v1882_v37 = vrot.slane %v1881_v36, 2  ;;  %v1895_v27 = vmax.f32 %v1893_v53, %v1894_v19  ;;  %v1907_v54 = vsel %vm228_vm2, %v889_v50, -inf  ;;  %v6692_v53 = vld [vmem:[#allocation2 + $0x31] sm:$0xff] }
 0x14b   : > { %5375 = vmatmul.mubr.msk.f32.gmra.mxu1 %vm226_vm1, %v6453_v29  ;;  %5363 = vmatprep.mubr.msk.f32.mxu0 %vm226_vm1, %v6665_v30  ;;  %v1863_v35 = vrot.slane %v1862_v49, 1  ;;  %v1876_v17 = vmax.f32 %v1874_v8, %v1875_v40  ;;  %v1889_v21 = vrot.slane %v1888_v11, 2  ;;  %v1902_v47 = vmax.f32 %v1900_v58, %v1901_v13 }
 0x14c   : > { %5377 = vmatprep.mubr.msk.f32.mxu1 %vm226_vm1, %v6567_v25  ;;  %v1870_v18 = vrot.slane %v1869_v2, 1  ;;  %v1883_v48 = vmax.f32 %v1881_v36, %v1882_v37  ;;  %v1896_v3 = vrot.slane %v1895_v27, 2  ;;  %v1908_v33 = vrot.slane %v1907_v54, 4 }
 0x14d   : > { %v1864_v9 = vmax.f32 %v1862_v49, %v1863_v35  ;;  %v1877_v16 = vrot.slane %v1876_v17, 1  ;;  %v1890_v52 = vmax.f32 %v1888_v11, %v1889_v21  ;;  %v1903_v28 = vrot.slane %v1902_v47, 2  ;;  %v2835_v21 = vld [vmem:[#allocation2 + $0x51] sm:$0xff] }
 0x14e   : > { %5364 = vmatmul.mubr.msk.f32.gmra.mxu0 %vm226_vm1, %v6676_v39  ;;  %v1871_v38 = vmax.f32 %v1869_v2, %v1870_v18  ;;  %v1884_v44 = vrot.slane %v1883_v48, 1  ;;  %v1897_v32 = vmax.f32 %v1895_v27, %v1896_v3  ;;  %v1909_v31 = vmax.f32 %v1907_v54, %v1908_v33  ;;  %v6712_v27 = vld [vmem:[#allocation2 + $0x41] sm:$0xff] }
 0x14f   : > { %v1878_v63 = vmax.f32 %v1876_v17, %v1877_v16  ;;  %v1891_v0 = vrot.slane %v1890_v52, 1  ;;  %v2082_v50 = vsel %vm226_vm1, %v6585_v42, -inf  ;;  %5382 = vmatprep.mubr.msk.f32.mxu0 %vm226_vm1, %v2831_v26  ;;  %v1904_v8 = vmax.f32 %v1902_v47, %v1903_v28  ;;  %v3436_v42 = vld [vmem:[%s7099_s1 + $0x20] sm:$0xf] }
 0x150   : > { %v1885_v10 = vmax.f32 %v1883_v48, %v1884_v44  ;;  %v1898_v46 = vrot.slane %v1897_v32, 1  ;;  %v2083_v14 = vsel %vm226_vm1, %v1864_v9, -inf  ;;  %v1857_v41 = vmax.f32 %v6629_v12, %v1856_v59 }
 0x151   : > { %v1892_v36 = vmax.f32 %v1890_v52, %v1891_v0  ;;  %v1910_v19 = vrot.slane %v1909_v31, 2  ;;  %v2085_v49 = vsel %vm226_vm1, %v6587_v34, -inf  ;;  %v1905_v11 = vrot.slane %v1904_v8, 1 }
 0x152   : > { %v1899_v40 = vmax.f32 %v1897_v32, %v1898_v46  ;;  %v2086_v58 = vsel %vm226_vm1, %v1871_v38, -inf  ;;  %v2088_v2 = vsel %vm226_vm1, %v6598_v6, -inf  ;;  %5383 = vmatmul.mubr.msk.f32.vlgmr.msra.gmra.mxu0 %vm226_vm1, %v6689_v55  ;;  %v2084_v59 = vmax.f32 %v2082_v50, %v2083_v14  ;;  %v3133_v46 = vld [vmem:[#allocation2 + $0x50] sm:$0xff] }
 0x153   : > { %v1911_v12 = vmax.f32 %v1909_v31, %v1910_v19  ;;  %v2089_v37 = vsel %vm226_vm1, %v1878_v63, -inf  ;;  %v2091_v34 = vsel %vm226_vm1, %v6617_v62, -inf  ;;  %5409 = vmatpush3.msk.msra.mxu0 %vm2292_vm0, %v6592_v45  ;;  %5385 = vmatprep.mubr.msk.f32.mxu0 %vm226_vm1, %v6692_v53  ;;  %v1906_v13 = vmax.f32 %v1904_v8, %v1905_v11 }
 0x154   : > { %v2087_v6 = vmax.f32 %v2085_v49, %v2086_v58  ;;  %v2092_v35 = vsel %vm226_vm1, %v1885_v10, -inf  ;;  %v2094_v17 = vsel %vm226_vm1, %v6627_v22, -inf  ;;  %5436 = vmatprep.subr.msk.mxu0 %vm2292_vm0, %v3436_v42  ;;  %v2090_v62 = vmax.f32 %v2088_v2, %v2089_v37 }
 0x155   : > { %v1912_v54 = vrot.slane %v1911_v12, 1  ;;  %v2095_v18 = vsel %vm226_vm1, %v1892_v36, -inf  ;;  %v2097_v45 = vsel %vm226_vm1, %v6637_v1, -inf  ;;  %v2093_v48 = vmax.f32 %v2091_v34, %v2092_v35 }
 0x156   : > { %v2098_v3 = vsel %vm226_vm1, %v1899_v40, -inf  ;;  %v2100_v47 = vsel %vm226_vm1, %v6651_v5, -inf  ;;  %v2101_v26 = vsel %vm226_vm1, %v1906_v13, -inf  ;;  %5386 = vmatmul.mubr.msk.f32.gmra.mxu0 %vm226_vm1, %v6712_v27  ;;  %v2096_v9 = vmax.f32 %v2094_v17, %v2095_v18 }
 0x157   : > { %v1913_v22 = vmax.f32 %v1911_v12, %v1912_v54  ;;  %v2103_v16 = vsel %vm226_vm1, %v1857_v41, -inf  ;;  %5388 = vmatprep.mubr.msk.f32.mxu0 %vm226_vm1, %v2835_v21  ;;  %v2099_v52 = vmax.f32 %v2097_v45, %v2098_v3  ;;  %v2226_v1 = vsel %vm2170_vm4, %v2087_v6, %v2084_v59 }
 0x158   : > { %v2102_v33 = vmax.f32 %v2100_v47, %v2101_v26  ;;  %v2227_v44 = vsel %vm2172_vm5, %v2090_v62, %v2226_v1 }
 0x159   : > { %v2104_v38 = vsel %vm226_vm1, %v1913_v22, -inf  ;;  %v2228_v32 = vsel %vm2174_vm6, %v2093_v48, %v2227_v44 }
 0x15a   : > { %v2105_v5 = vmax.f32 %v2103_v16, %v2104_v38  ;;  %5389 = vmatmul.mubr.msk.f32.gmra.mxu0 %vm226_vm1, %v6451_v56  ;;  %v2229_v28 = vsel %vm2176_vm7, %v2096_v9, %v2228_v32 }
 0x15b   : > { %5391 = vmatprep.mubr.msk.f32.mxu0 %vm226_vm1, %v6565_v60  ;;  %v2230_v63 = vsel %vm2178_vm8, %v2099_v52, %v2229_v28 }
 0x15c   : > { %v2231_v0 = vsel %vm2180_vm9, %v2102_v33, %v2230_v63 }
 0x15d   : > { %v2232_v31 = vsel %vm2182_vm10, %v2105_v5, %v2231_v0 }
 0x15e   : > { %2249 = vst.msk [vmem:[#allocation2 + $0x81] sm:$0xff] %vm226_vm1, %v2232_v31 }
 0x165   : > { %v2689_v50 = vld [vmem:[#allocation2 + $0x80] sm:$0xff] }
 0x166   : > { %v2838_v10 = vld [vmem:[#allocation2 + $0x81] sm:$0xff]  ;;  %5378 = vmatmul.mubr.msk.f32.gmra.mxu1 %vm226_vm1, %v2689_v50 }
 0x167   : > { %5392 = vmatmul.mubr.msk.f32.gmra.mxu0 %vm226_vm1, %v2838_v10  ;;  %5396 = vmatprep.mubr.msk.f32.mxu1 %vm226_vm1, %v6574_v23  ;;  %v2987_v23 = vld [vmem:[#allocation2 + $0x82] sm:$0xff] }
 0x168   : > { %5410 = vmatprep.mubr.msk.f32.mxu0 %vm226_vm1, %v6577_v61  ;;  %v3137_v61 = vld [vmem:[#allocation2 + $0x90] sm:$0xff] }
 0x16a   : > { %5397 = vmatmul.mubr.msk.f32.vlgmr.msra.gmra.mxu1 %vm226_vm1, %v6579_v51 }
 0x16b   : > { %5411 = vmatmul.mubr.msk.f32.vlgmr.msra.gmra.mxu0 %vm226_vm1, %v6583_v43  ;;  %5399 = vmatprep.mubr.msk.f32.mxu1 %vm226_vm1, %v6613_v7  ;;  %v3609_v43 = vld [vmem:[#allocation3] sm:$0xff] }
 0x16c   : > { %5423 = vmatpush3.msk.msra.mxu1 %vm2292_vm0, %v6605_v15  ;;  %5437 = vmatpush3.msk.msra.mxu0 %vm2292_vm0, %v3436_v42  ;;  %v3618_v15 = vld [vmem:[#allocation3 + $0x1] sm:$0xff] }
 0x16d   : > { %5413 = vmatprep.mubr.msk.f32.mxu0 %vm226_vm1, %v6615_v24  ;;  %v2362_v24 = vpop.f32.mrf.mxu0 }
 0x16e   : > { %5400 = vmatmul.mubr.msk.f32.gmra.mxu1 %vm226_vm1, %v6625_v20 }
 0x16f   : > { %5414 = vmatmul.mubr.msk.f32.gmra.mxu0 %vm226_vm1, %v3133_v46  ;;  %5402 = vmatprep.mubr.msk.f32.mxu1 %vm226_vm1, %v6657_v57 }
 0x170   : > { %5416 = vmatprep.mubr.msk.f32.mxu0 %vm226_vm1, %v6453_v29  ;;  %v3286_v29 = vld [vmem:[#allocation2 + $0x91] sm:$0xff] }
 0x172   : > { %5403 = vmatmul.mubr.msk.f32.gmra.mxu1 %vm226_vm1, %v6665_v30 }
 0x173   : > { %5417 = vmatmul.mubr.msk.f32.gmra.mxu0 %vm226_vm1, %v6567_v25  ;;  %5405 = vmatprep.mubr.msk.f32.mxu1 %vm226_vm1, %v6676_v39  ;;  %v3435_v25 = vld [vmem:[#allocation2 + $0x92] sm:$0xff] }
 0x174   : > { %5419 = vmatprep.mubr.msk.f32.mxu0 %vm226_vm1, %v2689_v50 }
 0x176   : > { %5406 = vmatmul.mubr.msk.f32.gmra.mxu1 %vm226_vm1, %v2987_v23 }
 0x177   : > { %5420 = vmatmul.mubr.msk.f32.gmra.mxu0 %vm226_vm1, %v3137_v61  ;;  %5424 = vmatprep.mubr.msk.f32.mxu1 %vm226_vm1, %v6689_v55 }
 0x178   : > { %5438 = vmatprep.mubr.msk.f32.mxu0 %vm226_vm1, %v6579_v51  ;;  %v6859_v51 = vld [vmem:[%s7101_s3 + $0x10] sm:$0xff] }
 0x17a   : > { %5425 = vmatmul.mubr.msk.f32.vlgmr.msra.gmra.mxu1 %vm226_vm1, %v6692_v53 }
 0x17b   : > { %5439 = vmatmul.mubr.msk.f32.vlgmr.msra.gmra.mxu0 %vm226_vm1, %v6613_v7  ;;  %5427 = vmatprep.mubr.msk.f32.mxu1 %vm226_vm1, %v6712_v27  ;;  %v6867_v7 = vld [vmem:[%s7101_s3 + $0x18] sm:$0xff] }
 0x17c   : > { %5441 = vmatprep.mubr.msk.f32.mxu0 %vm226_vm1, %v6625_v20  ;;  %v5331_v20 = vpop.f32.mrf.mxu0 }
 0x17e   : > { %5428 = vmatmul.mubr.msk.f32.gmra.mxu1 %vm226_vm1, %v2835_v21 }
 0x17f   : > { %5442 = vmatmul.mubr.msk.f32.gmra.mxu0 %vm226_vm1, %v6657_v57  ;;  %5430 = vmatprep.mubr.msk.f32.mxu1 %vm226_vm1, %v6451_v56  ;;  %v3626_v56 = vld [vmem:[%s7101_s3 + $0x8] sm:$0xff]  ;;  %v5342_v57 = vpop.f32.mrf.mxu1 }
 0x180   : > { %5444 = vmatprep.mubr.msk.f32.mxu0 %vm226_vm1, %v6665_v30  ;;  %5450 = vmatprep.subr.mxu1 %v3626_v56  ;;  %v2372_v30 = vpop.f32.mrf.mxu0  ;;  %v2500_v52 = vadd.f32 %v5342_v57, %v5328_v4 }
 0x181   : > { %5451 = vmatpush3.msra.mxu1 %v3626_v56 }
 0x182   : > { %5431 = vmatmul.mubr.msk.f32.gmra.mxu1 %vm226_vm1, %v6565_v60  ;;  %v3617_v60 = vld [vmem:[%s7101_s3] sm:$0xff]  ;;  %5478 = vmatprep.subr.mxu1 %v6859_v51 }
 0x183   : > { %5445 = vmatmul.mubr.msk.f32.gmra.mxu0 %vm226_vm1, %v6676_v39  ;;  %5433 = vmatprep.mubr.msk.f32.mxu1 %vm226_vm1, %v2838_v10  ;;  %v2494_v39 = vpop.f32.mrf.mxu1 }
 0x184   : > { %5447 = vmatprep.mubr.msk.f32.mxu0 %vm226_vm1, %v2987_v23  ;;  %5464 = vmatprep.subr.mxu0 %v3617_v60  ;;  %v2495_v38 = vadd.f32 %v2494_v39, %v2362_v24 }
 0x185   : > { %5465 = vmatpush3.msra.mxu0 %v3617_v60  ;;  %v5345_v8 = vpop.f32.mrf.mxu1 }
 0x186   : > { %5434 = vmatmul.mubr.msk.f32.gmra.mxu1 %vm226_vm1, %v3286_v29  ;;  %5492 = vmatprep.subr.mxu0 %v6867_v7  ;;  %v2510_v28 = vadd.f32 %v5345_v8, %v5331_v20 }
 0x187   : > { %5448 = vmatmul.mubr.msk.f32.gmra.mxu0 %vm226_vm1, %v3435_v25  ;;  %5452 = vmatprep.mubr.msk.f32.mxu1 %vm254_vm11, %v3618_v15  ;;  %v2504_v53 = vpop.f32.mrf.mxu1 }
 0x188   : > { %5466 = vmatprep.mubr.msk.f32.mxu0 %vm254_vm11, %v3609_v43  ;;  %v2505_v50 = vadd.f32 %v2504_v53, %v2372_v30 }
 0x1ac   : > { %v5334_v55 = vpop.f32.mrf.mxu0 }
 0x1ad   : > { %v5348_v19 = vpop.f32.mrf.mxu1 }
 0x1ae   : > { %v2382_v14 = vpop.f32.mrf.mxu0  ;;  %v2520_v29 = vadd.f32 %v5348_v19, %v5334_v55 }
 0x1af   : > { %v2514_v40 = vpop.f32.mrf.mxu1 }
 0x1b0   : > { %v2515_v43 = vadd.f32 %v2514_v40, %v2382_v14 }
 0x1fe   : > { %v5337_v41 = vpop.f32.mrf.mxu0 }
 0x1ff   : > { %v5351_v2 = vpop.f32.mrf.mxu1 }
 0x200   : > { %v2392_v36 = vpop.f32.mrf.mxu0 }
 0x201   : > { %v2524_v37 = vpop.f32.mrf.mxu1 }
 0x202   : > { %v5356_v49 = vpop.f32.mrf.mxu0 }
 0x203   : > { %v5370_v27 = vpop.f32.mrf.mxu1  ;;  %v2675_v44 = vadd.f32 %v5356_v49, %v2500_v52  ;;  %v2530_v49 = vadd.f32 %v5351_v2, %v5337_v41 }
 0x204   : > { %v2635_v42 = vpop.f32.mrf.mxu0 }
 0x205   : > { %v2784_v35 = vpop.f32.mrf.mxu1  ;;  %v2674_v63 = vadd.f32 %v2635_v42, %v2495_v38  ;;  %v2824_v10 = vadd.f32 %v5370_v27, %v2675_v44 }
 0x206   : > { %v5359_v11 = vpop.f32.mrf.mxu0 }
 0x207   : > { %v5373_v21 = vpop.f32.mrf.mxu1  ;;  %v2677_v46 = vadd.f32 %v5359_v11, %v2510_v28  ;;  %v2823_v25 = vadd.f32 %v2784_v35, %v2674_v63  ;;  %v2525_v11 = vadd.f32 %v2524_v37, %v2392_v36 }
 0x208   : > { %v2645_v58 = vpop.f32.mrf.mxu0 }
 0x209   : > { %v2794_v62 = vpop.f32.mrf.mxu1  ;;  %v2676_v56 = vadd.f32 %v2645_v58, %v2505_v50  ;;  %v2826_v24 = vadd.f32 %v5373_v21, %v2677_v46 }
 0x20a   : > { %v5362_v12 = vpop.f32.mrf.mxu0 }
 0x20b   : > { %v5376_v45 = vpop.f32.mrf.mxu1  ;;  %v2679_v57 = vadd.f32 %v5362_v12, %v2520_v29  ;;  %v2825_v52 = vadd.f32 %v2794_v62, %v2676_v56 }
 0x20c   : > { %v2655_v59 = vpop.f32.mrf.mxu0 }
 0x20d   : > { %v2804_v3 = vpop.f32.mrf.mxu1  ;;  %v2678_v20 = vadd.f32 %v2655_v59, %v2515_v43  ;;  %v2828_v19 = vadd.f32 %v5376_v45, %v2679_v57 }
 0x20e   : > { %v5365_v34 = vpop.f32.mrf.mxu0 }
 0x20f   : > { %v2681_v27 = vadd.f32 %v5365_v34, %v2530_v49  ;;  %v2827_v40 = vadd.f32 %v2804_v3, %v2678_v20 }
 0x210   : > { %v2665_v13 = vpop.f32.mrf.mxu0 }
 0x211   : > { %v2680_v35 = vadd.f32 %v2665_v13, %v2525_v11 }
 0x212   : > { %v5384_v6 = vpop.f32.mrf.mxu0 }
 0x213   : > { %v2973_v60 = vadd.f32 %v5384_v6, %v2824_v10 }
 0x214   : > { %v2933_v17 = vpop.f32.mrf.mxu0 }
 0x215   : > { %v2972_v39 = vadd.f32 %v2933_v17, %v2823_v25 }
 0x216   : > { %v5387_v54 = vpop.f32.mrf.mxu0 }
 0x217   : > { %v2975_v53 = vadd.f32 %v5387_v54, %v2826_v24 }
 0x218   : > { %v2943_v18 = vpop.f32.mrf.mxu0 }
 0x219   : > { %v2974_v6 = vadd.f32 %v2943_v18, %v2825_v52  ;;  %v5085_v18 = vld [vmem:[%s7100_s2] ss:$0 sm:$0xff] }
 0x21a   : > { %v5390_v48 = vpop.f32.mrf.mxu0 }
 0x21b   : > { %v2977_v41 = vadd.f32 %v5390_v48, %v2828_v19 }
 0x21c   : > { %v2953_v47 = vpop.f32.mrf.mxu0 }
 0x21d   : > { %v2976_v44 = vadd.f32 %v2953_v47, %v2827_v40 }
 0x226   : > { %v5379_v26 = vpop.f32.mrf.mxu1 }
 0x227   : > { %v5393_v22 = vpop.f32.mrf.mxu0  ;;  %v2830_v59 = vadd.f32 %v5379_v26, %v2681_v27 }
 0x228   : > { %v2814_v9 = vpop.f32.mrf.mxu1 }
 0x229   : > { %v6870_v16 = vpop.f32.mrf.mxu0  ;;  %v2829_v34 = vadd.f32 %v2814_v9, %v2680_v35  ;;  %v2979_v28 = vadd.f32 %v5393_v22, %v2830_v59 }
 0x22a   : > { %v5398_v1 = vpop.f32.mrf.mxu1 }
 0x22b   : > { %v5412_v33 = vpop.f32.mrf.mxu0  ;;  %v3122_v30 = vadd.f32 %v5398_v1, %v2973_v60  ;;  %v2978_v47 = vadd.f32 %v6870_v16, %v2829_v34 }
 0x22c   : > { %v3082_v5 = vpop.f32.mrf.mxu1 }
 0x22d   : > { %v3232_v32 = vpop.f32.mrf.mxu0  ;;  %v3121_v58 = vadd.f32 %v3082_v5, %v2972_v39  ;;  %v3272_v14 = vadd.f32 %v5412_v33, %v3122_v30 }
 0x22e   : > { %v5401_v0 = vpop.f32.mrf.mxu1 }
 0x22f   : > { %v5415_v31 = vpop.f32.mrf.mxu0  ;;  %v3124_v17 = vadd.f32 %v5401_v0, %v2975_v53  ;;  %v3271_v2 = vadd.f32 %v3232_v32, %v3121_v58 }
 0x230   : > { %v3092_v23 = vpop.f32.mrf.mxu1 }
 0x231   : > { %v3242_v61 = vpop.f32.mrf.mxu0  ;;  %v3123_v54 = vadd.f32 %v3092_v23, %v2974_v6  ;;  %v3274_v37 = vadd.f32 %v5415_v31, %v3124_v17 }
 0x232   : > { %v5404_v15 = vpop.f32.mrf.mxu1 }
 0x233   : > { %v5418_v4 = vpop.f32.mrf.mxu0  ;;  %v3126_v3 = vadd.f32 %v5404_v15, %v2977_v41  ;;  %v3273_v5 = vadd.f32 %v3242_v61, %v3123_v54 }
 0x234   : > { %v3102_v8 = vpop.f32.mrf.mxu1 }
 0x235   : > { %v3252_v42 = vpop.f32.mrf.mxu0  ;;  %v3125_v32 = vadd.f32 %v3102_v8, %v2976_v44  ;;  %v3276_v50 = vadd.f32 %v5418_v4, %v3126_v3 }
 0x236   : > { %v5407_v38 = vpop.f32.mrf.mxu1 }
 0x237   : > { %v5421_v55 = vpop.f32.mrf.mxu0  ;;  %v3128_v22 = vadd.f32 %v5407_v38, %v2979_v28  ;;  %v3275_v46 = vadd.f32 %v3252_v42, %v3125_v32 }
 0x238   : > { %v3112_v21 = vpop.f32.mrf.mxu1 }
 0x239   : > { %v3262_v12 = vpop.f32.mrf.mxu0  ;;  %v3127_v43 = vadd.f32 %v3112_v21, %v2978_v47  ;;  %v3278_v15 = vadd.f32 %v5421_v55, %v3128_v22 }
 0x23a   : > { %v5426_v62 = vpop.f32.mrf.mxu1 }
 0x23b   : > { %v5440_v1 = vpop.f32.mrf.mxu0  ;;  %v3421_v36 = vadd.f32 %v5426_v62, %v3272_v14  ;;  %v3277_v20 = vadd.f32 %v3262_v12, %v3127_v43  ;;  %v4623_v43 = vld [vmem:[#allocation3 + $0x91] sm:$0xff] }
 0x23c   : > { %v3381_v45 = vpop.f32.mrf.mxu1 }
 0x23d   : > { %v3530_v13 = vpop.f32.mrf.mxu0  ;;  %v3420_v33 = vadd.f32 %v3381_v45, %v3271_v2  ;;  %v3570_v48 = vadd.f32 %v5440_v1, %v3421_v36  ;;  %v4185_v36 = vld [vmem:[%s7101_s3 + $0x20] sm:$0xff] }
 0x23e   : > { %v5429_v26 = vpop.f32.mrf.mxu1 }
 0x23f   : > { %v5443_v63 = vpop.f32.mrf.mxu0  ;;  %v3423_v0 = vadd.f32 %v5429_v26, %v3274_v37  ;;  %v3585_v31 = vadd.f32 %v5085_v18, %v3570_v48  ;;  %v3569_v9 = vadd.f32 %v3530_v13, %v3420_v33  ;;  %v4331_v37 = vld [vmem:[%s7101_s3 + $0x28] sm:$0xff] }
 0x240   : > { %v3391_v10 = vpop.f32.mrf.mxu1  ;;  %v3885_v48 = vld [vmem:[#allocation3 + $0x2] sm:$0xff] }
 0x241   : > { %v3540_v23 = vpop.f32.mrf.mxu0  ;;  %v3422_v29 = vadd.f32 %v3391_v10, %v3273_v5  ;;  %v3593_v25 = vmax.f32 %v3585_v31, 0.0  ;;  %v3584_v56 = vadd.f32 %v5085_v18, %v3569_v9  ;;  %v3572_v60 = vadd.f32 %v5443_v63, %v3423_v0  ;;  %v4478_v0 = vld [vmem:[%s7101_s3 + $0x30] sm:$0xff] }
 0x242   : > { %v5432_v61 = vpop.f32.mrf.mxu1 }
 0x243   : > { %v5446_v24 = vpop.f32.mrf.mxu0  ;;  %v3425_v57 = vadd.f32 %v5432_v61, %v3276_v50  ;;  %3602 = vst.msk [vmem:[#allocation3 + $0x21] sm:$0xff] %vm254_vm11, %v3593_v25  ;;  %v3592_v16 = vmax.f32 %v3584_v56, 0.0  ;;  %v3587_v39 = vadd.f32 %v5085_v18, %v3572_v60  ;;  %v3571_v4 = vadd.f32 %v3540_v23, %v3422_v29  ;;  %v4624_v50 = vld [vmem:[%s7101_s3 + $0x38] sm:$0xff]  ;;  %v4770_v29 = vld [vmem:[%s7101_s3 + $0x40] sm:$0xff]  ;;  %v4477_v60 = vld [vmem:[#allocation3 + $0x90] sm:$0xff] }
 0x244   : > { %v3401_v49 = vpop.f32.mrf.mxu1  ;;  %v4769_v61 = vld [vmem:[#allocation3 + $0x92] sm:$0xff] }
 0x245   : > { %v3550_v8 = vpop.f32.mrf.mxu0  ;;  %v3424_v52 = vadd.f32 %v3401_v49, %v3275_v46  ;;  %3601 = vst.msk [vmem:[#allocation3 + $0x11] sm:$0xff] %vm254_vm11, %v3592_v16  ;;  %v3595_v42 = vmax.f32 %v3587_v39, 0.0  ;;  %v3586_v30 = vadd.f32 %v5085_v18, %v3571_v4  ;;  %v3574_v53 = vadd.f32 %v5446_v24, %v3425_v57 }
 0x246   : > { %v5435_v11 = vpop.f32.mrf.mxu1 }
 0x247   : > { %v5449_v27 = vpop.f32.mrf.mxu0  ;;  %v3427_v38 = vadd.f32 %v5435_v11, %v3278_v15  ;;  %3604 = vst.msk [vmem:[#allocation3 + $0x41] sm:$0xff] %vm254_vm11, %v3595_v42  ;;  %v3594_v55 = vmax.f32 %v3586_v30, 0.0  ;;  %v3589_v19 = vadd.f32 %v5085_v18, %v3574_v53  ;;  %v3573_v58 = vadd.f32 %v3550_v8, %v3424_v52 }
 0x248   : > { %v3411_v6 = vpop.f32.mrf.mxu1 }
 0x249   : > { %v3560_v14 = vpop.f32.mrf.mxu0  ;;  %v3426_v40 = vadd.f32 %v3411_v6, %v3277_v20  ;;  %3603 = vst.msk [vmem:[#allocation3 + $0x31] sm:$0xff] %vm254_vm11, %v3594_v55  ;;  %v3597_v35 = vmax.f32 %v3589_v19, 0.0  ;;  %v3588_v21 = vadd.f32 %v5085_v18, %v3573_v58  ;;  %v3576_v12 = vadd.f32 %v5449_v27, %v3427_v38 }
 0x24a   : > { %v6887_v54 = vld [vmem:[#allocation3 + $0x21] sm:$0xff] }
 0x24b   : > { %3606 = vst.msk [vmem:[#allocation3 + $0x61] sm:$0xff] %vm254_vm11, %v3597_v35  ;;  %v3596_v17 = vmax.f32 %v3588_v21, 0.0  ;;  %v3591_v41 = vadd.f32 %v5085_v18, %v3576_v12  ;;  %v3575_v2 = vadd.f32 %v3560_v14, %v3426_v40  ;;  %v6898_v34 = vld [vmem:[#allocation3 + $0x20] sm:$0xff] }
 0x24c   : > { %v6881_v59 = vld [vmem:[#allocation3 + $0x11] sm:$0xff]  ;;  %v6950_v63 = vld [vmem:[#allocation3 + $0x22] sm:$0xff] }
 0x24d   : > { %v3610_v44 = vld [vmem:[#allocation3 + $0x10] sm:$0xff]  ;;  %3605 = vst.msk [vmem:[#allocation3 + $0x51] sm:$0xff] %vm254_vm11, %v3596_v17  ;;  %v3599_v62 = vmax.f32 %v3591_v41, 0.0  ;;  %v3590_v1 = vadd.f32 %v5085_v18, %v3575_v2  ;;  %5453 = vmatmul.mubr.msk.f32.vlgmr.msra.gmra.mxu1 %vm254_vm11, %v6881_v59 }
 0x24e   : > { %5467 = vmatmul.mubr.msk.f32.vlgmr.msra.gmra.mxu0 %vm254_vm11, %v3610_v44  ;;  %5479 = vmatpush3.msra.mxu1 %v6859_v51  ;;  %v6913_v51 = vld [vmem:[#allocation3 + $0x41] sm:$0xff]  ;;  %v3886_v26 = vld [vmem:[#allocation3 + $0x12] sm:$0xff] }
 0x24f   : > { %5455 = vmatprep.mubr.msk.f32.mxu1 %vm254_vm11, %v6887_v54  ;;  %3608 = vst.msk [vmem:[#allocation3 + $0x81] sm:$0xff] %vm254_vm11, %v3599_v62  ;;  %v3598_v28 = vmax.f32 %v3590_v1, 0.0  ;;  %5469 = vmatprep.mubr.msk.f32.mxu0 %vm254_vm11, %v6898_v34  ;;  %v6915_v13 = vld [vmem:[#allocation3 + $0x40] sm:$0xff] }
 0x250   : > { %5493 = vmatpush3.msra.mxu0 %v6867_v7  ;;  %v6904_v45 = vld [vmem:[#allocation3 + $0x31] sm:$0xff]  ;;  %5506 = vmatprep.subr.mxu1 %v4185_v36  ;;  %v3889_v9 = vld [vmem:[#allocation3 + $0x42] sm:$0xff] }
 0x251   : > { %v6906_v18 = vld [vmem:[#allocation3 + $0x30] sm:$0xff]  ;;  %5520 = vmatprep.subr.mxu0 %v4331_v37  ;;  %3607 = vst.msk [vmem:[#allocation3 + $0x71] sm:$0xff] %vm254_vm11, %v3598_v28  ;;  %5456 = vmatmul.mubr.msk.f32.gmra.mxu1 %vm254_vm11, %v6904_v45 }
 0x252   : > { %5470 = vmatmul.mubr.msk.f32.gmra.mxu0 %vm254_vm11, %v6906_v18  ;;  %5458 = vmatprep.mubr.msk.f32.mxu1 %vm254_vm11, %v6913_v51  ;;  %v6929_v33 = vld [vmem:[#allocation3 + $0x61] sm:$0xff]  ;;  %v3888_v31 = vld [vmem:[#allocation3 + $0x32] sm:$0xff] }
 0x253   : > { %5472 = vmatprep.mubr.msk.f32.mxu0 %vm254_vm11, %v6915_v13  ;;  %v6931_v5 = vld [vmem:[#allocation3 + $0x60] sm:$0xff] }
 0x254   : > { %v6921_v7 = vld [vmem:[#allocation3 + $0x51] sm:$0xff]  ;;  %v3891_v10 = vld [vmem:[#allocation3 + $0x62] sm:$0xff] }
 0x255   : > { %v6923_v3 = vld [vmem:[#allocation3 + $0x50] sm:$0xff]  ;;  %5459 = vmatmul.mubr.msk.f32.gmra.mxu1 %vm254_vm11, %v6921_v7 }
 0x256   : > { %5473 = vmatmul.mubr.msk.f32.gmra.mxu0 %vm254_vm11, %v6923_v3  ;;  %5461 = vmatprep.mubr.msk.f32.mxu1 %vm254_vm11, %v6929_v33  ;;  %v3890_v22 = vld [vmem:[#allocation3 + $0x52] sm:$0xff]  ;;  %v4038_v23 = vld [vmem:[#allocation3 + $0x80] sm:$0xff] }
 0x257   : > { %5475 = vmatprep.mubr.msk.f32.mxu0 %vm254_vm11, %v6931_v5  ;;  %v4184_v25 = vld [vmem:[#allocation3 + $0x81] sm:$0xff] }
 0x258   : > { %v6937_v32 = vld [vmem:[#allocation3 + $0x71] sm:$0xff]  ;;  %v4330_v56 = vld [vmem:[#allocation3 + $0x82] sm:$0xff] }
 0x259   : > { %v6939_v47 = vld [vmem:[#allocation3 + $0x70] sm:$0xff]  ;;  %5462 = vmatmul.mubr.msk.f32.gmra.mxu1 %vm254_vm11, %v6937_v32 }
 0x25a   : > { %5476 = vmatmul.mubr.msk.f32.gmra.mxu0 %vm254_vm11, %v6939_v47  ;;  %5480 = vmatprep.mubr.msk.f32.mxu1 %vm254_vm11, %v3885_v48  ;;  %v3892_v46 = vld [vmem:[#allocation3 + $0x72] sm:$0xff] }
 0x25b   : > { %5494 = vmatprep.mubr.msk.f32.mxu0 %vm254_vm11, %v3610_v44 }
 0x25d   : > { %5481 = vmatmul.mubr.msk.f32.vlgmr.msra.gmra.mxu1 %vm254_vm11, %v3886_v26 }
 0x25e   : > { %5495 = vmatmul.mubr.msk.f32.vlgmr.msra.gmra.mxu0 %vm254_vm11, %v6898_v34  ;;  %5507 = vmatpush3.msra.mxu1 %v4185_v36 }
 0x25f   : > { %5483 = vmatprep.mubr.msk.f32.mxu1 %vm254_vm11, %v6950_v63  ;;  %5497 = vmatprep.mubr.msk.f32.mxu0 %vm254_vm11, %v6906_v18 }
 0x260   : > { %5521 = vmatpush3.msra.mxu0 %v4331_v37  ;;  %5534 = vmatprep.subr.mxu1 %v4478_v0 }
 0x261   : > { %5548 = vmatprep.subr.mxu0 %v4624_v50  ;;  %5484 = vmatmul.mubr.msk.f32.gmra.mxu1 %vm254_vm11, %v3888_v31 }
 0x262   : > { %5498 = vmatmul.mubr.msk.f32.gmra.mxu0 %vm254_vm11, %v6915_v13  ;;  %5486 = vmatprep.mubr.msk.f32.mxu1 %vm254_vm11, %v3889_v9 }
 0x263   : > { %5500 = vmatprep.mubr.msk.f32.mxu0 %vm254_vm11, %v6923_v3 }
 0x265   : > { %5487 = vmatmul.mubr.msk.f32.gmra.mxu1 %vm254_vm11, %v3890_v22 }
 0x266   : > { %5501 = vmatmul.mubr.msk.f32.gmra.mxu0 %vm254_vm11, %v6931_v5  ;;  %5489 = vmatprep.mubr.msk.f32.mxu1 %vm254_vm11, %v3891_v10 }
 0x267   : > { %5503 = vmatprep.mubr.msk.f32.mxu0 %vm254_vm11, %v6939_v47 }
 0x269   : > { %5490 = vmatmul.mubr.msk.f32.gmra.mxu1 %vm254_vm11, %v3892_v46 }
 0x26a   : > { %5504 = vmatmul.mubr.msk.f32.gmra.mxu0 %vm254_vm11, %v4038_v23  ;;  %5508 = vmatprep.mubr.msk.f32.mxu1 %vm254_vm11, %v6881_v59 }
 0x26b   : > { %5522 = vmatprep.mubr.msk.f32.mxu0 %vm254_vm11, %v3886_v26 }
 0x26d   : > { %5509 = vmatmul.mubr.msk.f32.vlgmr.msra.gmra.mxu1 %vm254_vm11, %v6887_v54 }
 0x26e   : > { %5523 = vmatmul.mubr.msk.f32.vlgmr.msra.gmra.mxu0 %vm254_vm11, %v6950_v63  ;;  %5535 = vmatpush3.msra.mxu1 %v4478_v0 }
 0x26f   : > { %5511 = vmatprep.mubr.msk.f32.mxu1 %vm254_vm11, %v6904_v45  ;;  %5525 = vmatprep.mubr.msk.f32.mxu0 %vm254_vm11, %v3888_v31 }
 0x270   : > { %5549 = vmatpush3.msra.mxu0 %v4624_v50  ;;  %5562 = vmatprep.subr.mxu1 %v4770_v29 }
 0x271   : > { %5512 = vmatmul.mubr.msk.f32.gmra.mxu1 %vm254_vm11, %v6913_v51 }
 0x272   : > { %5526 = vmatmul.mubr.msk.f32.gmra.mxu0 %vm254_vm11, %v3889_v9  ;;  %5514 = vmatprep.mubr.msk.f32.mxu1 %vm254_vm11, %v6921_v7 }
 0x273   : > { %5528 = vmatprep.mubr.msk.f32.mxu0 %vm254_vm11, %v3890_v22 }
 0x275   : > { %5515 = vmatmul.mubr.msk.f32.gmra.mxu1 %vm254_vm11, %v6929_v33 }
 0x276   : > { %5529 = vmatmul.mubr.msk.f32.gmra.mxu0 %vm254_vm11, %v3891_v10  ;;  %5517 = vmatprep.mubr.msk.f32.mxu1 %vm254_vm11, %v6937_v32 }
 0x277   : > { %5531 = vmatprep.mubr.msk.f32.mxu0 %vm254_vm11, %v3892_v46 }
 0x279   : > { %5518 = vmatmul.mubr.msk.f32.gmra.mxu1 %vm254_vm11, %v4184_v25 }
 0x27a   : > { %5532 = vmatmul.mubr.msk.f32.gmra.mxu0 %vm254_vm11, %v4330_v56  ;;  %5536 = vmatprep.mubr.msk.f32.mxu1 %vm254_vm11, %v6898_v34 }
 0x27b   : > { %5550 = vmatprep.mubr.msk.f32.mxu0 %vm254_vm11, %v6887_v54 }
 0x27d   : > { %5537 = vmatmul.mubr.msk.f32.vlgmr.msra.gmra.mxu1 %vm254_vm11, %v6906_v18 }
 0x27e   : > { %5551 = vmatmul.mubr.msk.f32.vlgmr.msra.gmra.mxu0 %vm254_vm11, %v6904_v45  ;;  %5563 = vmatpush3.msra.mxu1 %v4770_v29 }
 0x27f   : > { %5539 = vmatprep.mubr.msk.f32.mxu1 %vm254_vm11, %v6915_v13  ;;  %5553 = vmatprep.mubr.msk.f32.mxu0 %vm254_vm11, %v6913_v51 }
 0x281   : > { %5540 = vmatmul.mubr.msk.f32.gmra.mxu1 %vm254_vm11, %v6923_v3 }
 0x282   : > { %5554 = vmatmul.mubr.msk.f32.gmra.mxu0 %vm254_vm11, %v6921_v7  ;;  %5542 = vmatprep.mubr.msk.f32.mxu1 %vm254_vm11, %v6931_v5 }
 0x283   : > { %5556 = vmatprep.mubr.msk.f32.mxu0 %vm254_vm11, %v6929_v33 }
 0x285   : > { %5543 = vmatmul.mubr.msk.f32.gmra.mxu1 %vm254_vm11, %v6939_v47 }
 0x286   : > { %5557 = vmatmul.mubr.msk.f32.gmra.mxu0 %vm254_vm11, %v6937_v32  ;;  %5545 = vmatprep.mubr.msk.f32.mxu1 %vm254_vm11, %v4038_v23 }
 0x287   : > { %5559 = vmatprep.mubr.msk.f32.mxu0 %vm254_vm11, %v4184_v25 }
 0x289   : > { %5546 = vmatmul.mubr.msk.f32.gmra.mxu1 %vm254_vm11, %v4477_v60 }
 0x28a   : > { %5560 = vmatmul.mubr.msk.f32.gmra.mxu0 %vm254_vm11, %v4623_v43  ;;  %5564 = vmatprep.mubr.msk.f32.mxu1 %vm254_vm11, %v6950_v63 }
 0x28d   : > { %5565 = vmatmul.mubr.msk.f32.vlgmr.msra.gmra.mxu1 %vm254_vm11, %v3888_v31 }
 0x28e   : > { %5567 = vmatprep.mubr.msk.f32.mxu1 %vm254_vm11, %v3889_v9 }
 0x291   : > { %5568 = vmatmul.mubr.msk.f32.gmra.mxu1 %vm254_vm11, %v3890_v22 }
 0x292   : > { %5570 = vmatprep.mubr.msk.f32.mxu1 %vm254_vm11, %v3891_v10 }
 0x295   : > { %5571 = vmatmul.mubr.msk.f32.gmra.mxu1 %vm254_vm11, %v3892_v46 }
 0x296   : > { %5573 = vmatprep.mubr.msk.f32.mxu1 %vm254_vm11, %v4330_v56 }
 0x299   : > { %5574 = vmatmul.mubr.msk.f32.gmra.mxu1 %vm254_vm11, %v4769_v61 }
 0x30d   : > { %v5454_v15 = vpop.f32.mrf.mxu1 }
 0x30e   : > { %v5468_v24 = vpop.f32.mrf.mxu0 }
 0x30f   : > { %v3717_v57 = vpop.f32.mrf.mxu1  ;;  %v3852_v32 = vadd.f32 %v5468_v24, %v5454_v15 }
 0x310   : > { %v3846_v16 = vpop.f32.mrf.mxu0 }
 0x311   : > { %v5457_v39 = vpop.f32.mrf.mxu1  ;;  %v3847_v63 = vadd.f32 %v3846_v16, %v3717_v57 }
 0x312   : > { %v5471_v4 = vpop.f32.mrf.mxu0 }
 0x313   : > { %v3727_v49 = vpop.f32.mrf.mxu1  ;;  %v3862_v9 = vadd.f32 %v5471_v4, %v5457_v39 }
 0x314   : > { %v3856_v20 = vpop.f32.mrf.mxu0 }
 0x315   : > { %v5460_v8 = vpop.f32.mrf.mxu1  ;;  %v3857_v46 = vadd.f32 %v3856_v20, %v3727_v49 }
 0x316   : > { %v5474_v52 = vpop.f32.mrf.mxu0 }
 0x317   : > { %v3737_v42 = vpop.f32.mrf.mxu1  ;;  %v3872_v25 = vadd.f32 %v5474_v52, %v5460_v8 }
 0x318   : > { %v3866_v30 = vpop.f32.mrf.mxu0 }
 0x319   : > { %v5463_v53 = vpop.f32.mrf.mxu1  ;;  %v3867_v24 = vadd.f32 %v3866_v30, %v3737_v42 }
 0x31a   : > { %v5477_v11 = vpop.f32.mrf.mxu0 }
 0x31b   : > { %v7040_v27 = vpop.f32.mrf.mxu1 }
 0x31c   : > { %v7042_v38 = vpop.f32.mrf.mxu0 }
 0x31d   : > { %v5482_v55 = vpop.f32.mrf.mxu1  ;;  %v3877_v8 = vadd.f32 %v7042_v38, %v7040_v27 }
 0x31e   : > { %v5496_v19 = vpop.f32.mrf.mxu0  ;;  %v4024_v0 = vadd.f32 %v5482_v55, %v3852_v32  ;;  %v3882_v55 = vadd.f32 %v5477_v11, %v5463_v53 }
 0x31f   : > { %v3984_v58 = vpop.f32.mrf.mxu1 }
 0x320   : > { %v4130_v6 = vpop.f32.mrf.mxu0  ;;  %v4023_v22 = vadd.f32 %v3984_v58, %v3847_v63  ;;  %v4170_v23 = vadd.f32 %v5496_v19, %v4024_v0 }
 0x321   : > { %v5485_v14 = vpop.f32.mrf.mxu1 }
 0x322   : > { %v5499_v40 = vpop.f32.mrf.mxu0  ;;  %v4026_v29 = vadd.f32 %v5485_v14, %v3862_v9  ;;  %v4169_v43 = vadd.f32 %v4130_v6, %v4023_v22 }
 0x323   : > { %v3994_v35 = vpop.f32.mrf.mxu1 }
 0x324   : > { %v4140_v21 = vpop.f32.mrf.mxu0  ;;  %v4025_v61 = vadd.f32 %v3994_v35, %v3857_v46  ;;  %v4172_v57 = vadd.f32 %v5499_v40, %v4026_v29 }
 0x325   : > { %v5488_v12 = vpop.f32.mrf.mxu1 }
 0x326   : > { %v5502_v17 = vpop.f32.mrf.mxu0  ;;  %v4171_v58 = vadd.f32 %v4140_v21, %v4025_v61 }
 0x327   : > { %v4004_v41 = vpop.f32.mrf.mxu1 }
 0x328   : > { %v4150_v2 = vpop.f32.mrf.mxu0  ;;  %v4027_v32 = vadd.f32 %v4004_v41, %v3867_v24 }
 0x329   : > { %v5491_v59 = vpop.f32.mrf.mxu1 }
 0x32a   : > { %v7044_v44 = vpop.f32.mrf.mxu0  ;;  %v4030_v42 = vadd.f32 %v5491_v59, %v3882_v55  ;;  %v4173_v11 = vadd.f32 %v4150_v2, %v4027_v32 }
 0x32b   : > { %v4014_v62 = vpop.f32.mrf.mxu1 }
 0x32c   : > { %v7046_v1 = vpop.f32.mrf.mxu0  ;;  %v4029_v14 = vadd.f32 %v4014_v62, %v3877_v8 }
 0x32d   : > { %v5510_v54 = vpop.f32.mrf.mxu1 }
 0x32e   : > { %v5524_v36 = vpop.f32.mrf.mxu0  ;;  %v4316_v15 = vadd.f32 %v5510_v54, %v4170_v23  ;;  %v4176_v54 = vadd.f32 %v7044_v44, %v4030_v42  ;;  %v4175_v59 = vadd.f32 %v7046_v1, %v4029_v14 }
 0x32f   : > { %v4276_v37 = vpop.f32.mrf.mxu1 }
 0x330   : > { %v4422_v34 = vpop.f32.mrf.mxu0  ;;  %v4315_v16 = vadd.f32 %v4276_v37, %v4169_v43  ;;  %v4462_v49 = vadd.f32 %v5524_v36, %v4316_v15 }
 0x331   : > { %v5513_v28 = vpop.f32.mrf.mxu1 }
 0x332   : > { %v5527_v45 = vpop.f32.mrf.mxu0  ;;  %v4318_v20 = vadd.f32 %v5513_v28, %v4172_v57  ;;  %v4461_v19 = vadd.f32 %v4422_v34, %v4315_v16 }
 0x333   : > { %v4286_v18 = vpop.f32.mrf.mxu1 }
 0x334   : > { %v4432_v51 = vpop.f32.mrf.mxu0  ;;  %v4317_v6 = vadd.f32 %v4286_v18, %v4171_v58 }
 0x335   : > { %v5516_v13 = vpop.f32.mrf.mxu1 }
 0x336   : > { %v5530_v7 = vpop.f32.mrf.mxu0  ;;  %v4463_v27 = vadd.f32 %v4432_v51, %v4317_v6 }
 0x337   : > { %v4296_v3 = vpop.f32.mrf.mxu1 }
 0x338   : > { %v7048_v33 = vpop.f32.mrf.mxu0  ;;  %v4319_v36 = vadd.f32 %v4296_v3, %v4173_v11 }
 0x339   : > { %v5519_v5 = vpop.f32.mrf.mxu1 }
 0x33a   : > { %v7050_v48 = vpop.f32.mrf.mxu0  ;;  %v4322_v28 = vadd.f32 %v5519_v5, %v4176_v54  ;;  %v4465_v44 = vadd.f32 %v7048_v33, %v4319_v36 }
 0x33b   : > { %7104 = vst [vmem:[#allocation4_spill] sm:$0xff] %v7050_v48  ;;  %v7052_v47 = vpop.f32.mrf.mxu1  ;;  %v4028_v48 = vadd.f32 %v5488_v12, %v3872_v25  ;;  %v4464_v12 = vadd.f32 %v5527_v45, %v4318_v20  ;;  %v5158_v45 = vld [vmem:[%s7102_s4] ss:$0 sm:$0xff] }
 0x33c   : > { %v7054_v26 = vpop.f32.mrf.mxu0  ;;  %v4321_v51 = vadd.f32 %v7052_v47, %v4175_v59 }
 0x33d   : > { %7105 = vst [vmem:[#allocation5_spill] sm:$0xff] %v7054_v26  ;;  %v5538_v50 = vpop.f32.mrf.mxu1  ;;  %v4174_v52 = vadd.f32 %v5502_v17, %v4028_v48 }
 0x33e   : > { %v5552_v31 = vpop.f32.mrf.mxu0  ;;  %v4609_v53 = vadd.f32 %v5538_v50, %v4462_v49 }
 0x33f   : > { %v4569_v10 = vpop.f32.mrf.mxu1  ;;  %v4320_v40 = vadd.f32 %v5516_v13, %v4174_v52 }
 0x340   : > { %v4715_v56 = vpop.f32.mrf.mxu0  ;;  %v4608_v41 = vadd.f32 %v4569_v10, %v4461_v19  ;;  %v4755_v38 = vadd.f32 %v5552_v31, %v4609_v53 }
 0x341   : > { %v5541_v60 = vpop.f32.mrf.mxu1  ;;  %v4466_v34 = vadd.f32 %v5530_v7, %v4320_v40 }
 0x342   : > { %v5555_v39 = vpop.f32.mrf.mxu0  ;;  %v4611_v17 = vadd.f32 %v5541_v60, %v4464_v12  ;;  %v4754_v18 = vadd.f32 %v4715_v56, %v4608_v41  ;;  %v7107_v5 = vld [vmem:[#allocation4_spill] sm:$0xff] }
 0x343   : > { %v4579_v26 = vpop.f32.mrf.mxu1  ;;  %v4468_v50 = vadd.f32 %v7107_v5, %v4322_v28 }
 0x344   : > { %v4725_v35 = vpop.f32.mrf.mxu0  ;;  %v4610_v13 = vadd.f32 %v4579_v26, %v4463_v27  ;;  %v4757_v0 = vadd.f32 %v5555_v39, %v4611_v17  ;;  %v7108_v46 = vld [vmem:[#allocation5_spill] sm:$0xff] }
 0x345   : > { %v5544_v4 = vpop.f32.mrf.mxu1  ;;  %v4467_v23 = vadd.f32 %v7108_v46, %v4321_v51 }
 0x346   : > { %v5558_v2 = vpop.f32.mrf.mxu0  ;;  %v4613_v3 = vadd.f32 %v5544_v4, %v4466_v34  ;;  %v4756_v22 = vadd.f32 %v4725_v35, %v4610_v13 }
 0x347   : > { %v4589_v30 = vpop.f32.mrf.mxu1 }
 0x348   : > { %v4612_v31 = vadd.f32 %v4589_v30, %v4465_v44  ;;  %v4735_v9 = vpop.f32.mrf.mxu0  ;;  %v4759_v29 = vadd.f32 %v5558_v2, %v4613_v3 }
 0x349   : > { %v5547_v21 = vpop.f32.mrf.mxu1 }
 0x34a   : > { %v5561_v25 = vpop.f32.mrf.mxu0  ;;  %v4615_v60 = vadd.f32 %v5547_v21, %v4468_v50  ;;  %v4758_v24 = vadd.f32 %v4735_v9, %v4612_v31 }
 0x34b   : > { %v4599_v37 = vpop.f32.mrf.mxu1 }
 0x34c   : > { %v4614_v16 = vadd.f32 %v4599_v37, %v4467_v23  ;;  %v4745_v4 = vpop.f32.mrf.mxu0  ;;  %v4761_v49 = vadd.f32 %v5561_v25, %v4615_v60 }
 0x34d   : > { %v5566_v62 = vpop.f32.mrf.mxu1 }
 0x34e   : > { %v4901_v48 = vadd.f32 %v5566_v62, %v4755_v38  ;;  %v4760_v30 = vadd.f32 %v4745_v4, %v4614_v16 }
 0x34f   : > { %v4861_v63 = vpop.f32.mrf.mxu1 }
 0x350   : > { %v4916_v1 = vadd.f32 %v5158_v45, %v4901_v48  ;;  %v4900_v7 = vadd.f32 %v4861_v63, %v4754_v18 }
 0x351   : > { %v5569_v26 = vpop.f32.mrf.mxu1 }
 0x352   : > { %v4924_v33 = vmax.f32 %v4916_v1, 0.0  ;;  %v4915_v47 = vadd.f32 %v5158_v45, %v4900_v7  ;;  %v4903_v10 = vadd.f32 %v5569_v26, %v4757_v0 }
 0x353   : > { %v4871_v56 = vpop.f32.mrf.mxu1 }
 0x354   : > { %4932 = vst.msk [vmem:[%s7076_s27 + $0x8] sm:$0xff] %vm254_vm11, %v4924_v33  ;;  %v4923_v43 = vmax.f32 %v4915_v47, 0.0  ;;  %v4918_v61 = vadd.f32 %v5158_v45, %v4903_v10  ;;  %v4902_v15 = vadd.f32 %v4871_v56, %v4756_v22 }
 0x355   : > { %v5572_v57 = vpop.f32.mrf.mxu1 }
 0x356   : > { %4931 = vst.msk [vmem:[%s7076_s27] sm:$0xff] %vm254_vm11, %v4923_v43  ;;  %v4926_v55 = vmax.f32 %v4918_v61, 0.0  ;;  %v4917_v32 = vadd.f32 %v5158_v45, %v4902_v15  ;;  %v4905_v39 = vadd.f32 %v5572_v57, %v4759_v29 }
 0x357   : > { %v4881_v58 = vpop.f32.mrf.mxu1 }
 0x358   : > { %4934 = vst.msk [vmem:[%s7076_s27 + $0x18] sm:$0xff] %vm254_vm11, %v4926_v55  ;;  %v4925_v20 = vmax.f32 %v4917_v32, 0.0  ;;  %v4920_v8 = vadd.f32 %v5158_v45, %v4905_v39  ;;  %v4904_v52 = vadd.f32 %v4881_v58, %v4758_v24 }
 0x359   : > { %v5575_v42 = vpop.f32.mrf.mxu1 }
 0x35a   : > { %4933 = vst.msk [vmem:[%s7076_s27 + $0x10] sm:$0xff] %vm254_vm11, %v4925_v20  ;;  %v4928_v19 = vmax.f32 %v4920_v8, 0.0  ;;  %v4919_v6 = vadd.f32 %v5158_v45, %v4904_v52  ;;  %v4907_v53 = vadd.f32 %v5575_v42, %v4761_v49 }
 0x35b   : > { %v4891_v11 = vpop.f32.mrf.mxu1 }
 0x35c   : > { %4936 = vst.msk [vmem:[%s7076_s27 + $0x28] sm:$0xff] %vm254_vm11, %v4928_v19  ;;  %v4927_v14 = vmax.f32 %v4919_v6, 0.0  ;;  %v4922_v40 = vadd.f32 %v5158_v45, %v4907_v53  ;;  %v4906_v35 = vadd.f32 %v4891_v11, %v4760_v30 }
 0x35e   : > { %4935 = vst.msk [vmem:[%s7076_s27 + $0x20] sm:$0xff] %vm254_vm11, %v4927_v14  ;;  %v4930_v21 = vmax.f32 %v4922_v40, 0.0  ;;  %v4921_v12 = vadd.f32 %v5158_v45, %v4906_v35 }
 0x360   : > { %4938 = vst.msk [vmem:[%s7076_s27 + $0x38] sm:$0xff] %vm254_vm11, %v4930_v21  ;;  %v4929_v41 = vmax.f32 %v4921_v12, 0.0 }
 0x362   : > { %4937 = vst.msk [vmem:[%s7076_s27 + $0x30] sm:$0xff] %vm254_vm11, %v4929_v41 }
 0x363 PF: > { %s15_s18 = sadd.s32 1, %s5626_s18  }
 0x364   : > { %p12_p5 = scmp.ge.s32.totalorder %s15_s18, 4  }
 0x366   :  { %14 = sbr.rel (!%p12_p5) target bundleno = 1 (0x1), region = 76 }

</bundles_post_ra>
